<compile_context>
chip_gen: v7x
topology: tpu7x:2x2x1
jax: 0.10.0
libtpu: 0.0.40
codegen_flags: <defaults>
</compile_context>

<pallas_src>
import functools

import jax
import jax.numpy as jnp
from jax import lax
from jax.experimental import pallas as pl
from jax.experimental.pallas import tpu as pltpu

_HP = lax.Precision.HIGHEST


def _encoder_kernel(x_ref, *rest, K, nb, chans, has_skip, has_gavg,
                    num_groups, eps):
  """Fused 3x ResidualConvBlock(dims=1) forward for nb batch rows per step."""
  o_ref, pscr = rest[-2], rest[-1]
  param_refs = rest[:-2]
  NK = nb * K

  # ---- unpack per-block parameter refs (static structure) ----
  blocks = []
  it = iter(param_refs)
  for bi in range(3):
    blk = {"wc1": next(it), "b1": next(it), "gamma": next(it), "beta": next(it)}
    if has_gavg[bi]:
      blk["gavg"] = next(it)
    blk["wc2"] = next(it)
    blk["b2"] = next(it)
    if has_skip[bi]:
      blk["wsk"] = next(it)
      blk["bsk"] = next(it)
    blocks.append(blk)

  def mm(a, b):
    return jnp.dot(a, b, preferred_element_type=jnp.float32, precision=_HP)

  # Row masks (hoisted, built once per grid step): zero the taps that would
  # otherwise leak across sample boundaries when the flattened (nb*K, C)
  # activation slab is shifted by one row.
  row_in_k = lax.broadcasted_iota(jnp.int32, (NK, 1), 0) % K
  m_last = (row_in_k != (K - 1)).astype(jnp.float32)   # kills h[b, K-1] feeding next sample's t=0
  m_first = (row_in_k != 0).astype(jnp.float32)        # kills h[b, 0] feeding prev sample's t=K-1

  def conv3(hf, c, w_ref, b_ref):
    """3-tap conv1d (pad=1) for all nb samples as ONE (NK,3C)@(3C,Cout) matmul."""
    # Patch layout: P[r, dk*C:(dk+1)*C] = h_flat[r-1+dk] within each sample,
    # zero at per-sample boundaries.
    zrow = jnp.zeros((1, c), jnp.float32)
    pscr[0:1, 0:c] = zrow                                 # never written below
    pscr[NK - 1:NK, 2 * c:3 * c] = zrow                   # never written below
    pscr[:, c:2 * c] = hf                                 # center tap
    pscr[1:NK, 0:c] = (hf * m_last)[0:NK - 1, :]          # left tap (t-1)
    pscr[0:NK - 1, 2 * c:3 * c] = (hf * m_first)[1:NK, :]  # right tap (t+1)
    return mm(pscr[:, 0:3 * c], w_ref[...]) + b_ref[...]

  def group_norm(hf, blk, c):
    """Per-sample GroupNorm(num_groups) on an (NK, C) slab; two-pass, f32."""
    cpg = c // num_groups
    cnt = jnp.float32(K * cpg)
    h3 = hf.reshape(nb, K, c)
    ch_sum = jnp.sum(h3, axis=1)                          # (nb, C) XLU reduce
    if "gavg" in blk:                                     # group mean per channel
      mean_c = mm(ch_sum, blk["gavg"][...])               # (nb,C)@(C,C), tiny
    else:                                                 # cpg == 1: identity
      mean_c = ch_sum * (1.0 / cnt)
    cent = h3 - mean_c[:, None, :]
    ch_vs = jnp.sum(cent * cent, axis=1)                  # (nb, C)
    if "gavg" in blk:
      var_c = mm(ch_vs, blk["gavg"][...])
    else:
      var_c = ch_vs * (1.0 / cnt)
    rstd = lax.rsqrt(var_c + eps)
    out3 = cent * rstd[:, None, :] * blk["gamma"][...] + blk["beta"][...]
    return out3.reshape(NK, c)

  def res_block(hf, cin, cout, blk, skip):
    h = conv3(hf, cin, blk["wc1"], blk["b1"])
    h = group_norm(h, blk, cout)
    h = h * jax.nn.sigmoid(h)                             # SiLU (EUP)
    h = conv3(h, cout, blk["wc2"], blk["b2"])
    if skip:                                              # 1x1 conv skip
      res = mm(hf, blk["wsk"][...]) + blk["bsk"][...]
    else:                                                 # nn.Identity skip
      res = hf
    return h + res

  y = x_ref[...]                                          # (NK, A)
  for bi in range(3):
    y = res_block(y, chans[bi], chans[bi + 1], blocks[bi], has_skip[bi])
  o_ref[...] = y.astype(o_ref.dtype)                      # one contiguous slab store


def action_condition_encoder(x_bka, params, *, num_groups=32, eps=1e-5,
                             batch_block=None):
  """Pallas ActionConditionEncoder.forward.  x_bka: (B, K, num_actions)."""
  B, K, A = x_bka.shape

  # Rows-per-grid-step: batch as many rows as possible into each MXU matmul,
  # but keep 2 "parallel" grid steps (feeds both v7x TensorCores) when that
  # still gives >=128 matmul rows.  Tiny batches -> single step (v5e/v6e).
  if batch_block is None:
    nb = B
    if B % 2 == 0 and ((B // 2) * K) % 8 == 0 and (B // 2) * K >= 128:
      nb = B // 2
  else:
    nb = int(batch_block)
  assert B % nb == 0, (B, nb)
  assert nb == B or (nb * K) % 8 == 0, (nb, K)

  flat = []          # flattened per-block weights in kernel order
  chans = [A]
  has_skip = []
  has_gavg = []

  cin = A
  for p in params["blocks"]:
    w1 = jnp.asarray(p["w1"], jnp.float32)                # torch (Cout, Cin, 3)
    cout = w1.shape[0]
    assert w1.shape[1] == cin and w1.shape[2] == 3
    assert cout % num_groups == 0, (cout, num_groups)
    cpg = cout // num_groups

    # conv weights -> im2col layout: Wm[dk*Cin + ci, co] = w[co, ci, dk]
    wc1 = jnp.transpose(w1, (2, 1, 0)).reshape(3 * cin, cout)
    wc2 = jnp.transpose(jnp.asarray(p["w2"], jnp.float32),
                        (2, 1, 0)).reshape(3 * cout, cout)

    blk_flat = [
        wc1,
        jnp.asarray(p["b1"], jnp.float32).reshape(1, cout),
        jnp.asarray(p["gw"], jnp.float32).reshape(1, cout),
        jnp.asarray(p["gb"], jnp.float32).reshape(1, cout),
    ]
    g = cpg > 1
    if g:
      # Group-average matrix: one tiny matmul does reduce+broadcast of GN stats.
      grp = jnp.arange(cout) // cpg
      gavg = (grp[:, None] == grp[None, :]).astype(jnp.float32) / float(K * cpg)
      blk_flat.append(gavg)
    blk_flat += [wc2, jnp.asarray(p["b2"], jnp.float32).reshape(1, cout)]
    skip = p.get("wsk") is not None
    assert skip == (cin != cout)        # mirrors the PyTorch module
    if skip:
      blk_flat.append(
          jnp.transpose(jnp.asarray(p["wsk"], jnp.float32)[:, :, 0], (1, 0)))
      blk_flat.append(jnp.asarray(p["bsk"], jnp.float32).reshape(1, cout))
    flat.extend(blk_flat)
    chans.append(cout)
    has_skip.append(skip)
    has_gavg.append(g)
    cin = cout

  c_out = chans[-1]
  cmax = max(chans)
  NKb = nb * K

  x2d = jnp.asarray(x_bka, jnp.float32).reshape(B * K, A)   # 'b k a' flattened

  kernel = functools.partial(
      _encoder_kernel, K=K, nb=nb, chans=tuple(chans),
      has_skip=tuple(has_skip), has_gavg=tuple(has_gavg),
      num_groups=num_groups, eps=eps)

  in_specs = [pl.BlockSpec((NKb, A), lambda n: (n, 0))]
  in_specs += [pl.BlockSpec(a.shape, lambda n: (0, 0)) for a in flat]

  out2d = pl.pallas_call(
      kernel,
      out_shape=jax.ShapeDtypeStruct((B * K, c_out), jnp.float32),
      grid=(B // nb,),
      in_specs=in_specs,
      out_specs=pl.BlockSpec((NKb, c_out), lambda n: (n, 0)),
      scratch_shapes=[pltpu.VMEM((NKb, 3 * cmax), jnp.float32)],
      compiler_params=pltpu.CompilerParams(
          dimension_semantics=("parallel",)),
  )(x2d, *flat)
  return out2d.reshape(B, K, c_out)


def make_params(key, num_actions, context_dim, *, num_groups=32):
  """Deterministic synthetic parameters with PyTorch-layout conv1d weights."""
  assert context_dim % 2 == 0
  chans = [num_actions, context_dim // 2, context_dim, context_dim]
  keys = jax.random.split(key, 3)
  blocks = []
  for i in range(3):
    cin, cout = chans[i], chans[i + 1]
    assert cout % num_groups == 0
    ks = jax.random.split(keys[i], 8)
    fan1 = cin * 3
    fan2 = cout * 3
    blk = {
        "w1": jax.random.normal(ks[0], (cout, cin, 3), jnp.float32) / jnp.sqrt(fan1),
        "b1": 0.05 * jax.random.normal(ks[1], (cout,), jnp.float32),
        "gw": 1.0 + 0.1 * jax.random.normal(ks[2], (cout,), jnp.float32),
        "gb": 0.1 * jax.random.normal(ks[3], (cout,), jnp.float32),
        "w2": jax.random.normal(ks[4], (cout, cout, 3), jnp.float32) / jnp.sqrt(fan2),
        "b2": 0.05 * jax.random.normal(ks[5], (cout,), jnp.float32),
    }
    if cin != cout:
      blk["wsk"] = jax.random.normal(ks[6], (cout, cin, 1), jnp.float32) / jnp.sqrt(cin)
      blk["bsk"] = 0.05 * jax.random.normal(ks[7], (cout,), jnp.float32)
    else:
      blk["wsk"] = None
      blk["bsk"] = None
    blocks.append(blk)
  return {"blocks": blocks}


def _ref_residual_block_1d(x_ncl, p, *, num_groups, eps):
  """Pure-JAX ResidualConvBlock(dims=1) mirroring the PyTorch module (NCL)."""
  dn = ("NCH", "OIH", "NCH")
  h = lax.conv_general_dilated(x_ncl, p["w1"], (1,), [(1, 1)],
                               dimension_numbers=dn, precision=_HP)
  h = h + p["b1"][None, :, None]
  N, C, L = h.shape
  g = h.reshape(N, num_groups, C // num_groups, L)
  mean = g.mean(axis=(2, 3), keepdims=True)
  var = ((g - mean) ** 2).mean(axis=(2, 3), keepdims=True)
  g = (g - mean) * lax.rsqrt(var + eps)
  h = g.reshape(N, C, L) * p["gw"][None, :, None] + p["gb"][None, :, None]
  h = h * jax.nn.sigmoid(h)
  h = lax.conv_general_dilated(h, p["w2"], (1,), [(1, 1)],
                               dimension_numbers=dn, precision=_HP)
  h = h + p["b2"][None, :, None]
  if p.get("wsk") is not None:
    skip = lax.conv_general_dilated(x_ncl, p["wsk"], (1,), [(0, 0)],
                                    dimension_numbers=dn, precision=_HP)
    skip = skip + p["bsk"][None, :, None]
  else:
    skip = x_ncl
  return h + skip


def ref_action_condition_encoder(x_bka, params, *, num_groups=32, eps=1e-5):
  """Pure-JAX reference for ActionConditionEncoder.forward."""
  x = jnp.transpose(jnp.asarray(x_bka, jnp.float32), (0, 2, 1))  # b k a -> b a k
  for p in params["blocks"]:
    x = _ref_residual_block_1d(x, p, num_groups=num_groups, eps=eps)
  return jnp.transpose(x, (0, 2, 1))                             # b c k -> b k c


if __name__ == "__main__":
  key = jax.random.PRNGKey(0)
  kx, kp = jax.random.split(key)

  B, K, num_actions, context_dim = 2, 16, 8, 64
  num_groups = 32          # guided_diffusion normalization() uses 32 groups

  x = jax.random.normal(kx, (B, K, num_actions), jnp.float32)   # (b, k, a)
  params = make_params(kp, num_actions, context_dim, num_groups=num_groups)

  out = jax.block_until_ready(
      action_condition_encoder(x, params, num_groups=num_groups))

  ref = ref_action_condition_encoder(x, params, num_groups=num_groups)
  assert out.shape == (B, K, context_dim), out.shape
  err = float(jnp.max(jnp.abs(out - ref)))
  assert bool(jnp.allclose(out, ref, rtol=1e-3, atol=1e-3)), err

  print("KERNEL_OK")
</pallas_src>

<mosaic_0001>
module attributes {stable_mosaic.version = 11 : i64} {
  func.func @_encoder_kernel(%arg0: i32, %arg1: memref<32x8xf32, #tpu.memory_space<vmem>>, %arg2: memref<24x32xf32, #tpu.memory_space<vmem>>, %arg3: memref<1x32xf32, #tpu.memory_space<vmem>>, %arg4: memref<1x32xf32, #tpu.memory_space<vmem>>, %arg5: memref<1x32xf32, #tpu.memory_space<vmem>>, %arg6: memref<96x32xf32, #tpu.memory_space<vmem>>, %arg7: memref<1x32xf32, #tpu.memory_space<vmem>>, %arg8: memref<8x32xf32, #tpu.memory_space<vmem>>, %arg9: memref<1x32xf32, #tpu.memory_space<vmem>>, %arg10: memref<96x64xf32, #tpu.memory_space<vmem>>, %arg11: memref<1x64xf32, #tpu.memory_space<vmem>>, %arg12: memref<1x64xf32, #tpu.memory_space<vmem>>, %arg13: memref<1x64xf32, #tpu.memory_space<vmem>>, %arg14: memref<64x64xf32, #tpu.memory_space<vmem>>, %arg15: memref<192x64xf32, #tpu.memory_space<vmem>>, %arg16: memref<1x64xf32, #tpu.memory_space<vmem>>, %arg17: memref<32x64xf32, #tpu.memory_space<vmem>>, %arg18: memref<1x64xf32, #tpu.memory_space<vmem>>, %arg19: memref<192x64xf32, #tpu.memory_space<vmem>>, %arg20: memref<1x64xf32, #tpu.memory_space<vmem>>, %arg21: memref<1x64xf32, #tpu.memory_space<vmem>>, %arg22: memref<1x64xf32, #tpu.memory_space<vmem>>, %arg23: memref<64x64xf32, #tpu.memory_space<vmem>>, %arg24: memref<192x64xf32, #tpu.memory_space<vmem>>, %arg25: memref<1x64xf32, #tpu.memory_space<vmem>>, %arg26: memref<32x64xf32, #tpu.memory_space<vmem>>, %arg27: memref<32x192xf32, #tpu.memory_space<vmem>>) attributes {dimension_semantics = [#tpu.dimension_semantics<parallel>], iteration_bounds = array<i64: 1>, scalar_prefetch = 0 : i64, scratch_operands = 1 : i64, tpu.core_type = #tpu.core_type<tc>, window_params = [{transform_indices = @transform_0, window_bounds = array<i64: 32, 8>}, {pipeline_mode = #tpu.pipeline_mode<synchronous>, transform_indices = @transform_1, window_bounds = array<i64: 24, 32>}, {pipeline_mode = #tpu.pipeline_mode<synchronous>, transform_indices = @transform_2, window_bounds = array<i64: 1, 32>}, {pipeline_mode = #tpu.pipeline_mode<synchronous>, transform_indices = @transform_3, window_bounds = array<i64: 1, 32>}, {pipeline_mode = #tpu.pipeline_mode<synchronous>, transform_indices = @transform_4, window_bounds = array<i64: 1, 32>}, {pipeline_mode = #tpu.pipeline_mode<synchronous>, transform_indices = @transform_5, window_bounds = array<i64: 96, 32>}, {pipeline_mode = #tpu.pipeline_mode<synchronous>, transform_indices = @transform_6, window_bounds = array<i64: 1, 32>}, {pipeline_mode = #tpu.pipeline_mode<synchronous>, transform_indices = @transform_7, window_bounds = array<i64: 8, 32>}, {pipeline_mode = #tpu.pipeline_mode<synchronous>, transform_indices = @transform_8, window_bounds = array<i64: 1, 32>}, {pipeline_mode = #tpu.pipeline_mode<synchronous>, transform_indices = @transform_9, window_bounds = array<i64: 96, 64>}, {pipeline_mode = #tpu.pipeline_mode<synchronous>, transform_indices = @transform_10, window_bounds = array<i64: 1, 64>}, {pipeline_mode = #tpu.pipeline_mode<synchronous>, transform_indices = @transform_11, window_bounds = array<i64: 1, 64>}, {pipeline_mode = #tpu.pipeline_mode<synchronous>, transform_indices = @transform_12, window_bounds = array<i64: 1, 64>}, {pipeline_mode = #tpu.pipeline_mode<synchronous>, transform_indices = @transform_13, window_bounds = array<i64: 64, 64>}, {pipeline_mode = #tpu.pipeline_mode<synchronous>, transform_indices = @transform_14, window_bounds = array<i64: 192, 64>}, {pipeline_mode = #tpu.pipeline_mode<synchronous>, transform_indices = @transform_15, window_bounds = array<i64: 1, 64>}, {pipeline_mode = #tpu.pipeline_mode<synchronous>, transform_indices = @transform_16, window_bounds = array<i64: 32, 64>}, {pipeline_mode = #tpu.pipeline_mode<synchronous>, transform_indices = @transform_17, window_bounds = array<i64: 1, 64>}, {pipeline_mode = #tpu.pipeline_mode<synchronous>, transform_indices = @transform_18, window_bounds = array<i64: 192, 64>}, {pipeline_mode = #tpu.pipeline_mode<synchronous>, transform_indices = @transform_19, window_bounds = array<i64: 1, 64>}, {pipeline_mode = #tpu.pipeline_mode<synchronous>, transform_indices = @transform_20, window_bounds = array<i64: 1, 64>}, {pipeline_mode = #tpu.pipeline_mode<synchronous>, transform_indices = @transform_21, window_bounds = array<i64: 1, 64>}, {pipeline_mode = #tpu.pipeline_mode<synchronous>, transform_indices = @transform_22, window_bounds = array<i64: 64, 64>}, {pipeline_mode = #tpu.pipeline_mode<synchronous>, transform_indices = @transform_23, window_bounds = array<i64: 192, 64>}, {pipeline_mode = #tpu.pipeline_mode<synchronous>, transform_indices = @transform_24, window_bounds = array<i64: 1, 64>}, {transform_indices = @transform_25, window_bounds = array<i64: 32, 64>}]} {
    %0 = tpu.iota {dimensions = array<i32: 0>} : vector<32x1xi32>
    %c16_i32 = arith.constant 16 : i32
    %c0_i32 = arith.constant 0 : i32
    %1 = arith.cmpi eq, %c16_i32, %c0_i32 : i32
    %c1_i32 = arith.constant 1 : i32
    %2 = arith.select %1, %c1_i32, %c16_i32 : i32
    %3 = vector.broadcast %2 : i32 to vector<32x1xi32>
    %4 = arith.remsi %0, %3 : vector<32x1xi32>
    %c0_i32_0 = arith.constant 0 : i32
    %5 = vector.broadcast %c0_i32_0 : i32 to vector<32x1xi32>
    %6 = arith.cmpi ne, %4, %5 : vector<32x1xi32>
    %c0_i32_1 = arith.constant 0 : i32
    %7 = vector.broadcast %c0_i32_1 : i32 to vector<32x1xi32>
    %8 = arith.cmpi slt, %4, %7 : vector<32x1xi32>
    %c0_i32_2 = arith.constant 0 : i32
    %9 = arith.cmpi slt, %2, %c0_i32_2 : i32
    %10 = vector.broadcast %9 : i1 to vector<32x1xi1>
    %11 = vector.broadcast %10 : vector<32x1xi1> to vector<32x1xi1>
    %12 = arith.xori %8, %11 : vector<32x1xi1>
    %13 = arith.andi %12, %6 : vector<32x1xi1>
    %14 = vector.broadcast %2 : i32 to vector<32x1xi32>
    %15 = arith.addi %4, %14 : vector<32x1xi32>
    %16 = arith.select %13, %15, %4 : vector<32x1xi1>, vector<32x1xi32>
    %c15_i32 = arith.constant 15 : i32
    %17 = vector.broadcast %c15_i32 : i32 to vector<32x1xi32>
    %18 = arith.cmpi ne, %16, %17 : vector<32x1xi32>
    %19 = arith.extui %18 : vector<32x1xi1> to vector<32x1xi32>
    %20 = arith.sitofp %19 : vector<32x1xi32> to vector<32x1xf32>
    %c0_i32_3 = arith.constant 0 : i32
    %21 = vector.broadcast %c0_i32_3 : i32 to vector<32x1xi32>
    %22 = arith.cmpi ne, %16, %21 : vector<32x1xi32>
    %23 = arith.extui %22 : vector<32x1xi1> to vector<32x1xi32>
    %24 = arith.sitofp %23 : vector<32x1xi32> to vector<32x1xf32>
    %c0 = arith.constant 0 : index
    %c0_4 = arith.constant 0 : index
    %25 = vector.load %arg1[%c0, %c0_4] : memref<32x8xf32, #tpu.memory_space<vmem>>, vector<32x8xf32>
    %cst = arith.constant 0.000000e+00 : f32
    %26 = vector.broadcast %cst : f32 to vector<1x8xf32>
    %c0_5 = arith.constant 0 : index
    %c0_6 = arith.constant 0 : index
    %27 = vector.load %arg27[%c0_5, %c0_6] : memref<32x192xf32, #tpu.memory_space<vmem>>, vector<1x8xf32>
    tpu.vector_store %arg27[%c0_5, %c0_6], %26 {strides = array<i32>} : memref<32x192xf32, #tpu.memory_space<vmem>>, vector<1x8xf32>,
    %c31 = arith.constant 31 : index
    %c16 = arith.constant 16 : index
    %28 = vector.load %arg27[%c31, %c16] : memref<32x192xf32, #tpu.memory_space<vmem>>, vector<1x8xf32>
    tpu.vector_store %arg27[%c31, %c16], %26 {strides = array<i32>} : memref<32x192xf32, #tpu.memory_space<vmem>>, vector<1x8xf32>,
    %c0_7 = arith.constant 0 : index
    %c8 = arith.constant 8 : index
    %29 = vector.load %arg27[%c0_7, %c8] : memref<32x192xf32, #tpu.memory_space<vmem>>, vector<32x8xf32>
    tpu.vector_store %arg27[%c0_7, %c8], %25 {strides = array<i32>} : memref<32x192xf32, #tpu.memory_space<vmem>>, vector<32x8xf32>,
    %30 = vector.broadcast %20 : vector<32x1xf32> to vector<32x8xf32>
    %31 = arith.mulf %25, %30 : vector<32x8xf32>
    %32 = vector.extract_strided_slice %31 {offsets = [0, 0], sizes = [31, 8], strides = [1, 1]} : vector<32x8xf32> to vector<31x8xf32>
    %c1 = arith.constant 1 : index
    %c0_8 = arith.constant 0 : index
    %33 = vector.load %arg27[%c1, %c0_8] : memref<32x192xf32, #tpu.memory_space<vmem>>, vector<31x8xf32>
    tpu.vector_store %arg27[%c1, %c0_8], %32 {strides = array<i32>} : memref<32x192xf32, #tpu.memory_space<vmem>>, vector<31x8xf32>,
    %34 = vector.broadcast %24 : vector<32x1xf32> to vector<32x8xf32>
    %35 = arith.mulf %25, %34 : vector<32x8xf32>
    %36 = vector.extract_strided_slice %35 {offsets = [1, 0], sizes = [31, 8], strides = [1, 1]} : vector<32x8xf32> to vector<31x8xf32>
    %c0_9 = arith.constant 0 : index
    %c16_10 = arith.constant 16 : index
    %37 = vector.load %arg27[%c0_9, %c16_10] : memref<32x192xf32, #tpu.memory_space<vmem>>, vector<31x8xf32>
    tpu.vector_store %arg27[%c0_9, %c16_10], %36 {strides = array<i32>} : memref<32x192xf32, #tpu.memory_space<vmem>>, vector<31x8xf32>,
    %c0_11 = arith.constant 0 : index
    %c0_12 = arith.constant 0 : index
    %38 = vector.load %arg27[%c0_11, %c0_12] : memref<32x192xf32, #tpu.memory_space<vmem>>, vector<32x24xf32>
    %c0_13 = arith.constant 0 : index
    %c0_14 = arith.constant 0 : index
    %39 = vector.load %arg2[%c0_13, %c0_14] : memref<24x32xf32, #tpu.memory_space<vmem>>, vector<24x32xf32>
    %cst_15 = arith.constant dense<0.000000e+00> : vector<32x32xf32>
    %40 = tpu.matmul %38, %39, %cst_15 {dimension_numbers = #tpu.dot_dimension_numbers<[1], [0], [0], [1], [0, 0, 1, 1], [], []>, precision = #tpu.contract_precision<fp32>} : vector<32x24xf32>, vector<24x32xf32>, vector<32x32xf32> -> vector<32x32xf32>
    %c0_16 = arith.constant 0 : index
    %c0_17 = arith.constant 0 : index
    %41 = vector.load %arg3[%c0_16, %c0_17] : memref<1x32xf32, #tpu.memory_space<vmem>>, vector<1x32xf32>
    %42 = vector.broadcast %41 : vector<1x32xf32> to vector<32x32xf32>
    %43 = arith.addf %40, %42 : vector<32x32xf32>
    %44 = vector.shape_cast %43 : vector<32x32xf32> to vector<2x16x32xf32>
    %cst_18 = arith.constant dense<0.000000e+00> : vector<2x32xf32>
    %45 = vector.multi_reduction <add>, %44, %cst_18 [1] : vector<2x16x32xf32> to vector<2x32xf32>
    %cst_19 = arith.constant 1.000000e+00 : f32
    %cst_20 = arith.constant 1.600000e+01 : f32
    %46 = arith.divf %cst_19, %cst_20 : f32
    %47 = vector.broadcast %46 : f32 to vector<2x32xf32>
    %48 = arith.mulf %45, %47 : vector<2x32xf32>
    %49 = vector.shape_cast %48 : vector<2x32xf32> to vector<2x1x32xf32>
    %50 = vector.broadcast %49 : vector<2x1x32xf32> to vector<2x16x32xf32>
    %51 = arith.subf %44, %50 : vector<2x16x32xf32>
    %52 = arith.mulf %51, %51 : vector<2x16x32xf32>
    %cst_21 = arith.constant dense<0.000000e+00> : vector<2x32xf32>
    %53 = vector.multi_reduction <add>, %52, %cst_21 [1] : vector<2x16x32xf32> to vector<2x32xf32>
    %cst_22 = arith.constant 1.000000e+00 : f32
    %cst_23 = arith.constant 1.600000e+01 : f32
    %54 = arith.divf %cst_22, %cst_23 : f32
    %55 = vector.broadcast %54 : f32 to vector<2x32xf32>
    %56 = arith.mulf %53, %55 : vector<2x32xf32>
    %cst_24 = arith.constant 9.99999974E-6 : f32
    %57 = vector.broadcast %cst_24 : f32 to vector<2x32xf32>
    %58 = arith.addf %56, %57 : vector<2x32xf32>
    %59 = math.rsqrt %58 : vector<2x32xf32>
    %60 = vector.shape_cast %59 : vector<2x32xf32> to vector<2x1x32xf32>
    %61 = vector.broadcast %60 : vector<2x1x32xf32> to vector<2x16x32xf32>
    %62 = arith.mulf %51, %61 : vector<2x16x32xf32>
    %c0_25 = arith.constant 0 : index
    %c0_26 = arith.constant 0 : index
    %63 = vector.load %arg4[%c0_25, %c0_26] : memref<1x32xf32, #tpu.memory_space<vmem>>, vector<1x32xf32>
    %64 = vector.shape_cast %63 : vector<1x32xf32> to vector<1x1x32xf32>
    %65 = vector.broadcast %64 : vector<1x1x32xf32> to vector<2x16x32xf32>
    %66 = arith.mulf %62, %65 : vector<2x16x32xf32>
    %c0_27 = arith.constant 0 : index
    %c0_28 = arith.constant 0 : index
    %67 = vector.load %arg5[%c0_27, %c0_28] : memref<1x32xf32, #tpu.memory_space<vmem>>, vector<1x32xf32>
    %68 = vector.shape_cast %67 : vector<1x32xf32> to vector<1x1x32xf32>
    %69 = vector.broadcast %68 : vector<1x1x32xf32> to vector<2x16x32xf32>
    %70 = arith.addf %66, %69 : vector<2x16x32xf32>
    %71 = vector.shape_cast %70 : vector<2x16x32xf32> to vector<32x32xf32>
    %72 = arith.negf %71 : vector<32x32xf32>
    %73 = math.exp %72 : vector<32x32xf32>
    %cst_29 = arith.constant 1.000000e+00 : f32
    %74 = vector.broadcast %cst_29 : f32 to vector<32x32xf32>
    %75 = arith.addf %74, %73 : vector<32x32xf32>
    %76 = arith.divf %74, %75 : vector<32x32xf32>
    %77 = arith.mulf %71, %76 : vector<32x32xf32>
    %cst_30 = arith.constant 0.000000e+00 : f32
    %78 = vector.broadcast %cst_30 : f32 to vector<1x32xf32>
    %c0_31 = arith.constant 0 : index
    %c0_32 = arith.constant 0 : index
    %79 = vector.load %arg27[%c0_31, %c0_32] : memref<32x192xf32, #tpu.memory_space<vmem>>, vector<1x32xf32>
    tpu.vector_store %arg27[%c0_31, %c0_32], %78 {strides = array<i32>} : memref<32x192xf32, #tpu.memory_space<vmem>>, vector<1x32xf32>,
    %c31_33 = arith.constant 31 : index
    %c64 = arith.constant 64 : index
    %80 = vector.load %arg27[%c31_33, %c64] : memref<32x192xf32, #tpu.memory_space<vmem>>, vector<1x32xf32>
    tpu.vector_store %arg27[%c31_33, %c64], %78 {strides = array<i32>} : memref<32x192xf32, #tpu.memory_space<vmem>>, vector<1x32xf32>,
    %c0_34 = arith.constant 0 : index
    %c32 = arith.constant 32 : index
    %81 = vector.load %arg27[%c0_34, %c32] : memref<32x192xf32, #tpu.memory_space<vmem>>, vector<32x32xf32>
    tpu.vector_store %arg27[%c0_34, %c32], %77 {strides = array<i32>} : memref<32x192xf32, #tpu.memory_space<vmem>>, vector<32x32xf32>,
    %82 = vector.broadcast %20 : vector<32x1xf32> to vector<32x32xf32>
    %83 = arith.mulf %77, %82 : vector<32x32xf32>
    %84 = vector.extract_strided_slice %83 {offsets = [0, 0], sizes = [31, 32], strides = [1, 1]} : vector<32x32xf32> to vector<31x32xf32>
    %c1_35 = arith.constant 1 : index
    %c0_36 = arith.constant 0 : index
    %85 = vector.load %arg27[%c1_35, %c0_36] : memref<32x192xf32, #tpu.memory_space<vmem>>, vector<31x32xf32>
    tpu.vector_store %arg27[%c1_35, %c0_36], %84 {strides = array<i32>} : memref<32x192xf32, #tpu.memory_space<vmem>>, vector<31x32xf32>,
    %86 = vector.broadcast %24 : vector<32x1xf32> to vector<32x32xf32>
    %87 = arith.mulf %77, %86 : vector<32x32xf32>
    %88 = vector.extract_strided_slice %87 {offsets = [1, 0], sizes = [31, 32], strides = [1, 1]} : vector<32x32xf32> to vector<31x32xf32>
    %c0_37 = arith.constant 0 : index
    %c64_38 = arith.constant 64 : index
    %89 = vector.load %arg27[%c0_37, %c64_38] : memref<32x192xf32, #tpu.memory_space<vmem>>, vector<31x32xf32>
    tpu.vector_store %arg27[%c0_37, %c64_38], %88 {strides = array<i32>} : memref<32x192xf32, #tpu.memory_space<vmem>>, vector<31x32xf32>,
    %c0_39 = arith.constant 0 : index
    %c0_40 = arith.constant 0 : index
    %90 = vector.load %arg27[%c0_39, %c0_40] : memref<32x192xf32, #tpu.memory_space<vmem>>, vector<32x96xf32>
    %c0_41 = arith.constant 0 : index
    %c0_42 = arith.constant 0 : index
    %91 = vector.load %arg6[%c0_41, %c0_42] : memref<96x32xf32, #tpu.memory_space<vmem>>, vector<96x32xf32>
    %cst_43 = arith.constant dense<0.000000e+00> : vector<32x32xf32>
    %92 = tpu.matmul %90, %91, %cst_43 {dimension_numbers = #tpu.dot_dimension_numbers<[1], [0], [0], [1], [0, 0, 1, 1], [], []>, precision = #tpu.contract_precision<fp32>} : vector<32x96xf32>, vector<96x32xf32>, vector<32x32xf32> -> vector<32x32xf32>
    %c0_44 = arith.constant 0 : index
    %c0_45 = arith.constant 0 : index
    %93 = vector.load %arg7[%c0_44, %c0_45] : memref<1x32xf32, #tpu.memory_space<vmem>>, vector<1x32xf32>
    %94 = vector.broadcast %93 : vector<1x32xf32> to vector<32x32xf32>
    %95 = arith.addf %92, %94 : vector<32x32xf32>
    %c0_46 = arith.constant 0 : index
    %c0_47 = arith.constant 0 : index
    %96 = vector.load %arg8[%c0_46, %c0_47] : memref<8x32xf32, #tpu.memory_space<vmem>>, vector<8x32xf32>
    %cst_48 = arith.constant dense<0.000000e+00> : vector<32x32xf32>
    %97 = tpu.matmul %25, %96, %cst_48 {dimension_numbers = #tpu.dot_dimension_numbers<[1], [0], [0], [1], [0, 0, 1, 1], [], []>, precision = #tpu.contract_precision<fp32>} : vector<32x8xf32>, vector<8x32xf32>, vector<32x32xf32> -> vector<32x32xf32>
    %c0_49 = arith.constant 0 : index
    %c0_50 = arith.constant 0 : index
    %98 = vector.load %arg9[%c0_49, %c0_50] : memref<1x32xf32, #tpu.memory_space<vmem>>, vector<1x32xf32>
    %99 = vector.broadcast %98 : vector<1x32xf32> to vector<32x32xf32>
    %100 = arith.addf %97, %99 : vector<32x32xf32>
    %101 = arith.addf %95, %100 : vector<32x32xf32>
    %cst_51 = arith.constant 0.000000e+00 : f32
    %102 = vector.broadcast %cst_51 : f32 to vector<1x32xf32>
    %c0_52 = arith.constant 0 : index
    %c0_53 = arith.constant 0 : index
    %103 = vector.load %arg27[%c0_52, %c0_53] : memref<32x192xf32, #tpu.memory_space<vmem>>, vector<1x32xf32>
    tpu.vector_store %arg27[%c0_52, %c0_53], %102 {strides = array<i32>} : memref<32x192xf32, #tpu.memory_space<vmem>>, vector<1x32xf32>,
    %c31_54 = arith.constant 31 : index
    %c64_55 = arith.constant 64 : index
    %104 = vector.load %arg27[%c31_54, %c64_55] : memref<32x192xf32, #tpu.memory_space<vmem>>, vector<1x32xf32>
    tpu.vector_store %arg27[%c31_54, %c64_55], %102 {strides = array<i32>} : memref<32x192xf32, #tpu.memory_space<vmem>>, vector<1x32xf32>,
    %c0_56 = arith.constant 0 : index
    %c32_57 = arith.constant 32 : index
    %105 = vector.load %arg27[%c0_56, %c32_57] : memref<32x192xf32, #tpu.memory_space<vmem>>, vector<32x32xf32>
    tpu.vector_store %arg27[%c0_56, %c32_57], %101 {strides = array<i32>} : memref<32x192xf32, #tpu.memory_space<vmem>>, vector<32x32xf32>,
    %106 = vector.broadcast %20 : vector<32x1xf32> to vector<32x32xf32>
    %107 = arith.mulf %101, %106 : vector<32x32xf32>
    %108 = vector.extract_strided_slice %107 {offsets = [0, 0], sizes = [31, 32], strides = [1, 1]} : vector<32x32xf32> to vector<31x32xf32>
    %c1_58 = arith.constant 1 : index
    %c0_59 = arith.constant 0 : index
    %109 = vector.load %arg27[%c1_58, %c0_59] : memref<32x192xf32, #tpu.memory_space<vmem>>, vector<31x32xf32>
    tpu.vector_store %arg27[%c1_58, %c0_59], %108 {strides = array<i32>} : memref<32x192xf32, #tpu.memory_space<vmem>>, vector<31x32xf32>,
    %110 = vector.broadcast %24 : vector<32x1xf32> to vector<32x32xf32>
    %111 = arith.mulf %101, %110 : vector<32x32xf32>
    %112 = vector.extract_strided_slice %111 {offsets = [1, 0], sizes = [31, 32], strides = [1, 1]} : vector<32x32xf32> to vector<31x32xf32>
    %c0_60 = arith.constant 0 : index
    %c64_61 = arith.constant 64 : index
    %113 = vector.load %arg27[%c0_60, %c64_61] : memref<32x192xf32, #tpu.memory_space<vmem>>, vector<31x32xf32>
    tpu.vector_store %arg27[%c0_60, %c64_61], %112 {strides = array<i32>} : memref<32x192xf32, #tpu.memory_space<vmem>>, vector<31x32xf32>,
    %c0_62 = arith.constant 0 : index
    %c0_63 = arith.constant 0 : index
    %114 = vector.load %arg27[%c0_62, %c0_63] : memref<32x192xf32, #tpu.memory_space<vmem>>, vector<32x96xf32>
    %c0_64 = arith.constant 0 : index
    %c0_65 = arith.constant 0 : index
    %115 = vector.load %arg10[%c0_64, %c0_65] : memref<96x64xf32, #tpu.memory_space<vmem>>, vector<96x64xf32>
    %cst_66 = arith.constant dense<0.000000e+00> : vector<32x64xf32>
    %116 = tpu.matmul %114, %115, %cst_66 {dimension_numbers = #tpu.dot_dimension_numbers<[1], [0], [0], [1], [0, 0, 1, 1], [], []>, precision = #tpu.contract_precision<fp32>} : vector<32x96xf32>, vector<96x64xf32>, vector<32x64xf32> -> vector<32x64xf32>
    %c0_67 = arith.constant 0 : index
    %c0_68 = arith.constant 0 : index
    %117 = vector.load %arg11[%c0_67, %c0_68] : memref<1x64xf32, #tpu.memory_space<vmem>>, vector<1x64xf32>
    %118 = vector.broadcast %117 : vector<1x64xf32> to vector<32x64xf32>
    %119 = arith.addf %116, %118 : vector<32x64xf32>
    %120 = vector.shape_cast %119 : vector<32x64xf32> to vector<2x16x64xf32>
    %cst_69 = arith.constant dense<0.000000e+00> : vector<2x64xf32>
    %121 = vector.multi_reduction <add>, %120, %cst_69 [1] : vector<2x16x64xf32> to vector<2x64xf32>
    %c0_70 = arith.constant 0 : index
    %c0_71 = arith.constant 0 : index
    %122 = vector.load %arg14[%c0_70, %c0_71] : memref<64x64xf32, #tpu.memory_space<vmem>>, vector<64x64xf32>
    %cst_72 = arith.constant dense<0.000000e+00> : vector<2x64xf32>
    %123 = tpu.matmul %121, %122, %cst_72 {dimension_numbers = #tpu.dot_dimension_numbers<[1], [0], [0], [1], [0, 0, 1, 1], [], []>, precision = #tpu.contract_precision<fp32>} : vector<2x64xf32>, vector<64x64xf32>, vector<2x64xf32> -> vector<2x64xf32>
    %124 = vector.shape_cast %123 : vector<2x64xf32> to vector<2x1x64xf32>
    %125 = vector.broadcast %124 : vector<2x1x64xf32> to vector<2x16x64xf32>
    %126 = arith.subf %120, %125 : vector<2x16x64xf32>
    %127 = arith.mulf %126, %126 : vector<2x16x64xf32>
    %cst_73 = arith.constant dense<0.000000e+00> : vector<2x64xf32>
    %128 = vector.multi_reduction <add>, %127, %cst_73 [1] : vector<2x16x64xf32> to vector<2x64xf32>
    %c0_74 = arith.constant 0 : index
    %c0_75 = arith.constant 0 : index
    %129 = vector.load %arg14[%c0_74, %c0_75] : memref<64x64xf32, #tpu.memory_space<vmem>>, vector<64x64xf32>
    %cst_76 = arith.constant dense<0.000000e+00> : vector<2x64xf32>
    %130 = tpu.matmul %128, %129, %cst_76 {dimension_numbers = #tpu.dot_dimension_numbers<[1], [0], [0], [1], [0, 0, 1, 1], [], []>, precision = #tpu.contract_precision<fp32>} : vector<2x64xf32>, vector<64x64xf32>, vector<2x64xf32> -> vector<2x64xf32>
    %cst_77 = arith.constant 9.99999974E-6 : f32
    %131 = vector.broadcast %cst_77 : f32 to vector<2x64xf32>
    %132 = arith.addf %130, %131 : vector<2x64xf32>
    %133 = math.rsqrt %132 : vector<2x64xf32>
    %134 = vector.shape_cast %133 : vector<2x64xf32> to vector<2x1x64xf32>
    %135 = vector.broadcast %134 : vector<2x1x64xf32> to vector<2x16x64xf32>
    %136 = arith.mulf %126, %135 : vector<2x16x64xf32>
    %c0_78 = arith.constant 0 : index
    %c0_79 = arith.constant 0 : index
    %137 = vector.load %arg12[%c0_78, %c0_79] : memref<1x64xf32, #tpu.memory_space<vmem>>, vector<1x64xf32>
    %138 = vector.shape_cast %137 : vector<1x64xf32> to vector<1x1x64xf32>
    %139 = vector.broadcast %138 : vector<1x1x64xf32> to vector<2x16x64xf32>
    %140 = arith.mulf %136, %139 : vector<2x16x64xf32>
    %c0_80 = arith.constant 0 : index
    %c0_81 = arith.constant 0 : index
    %141 = vector.load %arg13[%c0_80, %c0_81] : memref<1x64xf32, #tpu.memory_space<vmem>>, vector<1x64xf32>
    %142 = vector.shape_cast %141 : vector<1x64xf32> to vector<1x1x64xf32>
    %143 = vector.broadcast %142 : vector<1x1x64xf32> to vector<2x16x64xf32>
    %144 = arith.addf %140, %143 : vector<2x16x64xf32>
    %145 = vector.shape_cast %144 : vector<2x16x64xf32> to vector<32x64xf32>
    %146 = arith.negf %145 : vector<32x64xf32>
    %147 = math.exp %146 : vector<32x64xf32>
    %cst_82 = arith.constant 1.000000e+00 : f32
    %148 = vector.broadcast %cst_82 : f32 to vector<32x64xf32>
    %149 = arith.addf %148, %147 : vector<32x64xf32>
    %150 = arith.divf %148, %149 : vector<32x64xf32>
    %151 = arith.mulf %145, %150 : vector<32x64xf32>
    %cst_83 = arith.constant 0.000000e+00 : f32
    %152 = vector.broadcast %cst_83 : f32 to vector<1x64xf32>
    %c0_84 = arith.constant 0 : index
    %c0_85 = arith.constant 0 : index
    %153 = vector.load %arg27[%c0_84, %c0_85] : memref<32x192xf32, #tpu.memory_space<vmem>>, vector<1x64xf32>
    tpu.vector_store %arg27[%c0_84, %c0_85], %152 {strides = array<i32>} : memref<32x192xf32, #tpu.memory_space<vmem>>, vector<1x64xf32>,
    %c31_86 = arith.constant 31 : index
    %c128 = arith.constant 128 : index
    %154 = vector.load %arg27[%c31_86, %c128] : memref<32x192xf32, #tpu.memory_space<vmem>>, vector<1x64xf32>
    tpu.vector_store %arg27[%c31_86, %c128], %152 {strides = array<i32>} : memref<32x192xf32, #tpu.memory_space<vmem>>, vector<1x64xf32>,
    %c0_87 = arith.constant 0 : index
    %c64_88 = arith.constant 64 : index
    %155 = vector.load %arg27[%c0_87, %c64_88] : memref<32x192xf32, #tpu.memory_space<vmem>>, vector<32x64xf32>
    tpu.vector_store %arg27[%c0_87, %c64_88], %151 {strides = array<i32>} : memref<32x192xf32, #tpu.memory_space<vmem>>, vector<32x64xf32>,
    %156 = vector.broadcast %20 : vector<32x1xf32> to vector<32x64xf32>
    %157 = arith.mulf %151, %156 : vector<32x64xf32>
    %158 = vector.extract_strided_slice %157 {offsets = [0, 0], sizes = [31, 64], strides = [1, 1]} : vector<32x64xf32> to vector<31x64xf32>
    %c1_89 = arith.constant 1 : index
    %c0_90 = arith.constant 0 : index
    %159 = vector.load %arg27[%c1_89, %c0_90] : memref<32x192xf32, #tpu.memory_space<vmem>>, vector<31x64xf32>
    tpu.vector_store %arg27[%c1_89, %c0_90], %158 {strides = array<i32>} : memref<32x192xf32, #tpu.memory_space<vmem>>, vector<31x64xf32>,
    %160 = vector.broadcast %24 : vector<32x1xf32> to vector<32x64xf32>
    %161 = arith.mulf %151, %160 : vector<32x64xf32>
    %162 = vector.extract_strided_slice %161 {offsets = [1, 0], sizes = [31, 64], strides = [1, 1]} : vector<32x64xf32> to vector<31x64xf32>
    %c0_91 = arith.constant 0 : index
    %c128_92 = arith.constant 128 : index
    %163 = vector.load %arg27[%c0_91, %c128_92] : memref<32x192xf32, #tpu.memory_space<vmem>>, vector<31x64xf32>
    tpu.vector_store %arg27[%c0_91, %c128_92], %162 {strides = array<i32>} : memref<32x192xf32, #tpu.memory_space<vmem>>, vector<31x64xf32>,
    %c0_93 = arith.constant 0 : index
    %c0_94 = arith.constant 0 : index
    %164 = vector.load %arg27[%c0_93, %c0_94] : memref<32x192xf32, #tpu.memory_space<vmem>>, vector<32x192xf32>
    %c0_95 = arith.constant 0 : index
    %c0_96 = arith.constant 0 : index
    %165 = vector.load %arg15[%c0_95, %c0_96] : memref<192x64xf32, #tpu.memory_space<vmem>>, vector<192x64xf32>
    %cst_97 = arith.constant dense<0.000000e+00> : vector<32x64xf32>
    %166 = tpu.matmul %164, %165, %cst_97 {dimension_numbers = #tpu.dot_dimension_numbers<[1], [0], [0], [1], [0, 0, 1, 1], [], []>, precision = #tpu.contract_precision<fp32>} : vector<32x192xf32>, vector<192x64xf32>, vector<32x64xf32> -> vector<32x64xf32>
    %c0_98 = arith.constant 0 : index
    %c0_99 = arith.constant 0 : index
    %167 = vector.load %arg16[%c0_98, %c0_99] : memref<1x64xf32, #tpu.memory_space<vmem>>, vector<1x64xf32>
    %168 = vector.broadcast %167 : vector<1x64xf32> to vector<32x64xf32>
    %169 = arith.addf %166, %168 : vector<32x64xf32>
    %c0_100 = arith.constant 0 : index
    %c0_101 = arith.constant 0 : index
    %170 = vector.load %arg17[%c0_100, %c0_101] : memref<32x64xf32, #tpu.memory_space<vmem>>, vector<32x64xf32>
    %cst_102 = arith.constant dense<0.000000e+00> : vector<32x64xf32>
    %171 = tpu.matmul %101, %170, %cst_102 {dimension_numbers = #tpu.dot_dimension_numbers<[1], [0], [0], [1], [0, 0, 1, 1], [], []>, precision = #tpu.contract_precision<fp32>} : vector<32x32xf32>, vector<32x64xf32>, vector<32x64xf32> -> vector<32x64xf32>
    %c0_103 = arith.constant 0 : index
    %c0_104 = arith.constant 0 : index
    %172 = vector.load %arg18[%c0_103, %c0_104] : memref<1x64xf32, #tpu.memory_space<vmem>>, vector<1x64xf32>
    %173 = vector.broadcast %172 : vector<1x64xf32> to vector<32x64xf32>
    %174 = arith.addf %171, %173 : vector<32x64xf32>
    %175 = arith.addf %169, %174 : vector<32x64xf32>
    %cst_105 = arith.constant 0.000000e+00 : f32
    %176 = vector.broadcast %cst_105 : f32 to vector<1x64xf32>
    %c0_106 = arith.constant 0 : index
    %c0_107 = arith.constant 0 : index
    %177 = vector.load %arg27[%c0_106, %c0_107] : memref<32x192xf32, #tpu.memory_space<vmem>>, vector<1x64xf32>
    tpu.vector_store %arg27[%c0_106, %c0_107], %176 {strides = array<i32>} : memref<32x192xf32, #tpu.memory_space<vmem>>, vector<1x64xf32>,
    %c31_108 = arith.constant 31 : index
    %c128_109 = arith.constant 128 : index
    %178 = vector.load %arg27[%c31_108, %c128_109] : memref<32x192xf32, #tpu.memory_space<vmem>>, vector<1x64xf32>
    tpu.vector_store %arg27[%c31_108, %c128_109], %176 {strides = array<i32>} : memref<32x192xf32, #tpu.memory_space<vmem>>, vector<1x64xf32>,
    %c0_110 = arith.constant 0 : index
    %c64_111 = arith.constant 64 : index
    %179 = vector.load %arg27[%c0_110, %c64_111] : memref<32x192xf32, #tpu.memory_space<vmem>>, vector<32x64xf32>
    tpu.vector_store %arg27[%c0_110, %c64_111], %175 {strides = array<i32>} : memref<32x192xf32, #tpu.memory_space<vmem>>, vector<32x64xf32>,
    %180 = vector.broadcast %20 : vector<32x1xf32> to vector<32x64xf32>
    %181 = arith.mulf %175, %180 : vector<32x64xf32>
    %182 = vector.extract_strided_slice %181 {offsets = [0, 0], sizes = [31, 64], strides = [1, 1]} : vector<32x64xf32> to vector<31x64xf32>
    %c1_112 = arith.constant 1 : index
    %c0_113 = arith.constant 0 : index
    %183 = vector.load %arg27[%c1_112, %c0_113] : memref<32x192xf32, #tpu.memory_space<vmem>>, vector<31x64xf32>
    tpu.vector_store %arg27[%c1_112, %c0_113], %182 {strides = array<i32>} : memref<32x192xf32, #tpu.memory_space<vmem>>, vector<31x64xf32>,
    %184 = vector.broadcast %24 : vector<32x1xf32> to vector<32x64xf32>
    %185 = arith.mulf %175, %184 : vector<32x64xf32>
    %186 = vector.extract_strided_slice %185 {offsets = [1, 0], sizes = [31, 64], strides = [1, 1]} : vector<32x64xf32> to vector<31x64xf32>
    %c0_114 = arith.constant 0 : index
    %c128_115 = arith.constant 128 : index
    %187 = vector.load %arg27[%c0_114, %c128_115] : memref<32x192xf32, #tpu.memory_space<vmem>>, vector<31x64xf32>
    tpu.vector_store %arg27[%c0_114, %c128_115], %186 {strides = array<i32>} : memref<32x192xf32, #tpu.memory_space<vmem>>, vector<31x64xf32>,
    %c0_116 = arith.constant 0 : index
    %c0_117 = arith.constant 0 : index
    %188 = vector.load %arg27[%c0_116, %c0_117] : memref<32x192xf32, #tpu.memory_space<vmem>>, vector<32x192xf32>
    %c0_118 = arith.constant 0 : index
    %c0_119 = arith.constant 0 : index
    %189 = vector.load %arg19[%c0_118, %c0_119] : memref<192x64xf32, #tpu.memory_space<vmem>>, vector<192x64xf32>
    %cst_120 = arith.constant dense<0.000000e+00> : vector<32x64xf32>
    %190 = tpu.matmul %188, %189, %cst_120 {dimension_numbers = #tpu.dot_dimension_numbers<[1], [0], [0], [1], [0, 0, 1, 1], [], []>, precision = #tpu.contract_precision<fp32>} : vector<32x192xf32>, vector<192x64xf32>, vector<32x64xf32> -> vector<32x64xf32>
    %c0_121 = arith.constant 0 : index
    %c0_122 = arith.constant 0 : index
    %191 = vector.load %arg20[%c0_121, %c0_122] : memref<1x64xf32, #tpu.memory_space<vmem>>, vector<1x64xf32>
    %192 = vector.broadcast %191 : vector<1x64xf32> to vector<32x64xf32>
    %193 = arith.addf %190, %192 : vector<32x64xf32>
    %194 = vector.shape_cast %193 : vector<32x64xf32> to vector<2x16x64xf32>
    %cst_123 = arith.constant dense<0.000000e+00> : vector<2x64xf32>
    %195 = vector.multi_reduction <add>, %194, %cst_123 [1] : vector<2x16x64xf32> to vector<2x64xf32>
    %c0_124 = arith.constant 0 : index
    %c0_125 = arith.constant 0 : index
    %196 = vector.load %arg23[%c0_124, %c0_125] : memref<64x64xf32, #tpu.memory_space<vmem>>, vector<64x64xf32>
    %cst_126 = arith.constant dense<0.000000e+00> : vector<2x64xf32>
    %197 = tpu.matmul %195, %196, %cst_126 {dimension_numbers = #tpu.dot_dimension_numbers<[1], [0], [0], [1], [0, 0, 1, 1], [], []>, precision = #tpu.contract_precision<fp32>} : vector<2x64xf32>, vector<64x64xf32>, vector<2x64xf32> -> vector<2x64xf32>
    %198 = vector.shape_cast %197 : vector<2x64xf32> to vector<2x1x64xf32>
    %199 = vector.broadcast %198 : vector<2x1x64xf32> to vector<2x16x64xf32>
    %200 = arith.subf %194, %199 : vector<2x16x64xf32>
    %201 = arith.mulf %200, %200 : vector<2x16x64xf32>
    %cst_127 = arith.constant dense<0.000000e+00> : vector<2x64xf32>
    %202 = vector.multi_reduction <add>, %201, %cst_127 [1] : vector<2x16x64xf32> to vector<2x64xf32>
    %c0_128 = arith.constant 0 : index
    %c0_129 = arith.constant 0 : index
    %203 = vector.load %arg23[%c0_128, %c0_129] : memref<64x64xf32, #tpu.memory_space<vmem>>, vector<64x64xf32>
    %cst_130 = arith.constant dense<0.000000e+00> : vector<2x64xf32>
    %204 = tpu.matmul %202, %203, %cst_130 {dimension_numbers = #tpu.dot_dimension_numbers<[1], [0], [0], [1], [0, 0, 1, 1], [], []>, precision = #tpu.contract_precision<fp32>} : vector<2x64xf32>, vector<64x64xf32>, vector<2x64xf32> -> vector<2x64xf32>
    %cst_131 = arith.constant 9.99999974E-6 : f32
    %205 = vector.broadcast %cst_131 : f32 to vector<2x64xf32>
    %206 = arith.addf %204, %205 : vector<2x64xf32>
    %207 = math.rsqrt %206 : vector<2x64xf32>
    %208 = vector.shape_cast %207 : vector<2x64xf32> to vector<2x1x64xf32>
    %209 = vector.broadcast %208 : vector<2x1x64xf32> to vector<2x16x64xf32>
    %210 = arith.mulf %200, %209 : vector<2x16x64xf32>
    %c0_132 = arith.constant 0 : index
    %c0_133 = arith.constant 0 : index
    %211 = vector.load %arg21[%c0_132, %c0_133] : memref<1x64xf32, #tpu.memory_space<vmem>>, vector<1x64xf32>
    %212 = vector.shape_cast %211 : vector<1x64xf32> to vector<1x1x64xf32>
    %213 = vector.broadcast %212 : vector<1x1x64xf32> to vector<2x16x64xf32>
    %214 = arith.mulf %210, %213 : vector<2x16x64xf32>
    %c0_134 = arith.constant 0 : index
    %c0_135 = arith.constant 0 : index
    %215 = vector.load %arg22[%c0_134, %c0_135] : memref<1x64xf32, #tpu.memory_space<vmem>>, vector<1x64xf32>
    %216 = vector.shape_cast %215 : vector<1x64xf32> to vector<1x1x64xf32>
    %217 = vector.broadcast %216 : vector<1x1x64xf32> to vector<2x16x64xf32>
    %218 = arith.addf %214, %217 : vector<2x16x64xf32>
    %219 = vector.shape_cast %218 : vector<2x16x64xf32> to vector<32x64xf32>
    %220 = arith.negf %219 : vector<32x64xf32>
    %221 = math.exp %220 : vector<32x64xf32>
    %cst_136 = arith.constant 1.000000e+00 : f32
    %222 = vector.broadcast %cst_136 : f32 to vector<32x64xf32>
    %223 = arith.addf %222, %221 : vector<32x64xf32>
    %224 = arith.divf %222, %223 : vector<32x64xf32>
    %225 = arith.mulf %219, %224 : vector<32x64xf32>
    %cst_137 = arith.constant 0.000000e+00 : f32
    %226 = vector.broadcast %cst_137 : f32 to vector<1x64xf32>
    %c0_138 = arith.constant 0 : index
    %c0_139 = arith.constant 0 : index
    %227 = vector.load %arg27[%c0_138, %c0_139] : memref<32x192xf32, #tpu.memory_space<vmem>>, vector<1x64xf32>
    tpu.vector_store %arg27[%c0_138, %c0_139], %226 {strides = array<i32>} : memref<32x192xf32, #tpu.memory_space<vmem>>, vector<1x64xf32>,
    %c31_140 = arith.constant 31 : index
    %c128_141 = arith.constant 128 : index
    %228 = vector.load %arg27[%c31_140, %c128_141] : memref<32x192xf32, #tpu.memory_space<vmem>>, vector<1x64xf32>
    tpu.vector_store %arg27[%c31_140, %c128_141], %226 {strides = array<i32>} : memref<32x192xf32, #tpu.memory_space<vmem>>, vector<1x64xf32>,
    %c0_142 = arith.constant 0 : index
    %c64_143 = arith.constant 64 : index
    %229 = vector.load %arg27[%c0_142, %c64_143] : memref<32x192xf32, #tpu.memory_space<vmem>>, vector<32x64xf32>
    tpu.vector_store %arg27[%c0_142, %c64_143], %225 {strides = array<i32>} : memref<32x192xf32, #tpu.memory_space<vmem>>, vector<32x64xf32>,
    %230 = vector.broadcast %20 : vector<32x1xf32> to vector<32x64xf32>
    %231 = arith.mulf %225, %230 : vector<32x64xf32>
    %232 = vector.extract_strided_slice %231 {offsets = [0, 0], sizes = [31, 64], strides = [1, 1]} : vector<32x64xf32> to vector<31x64xf32>
    %c1_144 = arith.constant 1 : index
    %c0_145 = arith.constant 0 : index
    %233 = vector.load %arg27[%c1_144, %c0_145] : memref<32x192xf32, #tpu.memory_space<vmem>>, vector<31x64xf32>
    tpu.vector_store %arg27[%c1_144, %c0_145], %232 {strides = array<i32>} : memref<32x192xf32, #tpu.memory_space<vmem>>, vector<31x64xf32>,
    %234 = vector.broadcast %24 : vector<32x1xf32> to vector<32x64xf32>
    %235 = arith.mulf %225, %234 : vector<32x64xf32>
    %236 = vector.extract_strided_slice %235 {offsets = [1, 0], sizes = [31, 64], strides = [1, 1]} : vector<32x64xf32> to vector<31x64xf32>
    %c0_146 = arith.constant 0 : index
    %c128_147 = arith.constant 128 : index
    %237 = vector.load %arg27[%c0_146, %c128_147] : memref<32x192xf32, #tpu.memory_space<vmem>>, vector<31x64xf32>
    tpu.vector_store %arg27[%c0_146, %c128_147], %236 {strides = array<i32>} : memref<32x192xf32, #tpu.memory_space<vmem>>, vector<31x64xf32>,
    %c0_148 = arith.constant 0 : index
    %c0_149 = arith.constant 0 : index
    %238 = vector.load %arg27[%c0_148, %c0_149] : memref<32x192xf32, #tpu.memory_space<vmem>>, vector<32x192xf32>
    %c0_150 = arith.constant 0 : index
    %c0_151 = arith.constant 0 : index
    %239 = vector.load %arg24[%c0_150, %c0_151] : memref<192x64xf32, #tpu.memory_space<vmem>>, vector<192x64xf32>
    %cst_152 = arith.constant dense<0.000000e+00> : vector<32x64xf32>
    %240 = tpu.matmul %238, %239, %cst_152 {dimension_numbers = #tpu.dot_dimension_numbers<[1], [0], [0], [1], [0, 0, 1, 1], [], []>, precision = #tpu.contract_precision<fp32>} : vector<32x192xf32>, vector<192x64xf32>, vector<32x64xf32> -> vector<32x64xf32>
    %c0_153 = arith.constant 0 : index
    %c0_154 = arith.constant 0 : index
    %241 = vector.load %arg25[%c0_153, %c0_154] : memref<1x64xf32, #tpu.memory_space<vmem>>, vector<1x64xf32>
    %242 = vector.broadcast %241 : vector<1x64xf32> to vector<32x64xf32>
    %243 = arith.addf %240, %242 : vector<32x64xf32>
    %244 = arith.addf %243, %175 : vector<32x64xf32>
    %c0_155 = arith.constant 0 : index
    %c0_156 = arith.constant 0 : index
    %245 = vector.load %arg26[%c0_155, %c0_156] : memref<32x64xf32, #tpu.memory_space<vmem>>, vector<32x64xf32>
    tpu.vector_store %arg26[%c0_155, %c0_156], %244 {strides = array<i32>} : memref<32x64xf32, #tpu.memory_space<vmem>>, vector<32x64xf32>,
    return
  }
  func.func @transform_0(%arg0: i32) -> (i32, i32) {
    %c0_i32 = arith.constant 0 : i32
    %c0_i32_0 = arith.constant 0 : i32
    return %arg0, %c0_i32 : i32, i32
  }
  func.func @transform_1(%arg0: i32) -> (i32, i32) {
    %c0_i32 = arith.constant 0 : i32
    %c0_i32_0 = arith.constant 0 : i32
    %c0_i32_1 = arith.constant 0 : i32
    return %c0_i32, %c0_i32_0 : i32, i32
  }
  func.func @transform_2(%arg0: i32) -> (i32, i32) {
    %c0_i32 = arith.constant 0 : i32
    %c0_i32_0 = arith.constant 0 : i32
    %c0_i32_1 = arith.constant 0 : i32
    return %c0_i32, %c0_i32_0 : i32, i32
  }
  func.func @transform_3(%arg0: i32) -> (i32, i32) {
    %c0_i32 = arith.constant 0 : i32
    %c0_i32_0 = arith.constant 0 : i32
    %c0_i32_1 = arith.constant 0 : i32
    return %c0_i32, %c0_i32_0 : i32, i32
  }
  func.func @transform_4(%arg0: i32) -> (i32, i32) {
    %c0_i32 = arith.constant 0 : i32
    %c0_i32_0 = arith.constant 0 : i32
    %c0_i32_1 = arith.constant 0 : i32
    return %c0_i32, %c0_i32_0 : i32, i32
  }
  func.func @transform_5(%arg0: i32) -> (i32, i32) {
    %c0_i32 = arith.constant 0 : i32
    %c0_i32_0 = arith.constant 0 : i32
    %c0_i32_1 = arith.constant 0 : i32
    return %c0_i32, %c0_i32_0 : i32, i32
  }
  func.func @transform_6(%arg0: i32) -> (i32, i32) {
    %c0_i32 = arith.constant 0 : i32
    %c0_i32_0 = arith.constant 0 : i32
    %c0_i32_1 = arith.constant 0 : i32
    return %c0_i32, %c0_i32_0 : i32, i32
  }
  func.func @transform_7(%arg0: i32) -> (i32, i32) {
    %c0_i32 = arith.constant 0 : i32
    %c0_i32_0 = arith.constant 0 : i32
    %c0_i32_1 = arith.constant 0 : i32
    return %c0_i32, %c0_i32_0 : i32, i32
  }
  func.func @transform_8(%arg0: i32) -> (i32, i32) {
    %c0_i32 = arith.constant 0 : i32
    %c0_i32_0 = arith.constant 0 : i32
    %c0_i32_1 = arith.constant 0 : i32
    return %c0_i32, %c0_i32_0 : i32, i32
  }
  func.func @transform_9(%arg0: i32) -> (i32, i32) {
    %c0_i32 = arith.constant 0 : i32
    %c0_i32_0 = arith.constant 0 : i32
    %c0_i32_1 = arith.constant 0 : i32
    return %c0_i32, %c0_i32_0 : i32, i32
  }
  func.func @transform_10(%arg0: i32) -> (i32, i32) {
    %c0_i32 = arith.constant 0 : i32
    %c0_i32_0 = arith.constant 0 : i32
    %c0_i32_1 = arith.constant 0 : i32
    return %c0_i32, %c0_i32_0 : i32, i32
  }
  func.func @transform_11(%arg0: i32) -> (i32, i32) {
    %c0_i32 = arith.constant 0 : i32
    %c0_i32_0 = arith.constant 0 : i32
    %c0_i32_1 = arith.constant 0 : i32
    return %c0_i32, %c0_i32_0 : i32, i32
  }
  func.func @transform_12(%arg0: i32) -> (i32, i32) {
    %c0_i32 = arith.constant 0 : i32
    %c0_i32_0 = arith.constant 0 : i32
    %c0_i32_1 = arith.constant 0 : i32
    return %c0_i32, %c0_i32_0 : i32, i32
  }
  func.func @transform_13(%arg0: i32) -> (i32, i32) {
    %c0_i32 = arith.constant 0 : i32
    %c0_i32_0 = arith.constant 0 : i32
    %c0_i32_1 = arith.constant 0 : i32
    return %c0_i32, %c0_i32_0 : i32, i32
  }
  func.func @transform_14(%arg0: i32) -> (i32, i32) {
    %c0_i32 = arith.constant 0 : i32
    %c0_i32_0 = arith.constant 0 : i32
    %c0_i32_1 = arith.constant 0 : i32
    return %c0_i32, %c0_i32_0 : i32, i32
  }
  func.func @transform_15(%arg0: i32) -> (i32, i32) {
    %c0_i32 = arith.constant 0 : i32
    %c0_i32_0 = arith.constant 0 : i32
    %c0_i32_1 = arith.constant 0 : i32
    return %c0_i32, %c0_i32_0 : i32, i32
  }
  func.func @transform_16(%arg0: i32) -> (i32, i32) {
    %c0_i32 = arith.constant 0 : i32
    %c0_i32_0 = arith.constant 0 : i32
    %c0_i32_1 = arith.constant 0 : i32
    return %c0_i32, %c0_i32_0 : i32, i32
  }
  func.func @transform_17(%arg0: i32) -> (i32, i32) {
    %c0_i32 = arith.constant 0 : i32
    %c0_i32_0 = arith.constant 0 : i32
    %c0_i32_1 = arith.constant 0 : i32
    return %c0_i32, %c0_i32_0 : i32, i32
  }
  func.func @transform_18(%arg0: i32) -> (i32, i32) {
    %c0_i32 = arith.constant 0 : i32
    %c0_i32_0 = arith.constant 0 : i32
    %c0_i32_1 = arith.constant 0 : i32
    return %c0_i32, %c0_i32_0 : i32, i32
  }
  func.func @transform_19(%arg0: i32) -> (i32, i32) {
    %c0_i32 = arith.constant 0 : i32
    %c0_i32_0 = arith.constant 0 : i32
    %c0_i32_1 = arith.constant 0 : i32
    return %c0_i32, %c0_i32_0 : i32, i32
  }
  func.func @transform_20(%arg0: i32) -> (i32, i32) {
    %c0_i32 = arith.constant 0 : i32
    %c0_i32_0 = arith.constant 0 : i32
    %c0_i32_1 = arith.constant 0 : i32
    return %c0_i32, %c0_i32_0 : i32, i32
  }
  func.func @transform_21(%arg0: i32) -> (i32, i32) {
    %c0_i32 = arith.constant 0 : i32
    %c0_i32_0 = arith.constant 0 : i32
    %c0_i32_1 = arith.constant 0 : i32
    return %c0_i32, %c0_i32_0 : i32, i32
  }
  func.func @transform_22(%arg0: i32) -> (i32, i32) {
    %c0_i32 = arith.constant 0 : i32
    %c0_i32_0 = arith.constant 0 : i32
    %c0_i32_1 = arith.constant 0 : i32
    return %c0_i32, %c0_i32_0 : i32, i32
  }
  func.func @transform_23(%arg0: i32) -> (i32, i32) {
    %c0_i32 = arith.constant 0 : i32
    %c0_i32_0 = arith.constant 0 : i32
    %c0_i32_1 = arith.constant 0 : i32
    return %c0_i32, %c0_i32_0 : i32, i32
  }
  func.func @transform_24(%arg0: i32) -> (i32, i32) {
    %c0_i32 = arith.constant 0 : i32
    %c0_i32_0 = arith.constant 0 : i32
    %c0_i32_1 = arith.constant 0 : i32
    return %c0_i32, %c0_i32_0 : i32, i32
  }
  func.func @transform_25(%arg0: i32) -> (i32, i32) {
    %c0_i32 = arith.constant 0 : i32
    %c0_i32_0 = arith.constant 0 : i32
    return %arg0, %c0_i32 : i32, i32
  }
}

</mosaic_0001>

<bundles_post_ra>
// kernel: tpu_custom_call.1
= control target key start
LH: loop header
LB: loop body
LE: loop exit
PB: predicated region body
PF: predicated region fallthrough
CT: control target
= control target key end

     0   :  { %s16341_s0 = inlined_call_operand.vmem [shape: f32[32,8], index: 0, kind: input, shape index: {}]   ;;  %s16342_s1 = inlined_call_operand.vmem [shape: f32[24,32], index: 1, kind: input, shape index: {}]   ;;  %s16343_s2 = inlined_call_operand.vmem [shape: f32[1,32], index: 2, kind: input, shape index: {}]   ;;  %s16344_s3 = inlined_call_operand.vmem [shape: f32[1,32], index: 3, kind: input, shape index: {}]   ;;  %s16345_s4 = inlined_call_operand.vmem [shape: f32[1,32], index: 4, kind: input, shape index: {}]   ;;  %s16346_s5 = inlined_call_operand.vmem [shape: f32[96,32], index: 5, kind: input, shape index: {}]   ;;  %s16347_s6 = inlined_call_operand.vmem [shape: f32[1,32], index: 6, kind: input, shape index: {}]   ;;  %s16348_s7 = inlined_call_operand.vmem [shape: f32[8,32], index: 7, kind: input, shape index: {}]   ;;  %s16349_s8 = inlined_call_operand.vmem [shape: f32[1,32], index: 8, kind: input, shape index: {}]   ;;  %s16350_s9 = inlined_call_operand.vmem [shape: f32[96,64], index: 9, kind: input, shape index: {}]   ;;  %s16351_s10 = inlined_call_operand.vmem [shape: f32[1,64], index: 10, kind: input, shape index: {}]   ;;  %s16352_s11 = inlined_call_operand.vmem [shape: f32[1,64], index: 11, kind: input, shape index: {}]   ;;  %s16353_s12 = inlined_call_operand.vmem [shape: f32[1,64], index: 12, kind: input, shape index: {}]   ;;  %s16354_s13 = inlined_call_operand.vmem [shape: f32[64,64], index: 13, kind: input, shape index: {}]   ;;  %s16355_s14 = inlined_call_operand.vmem [shape: f32[192,64], index: 14, kind: input, shape index: {}]   ;;  %s16356_s15 = inlined_call_operand.vmem [shape: f32[1,64], index: 15, kind: input, shape index: {}]   ;;  %s16357_s16 = inlined_call_operand.vmem [shape: f32[32,64], index: 16, kind: input, shape index: {}]   ;;  %s16358_s17 = inlined_call_operand.vmem [shape: f32[1,64], index: 17, kind: input, shape index: {}]   ;;  %s16359_s18 = inlined_call_operand.vmem [shape: f32[192,64], index: 18, kind: input, shape index: {}]   ;;  %s16360_s19 = inlined_call_operand.vmem [shape: f32[1,64], index: 19, kind: input, shape index: {}]   ;;  %s16361_s20 = inlined_call_operand.vmem [shape: f32[1,64], index: 20, kind: input, shape index: {}]   ;;  %s16362_s21 = inlined_call_operand.vmem [shape: f32[1,64], index: 21, kind: input, shape index: {}]   ;;  %s16363_s22 = inlined_call_operand.vmem [shape: f32[64,64], index: 22, kind: input, shape index: {}]   ;;  %s16364_s23 = inlined_call_operand.vmem [shape: f32[192,64], index: 23, kind: input, shape index: {}]   ;;  %s16365_s24 = inlined_call_operand.vmem [shape: f32[1,64], index: 24, kind: input, shape index: {}]   ;;  %s16366_s25 = inlined_call_operand.hbm [shape: f32[32,64], index: 25, kind: output, shape index: {}]  }
   0x1   :  { %16509 = sst [smem:[#allocation29_spill]] %s16341_s0 }
   0x2   :  { %16510 = sst [smem:[#allocation30_spill]] %s16342_s1 }
   0x3   :  { %16511 = sst [smem:[#allocation31_spill]] %s16343_s2 }
   0x4   :  { %16512 = sst [smem:[#allocation32_spill]] %s16344_s3 }
   0x5   :  { %16513 = sst [smem:[#allocation33_spill]] %s16345_s4 }
   0x6   :  { %16514 = sst [smem:[#allocation34_spill]] %s16346_s5 }
   0x7   :  { %16515 = sst [smem:[#allocation35_spill]] %s16347_s6 }
   0x8   :  { %16516 = sst [smem:[#allocation36_spill]] %s16348_s7 }
   0x9   :  { %16517 = sst [smem:[#allocation37_spill]] %s16349_s8 }
   0xa   :  { %16518 = sst [smem:[#allocation38_spill]] %s16350_s9 }
   0xb   :  { %s16519_s6 = sld [smem:[#allocation29_spill]]  ;;  %v81_v1 = vlaneseq  ;;  %s12780_s30 = smov 8  }
   0xd   :  { %v12935_v4 = vshrl.u32 %v81_v1, 7 }
  0x11   :  { %v12923_v0 = vld [vmem:[%s16519_s6] sm:$0xff]  ;;  %v12930_v2 = vld [vmem:[%s16519_s6 + $0x18] sm:$0xff]  ;;  %v159_v3 = vld [vmem:[%s16519_s6 + $0x8] sm:$0xff] }
  0x12   :  { %170 = vrot.lane.b32.xlu0 %v12923_v0, %s12780_s30  ;;  %176 = vrot.lane.b32.xlu1 %v12930_v2, %s12780_s30 }
  0x13   :  { %30 = vsyncpa [#allocation4], 0  ;;  %v83_v5 = vadd.s32 8, %v12935_v4  ;;  %v85_v6 = vadd.s32 24, %v12935_v4  ;;  %v90_v7 = vand.u32 15, %v12935_v4  ;;  %v160_v10 = vld [vmem:[%s16519_s6 + $0x10] sm:$0xff] }
  0x14   :  { %v199_v11 = vrot.slane %v160_v10, 7  ;;  %vm221_vm1 = vcmask 1046528   ;;  %v16375_v12 = vmov 0.0   ;;  %v84_v14 = vadd.s32 16, %v12935_v4  ;;  %s12782_s4 = smov 16   ;;  %s16524_s5 = sld [smem:[#allocation30_spill]] }
  0x15   :  { %v97_v8 = vand.u32 15, %v83_v5  ;;  %v111_v9 = vand.u32 15, %v85_v6  ;;  %vm146_vm0 = vcmp.ne.s32.totalorder %v90_v7, 0  ;;  %v223_v18 = vrot.slane %v159_v3, 1  ;;  %s16525_s1 = sld [smem:[#allocation31_spill]]  ;;  %s16528_s2 = sld [smem:[#allocation34_spill]] }
  0x16   :  { %172 = vrot.lane.b32.xlu0 %v159_v3, %s12780_s30  ;;  %v12947_v13 = vsel %vm146_vm0, 1.0, %v16375_v12  ;;  %v104_v21 = vand.u32 15, %v84_v14  ;;  %vm162_vm4 = vcmask 57344   ;;  %v196_v22 = vrot.slane %v12923_v0, 7  ;;  %s12783_s26 = smov 32   ;;  %s12784_s28 = smov 64  }
  0x17   :  { %vm135_vm2 = vcmp.ne.s32.totalorder %v97_v8, 15  ;;  %vm137_vm3 = vcmp.ne.s32.totalorder %v111_v9, 15  ;;  %16520 = vst [vmem:[#allocation6_spill] sm:$0xff] %v12947_v13  ;;  %v213_v17 = vmul.f32 %v12947_v13, %v12923_v0  ;;  %163 = vst.msk [vmem:[#allocation2] sm:$0x1] %vm162_vm4, %v16375_v12  ;;  %vm195_vm5 = vcmask 1040384  }
  0x18   :  { %v12951_v15 = vsel %vm135_vm2, 1.0, %v16375_v12  ;;  %v12954_v16 = vsel %vm137_vm3, 1.0, %v16375_v12  ;;  %vm148_vm6 = vcmp.ne.s32.totalorder %v104_v21, 0  ;;  %vm164_vm7 = vcmask 188544   ;;  %s16533_s3 = sld [smem:[#allocation36_spill]]  ;;  %s16534_s7 = sld [smem:[#allocation38_spill]] }
  0x19   :  { %16521 = vst [vmem:[#allocation7_spill] sm:$0xff] %v12951_v15  ;;  %16522 = vst [vmem:[#allocation8_spill] sm:$0xff] %v12954_v16  ;;  %v188_v19 = vmul.f32 %v12951_v15, %v159_v3  ;;  %v190_v20 = vmul.f32 %v12954_v16, %v12930_v2  ;;  %v222_v23 = vrot.slane %v213_v17, 1  ;;  %v12966_v27 = vsel %vm148_vm6, 1.0, %v16375_v12 }
  0x1a   :  { %174 = vrot.lane.b32.xlu0 %v160_v10, %s12780_s30  ;;  %16523 = vst [vmem:[#allocation9_spill] sm:$0xff] %v12966_v27  ;;  %v227_v28 = vrot.slane %v12930_v2, 1  ;;  %165 = vst.msk [vmem:[#allocation2 + $0x37] sm:$0x1] %vm164_vm7, %v16375_v12  ;;  %v215_v29 = vmul.f32 %v12966_v27, %v160_v10  ;;  %v251_v33 = vld [vmem:[%s16524_s5] sm:$0xff]  ;;  %v252_v34 = vld [vmem:[%s16524_s5 + $0x8] sm:$0xff] }
  0x1b   :  { %v197_v24 = vrot.slane %v188_v19, 7  ;;  %v201_v25 = vrot.slane %v190_v20, 7  ;;  %v224_v26 = vsel %vm221_vm1, %v222_v23, %v223_v18  ;;  %v275_v36 = vand.u32 4294901760, %v251_v33  ;;  %v253_v43 = vld [vmem:[%s16524_s5 + $0x10] sm:$0xff]  ;;  %s16527_s5 = sld [smem:[#allocation33_spill]] }
  0x1c   :  { %229 = vrot.lane.b32.xlu1 %v224_v26, %s12782_s4  ;;  %v225_v35 = vrot.slane %v215_v29, 1  ;;  %v278_v37 = vand.u32 4294901760, %v252_v34  ;;  %v12989_v45 = vand.u32 4294901760, %v253_v43  ;;  %vm182_vm8 = vcmask 130112  }
  0x1d   :  { %v198_v30 = vsel %vm195_vm5, %v196_v22, %v197_v24  ;;  %v200_v31 = vsel %vm195_vm5, %v197_v24, %v199_v11  ;;  %v202_v32 = vsel %vm195_vm5, %v199_v11, %v201_v25  ;;  %v384_v41 = vsub.f32 %v251_v33, %v275_v36 }
  0x1e   :  { %v228_v38 = vsel %vm221_vm1, %v225_v35, %v227_v28  ;;  %v226_v39 = vsel %vm221_vm1, %v223_v18, %v225_v35  ;;  %v12982_v40 = vpack.c.bf16 %v278_v37, %v275_v36  ;;  %v391_v42 = vsub.f32 %v252_v34, %v278_v37  ;;  %v9562_v36 = vld [vmem:[%s16525_s1] ss:$0 sm:$0xff]  ;;  %s16536_s1 = sld [smem:[#allocation37_spill]] }
  0x1f   :  { %233 = vrot.lane.b32.xlu0 %v228_v38, %s12782_s4  ;;  %v385_v44 = vand.u32 4294901760, %v384_v41  ;;  %vm207_vm9 = vcmask 64513   ;;  %vm209_vm10 = vcmask 64512   ;;  %vm241_vm11 = vcmask 195712  }
  0x20   :  { %231 = vrot.lane.b32.xlu1 %v226_v39, %s12782_s4  ;;  %11137 = vmatprep.subr.bf16.mxu0 %v12982_v40  ;;  %v392_v46 = vand.u32 4294901760, %v391_v42  ;;  %v12996_v52 = vpack.c.bf16 %v391_v42, %v384_v41  ;;  %vm982_vm12 = vcmask 253952   ;;  %vm261_vm13 = vcmask 195584  }
  0x21   :  { %11139 = vmatpush3.bf16.msra.mxu0 %v12982_v40  ;;  %v386_v47 = vsub.f32 %v384_v41, %v385_v44  ;;  %vm245_vm14 = vcmask 194688   ;;  %v398_v1 = vsub.f32 %v253_v43, %v12989_v45  ;;  %vm984_vm15 = vcmask 778752  }
  0x22   :  { %10120 = vmatprep.subr.mxu0 %v12989_v45  ;;  %v393_v48 = vsub.f32 %v391_v42, %v392_v46  ;;  %v12998_v53 = vpack.c.bf16 %v392_v46, %v385_v44  ;;  %vm875_vm0 = vcmask 261120   ;;  %vm1002_vm2 = vcmask 523520  }
  0x23   :  { %v387_v49 = vand.u32 4294901760, %v386_v47  ;;  %v399_v11 = vand.u32 4294901760, %v398_v1  ;;  %vm1026_vm3 = vcmask 261121   ;;  %vm1058_vm4 = vcmask 785920  }
  0x24   :  { %235 = vrot.lane.b32.xlu1 %v227_v28, %s12782_s4  ;;  %v394_v50 = vand.u32 4294901760, %v393_v48  ;;  %s16526_s4 = sld [smem:[#allocation32_spill]]  ;;  %vm1087_vm6 = vcmask 785408   ;;  %vm1062_vm7 = vcmask 784896  }
  0x25   :  { %10121 = vmatpush3.msra.mxu0 %v12989_v45  ;;  %v400_v25 = vsub.f32 %v398_v1, %v399_v11 }
  0x26   :  { %v12993_v51 = vpack.c.bf16 %v394_v50, %v387_v49 }
  0x28   :  { %11141 = vmatprep.subr.bf16.mxu0 %v12993_v51 }
  0x84   :  { %v171_v54 = vpop.permute.xlu0 %170  ;;  %v177_v55 = vpop.permute.xlu1 %176 }
  0x85   :  { %183 = vst.msk [vmem:[#allocation2] sm:$0xff] %vm182_vm8, %v171_v54  ;;  %186 = vst.msk [vmem:[#allocation2 + $0x30] sm:$0xff] %vm182_vm8, %v177_v55 }
  0x86   :  { %208 = vst.msk [vmem:[#allocation2] sm:$0xfe] %vm207_vm9, %v196_v22  ;;  %vm12786_vm9 = vmmov 0  }
  0x87   :  { %212 = vst.msk [vmem:[#allocation2 + $0x30] sm:$0xff] %vm209_vm10, %v202_v32  ;;  %v401_v32 = vand.u32 4294901760, %v400_v25 }
  0x88   :  { %v173_v56 = vpop.permute.xlu0 %172 }
  0x89   :  { %184 = vst.msk [vmem:[#allocation2 + $0x10] sm:$0xff] %vm182_vm8, %v173_v56 }
  0x8a   :  { %210 = vst.msk [vmem:[#allocation2 + $0x10] sm:$0xff] %vm209_vm10, %v198_v30 }
  0x8c   :  { %v175_v57 = vpop.permute.xlu0 %174 }
  0x8d   :  { %185 = vst.msk [vmem:[#allocation2 + $0x20] sm:$0xff] %vm182_vm8, %v175_v57  ;;  %vm4501_vm8 = vcmask 516096  }
  0x8e   :  { %211 = vst.msk [vmem:[#allocation2 + $0x20] sm:$0xff] %vm209_vm10, %v200_v31  ;;  %v230_v58 = vpop.permute.xlu1 %229 }
  0x8f   :  { %242 = vst.msk [vmem:[#allocation2] sm:$0xff] %vm241_vm11, %v230_v58 }
  0x91   :  { %v234_v59 = vpop.permute.xlu0 %233 }
  0x92   :  { %v232_v60 = vpop.permute.xlu1 %231  ;;  %244 = vst.msk [vmem:[#allocation2 + $0x20] sm:$0xff] %vm241_vm11, %v234_v59 }
  0x93   :  { %243 = vst.msk [vmem:[#allocation2 + $0x10] sm:$0xff] %vm241_vm11, %v232_v60  ;;  %vm3271_vm11 = vcmask 1041409  }
  0x96   :  { %v247_v61 = vld [vmem:[#allocation2] sm:$0xff]  ;;  %v236_v62 = vpop.permute.xlu1 %235 }
  0x97   :  { %983 = vst.msk [vmem:[#allocation2] sm:$0x1] %vm982_vm12, %v16375_v12  ;;  %v263_v63 = vsel %vm261_vm13, %v247_v61, 0 }
  0x98   :  { %246 = vst.msk [vmem:[#allocation2 + $0x30] sm:$0x7f] %vm245_vm14, %v236_v62  ;;  %v13006_v0 = vand.u32 4294901760, %v263_v63  ;;  %vm4544_vm14 = vcmask 523265  }
  0x99   :  { %v249_v5 = vld [vmem:[#allocation2 + $0x20] sm:$0xff] }
  0x9a   :  { %v343_v2 = vsub.f32 %v263_v63, %v13006_v0  ;;  %v248_v3 = vld [vmem:[#allocation2 + $0x10] sm:$0xff]  ;;  %v269_v8 = vsel %vm261_vm13, %v249_v5, 0 }
  0x9b   :  { %v266_v7 = vsel %vm261_vm13, %v248_v3, 0  ;;  %v362_v10 = vand.u32 4294901760, %v269_v8 }
  0x9c   :  { %v344_v6 = vand.u32 4294901760, %v343_v2  ;;  %v352_v9 = vand.u32 4294901760, %v266_v7 }
  0x9d   :  { %v363_v19 = vsub.f32 %v269_v8, %v362_v10 }
  0x9e   :  { %v345_v14 = vsub.f32 %v343_v2, %v344_v6  ;;  %v353_v18 = vsub.f32 %v266_v7, %v352_v9 }
  0x9f   :  { %v250_v17 = vld [vmem:[#allocation2 + $0x30] sm:$0xff]  ;;  %v364_v23 = vand.u32 4294901760, %v363_v19 }
  0xa0   :  { %985 = vst.msk [vmem:[#allocation2 + $0x37] sm:$0x1] %vm984_vm15, %v16375_v12  ;;  %v346_v20 = vand.u32 4294901760, %v345_v14  ;;  %v272_v21 = vsel %vm261_vm13, %v250_v17, 0  ;;  %v354_v22 = vand.u32 4294901760, %v353_v18  ;;  %vm4520_vm13 = vcmask 1048064  }
  0xa1   :  { %v372_v24 = vand.u32 4294901760, %v272_v21  ;;  %v365_v28 = vsub.f32 %v363_v19, %v364_v23 }
  0xa2   :  { %10122 = vmatprep.mubr.f32.mxu0 %v346_v20  ;;  %v355_v26 = vsub.f32 %v353_v18, %v354_v22 }
  0xa3   :  { %v373_v29 = vsub.f32 %v272_v21, %v372_v24  ;;  %v366_v33 = vand.u32 4294901760, %v365_v28 }
  0xa4   :  { %v356_v30 = vand.u32 4294901760, %v355_v26 }
  0xa5   :  { %v374_v31 = vand.u32 4294901760, %v373_v29 }
  0xa6   :  { %10123 = vmatmul.mubr.f32.vlgmr.msra.gmra.mrb[0].mxu0 %v356_v30 }
  0xa7   :  { %v375_v34 = vsub.f32 %v373_v29, %v374_v31  ;;  %10125 = vmatprep.mubr.f32.mxu0 %v366_v33  ;;  %11143 = vmatpush3.bf16.msra.mxu0 %v12993_v51 }
  0xa8   :  { %10132 = vmatprep.subr.mxu0 %v401_v32 }
  0xa9   :  { %v376_v35 = vand.u32 4294901760, %v375_v34 }
  0xab   :  { %10126 = vmatmul.mubr.f32.gmra.mrb[2].mxu0 %v376_v35 }
  0xac   :  { %10133 = vmatpush3.msra.mxu0 %v401_v32  ;;  %10134 = vmatprep.mubr.f32.mxu0 %v13006_v0 }
  0xad   :  { %11145 = vmatprep.subr.bf16.mxu0 %v12996_v52 }
  0xaf   :  { %10135 = vmatmul.mubr.f32.vlgmr.msra.gmra.mrb[0].mxu0 %v352_v9 }
  0xb0   :  { %10137 = vmatprep.mubr.f32.mxu0 %v362_v10  ;;  %11147 = vmatpush3.bf16.msra.mxu0 %v12996_v52 }
  0xb1   :  { %10144 = vmatprep.subr.mxu0 %v398_v1 }
  0xb3   :  { %10138 = vmatmul.mubr.f32.gmra.mrb[2].mxu0 %v372_v24 }
  0xb4   :  { %10145 = vmatpush3.msra.mxu0 %v398_v1  ;;  %10146 = vmatprep.mubr.f32.mxu0 %v343_v2 }
  0xb5   :  { %11149 = vmatprep.subr.bf16.mxu0 %v12982_v40 }
  0xb7   :  { %10147 = vmatmul.mubr.f32.vlgmr.msra.gmra.mrb[0].mxu0 %v353_v18 }
  0xb8   :  { %10149 = vmatprep.mubr.f32.mxu0 %v363_v19  ;;  %11151 = vmatpush3.bf16.msra.mxu0 %v12982_v40 }
  0xb9   :  { %10156 = vmatprep.subr.mxu0 %v12989_v45 }
  0xbb   :  { %10150 = vmatmul.mubr.f32.gmra.mrb[2].mxu0 %v373_v29 }
  0xbc   :  { %10157 = vmatpush3.msra.mxu0 %v12989_v45  ;;  %10158 = vmatprep.mubr.f32.mxu0 %v344_v6 }
  0xbd   :  { %11153 = vmatprep.subr.bf16.mxu0 %v12998_v53 }
  0xbf   :  { %10159 = vmatmul.mubr.f32.vlgmr.msra.gmra.mrb[0].mxu0 %v354_v22 }
  0xc0   :  { %10161 = vmatprep.mubr.f32.mxu0 %v364_v23  ;;  %11155 = vmatpush3.bf16.msra.mxu0 %v12998_v53 }
  0xc1   :  { %10168 = vmatprep.subr.mxu0 %v399_v11 }
  0xc3   :  { %10162 = vmatmul.mubr.f32.gmra.mrb[2].mxu0 %v374_v31 }
  0xc4   :  { %10169 = vmatpush3.msra.mxu0 %v399_v11  ;;  %10170 = vmatprep.mubr.f32.mxu0 %v13006_v0 }
  0xc5   :  { %11157 = vmatprep.subr.bf16.mxu0 %v12982_v40 }
  0xc7   :  { %10171 = vmatmul.mubr.f32.vlgmr.msra.gmra.mrb[0].mxu0 %v352_v9 }
  0xc8   :  { %10173 = vmatprep.mubr.f32.mxu0 %v362_v10  ;;  %11159 = vmatpush3.bf16.msra.mxu0 %v12982_v40 }
  0xc9   :  { %10180 = vmatprep.subr.mxu0 %v12989_v45 }
  0xcb   :  { %10174 = vmatmul.mubr.f32.gmra.mrb[2].mxu0 %v372_v24 }
  0xcc   :  { %10181 = vmatpush3.msra.mxu0 %v12989_v45  ;;  %10182 = vmatprep.mubr.f32.mxu0 %v13006_v0 }
  0xcf   :  { %10183 = vmatmul.mubr.f32.vlgmr.msra.gmra.mrb[0].mxu0 %v352_v9 }
  0xd0   :  { %10185 = vmatprep.mubr.f32.mxu0 %v362_v10 }
  0xd3   :  { %10186 = vmatmul.mubr.f32.gmra.mrb[2].mxu0 %v372_v24 }
 0x1a2   :  { %v10184_v37 = vpop.f32.mrb[0].mxu0 }
 0x1a3   :  { %v12432_v38 = vadd.f32 %v10184_v37, %v9562_v36  ;;  %v853_v39 = vpop.f32.mrb[1].mxu0 }
 0x1a4   :  { %v12433_v41 = vadd.f32 %v9562_v36, %v853_v39 }
 0x1a5   :  { %v877_v40 = vsel %vm875_vm0, %v12432_v38, 0.0 }
 0x1a6   :  { %v876_v42 = vsel %vm875_vm0, %v12433_v41, 0.0  ;;  %v10187_v43 = vpop.f32.mrb[2].mxu0 }
 0x1a7   :  { %v878_v44 = vadd.f32 %v877_v40, %v876_v42  ;;  %v12434_v45 = vadd.f32 %v10187_v43, %v9562_v36  ;;  %v865_v46 = vpop.f32.mrb[3].mxu0  ;;  %v9564_v40 = vld [vmem:[%s16527_s5] ss:$0 sm:$0xff] }
 0x1a8   :  { %v12435_v47 = vadd.f32 %v9562_v36, %v865_v46 }
 0x1a9   :  { %v879_v48 = vrot.slane %v878_v44, 4  ;;  %v886_v49 = vsel %vm875_vm0, %v12434_v45, 0.0 }
 0x1aa   :  { %v885_v50 = vsel %vm875_vm0, %v12435_v47, 0.0 }
 0x1ab   :  { %v880_v51 = vadd.f32 %v879_v48, %v878_v44  ;;  %v887_v52 = vadd.f32 %v886_v49, %v885_v50 }
 0x1ad   :  { %v881_v53 = vrot.slane %v880_v51, 2  ;;  %v888_v54 = vrot.slane %v887_v52, 4 }
 0x1af   :  { %v882_v55 = vadd.f32 %v881_v53, %v880_v51  ;;  %v889_v56 = vadd.f32 %v888_v54, %v887_v52 }
 0x1b1   :  { %v883_v57 = vrot.slane %v882_v55, 1  ;;  %v890_v58 = vrot.slane %v889_v56, 2 }
 0x1b3   :  { %v884_v59 = vadd.f32 %v883_v57, %v882_v55  ;;  %v891_v60 = vadd.f32 %v890_v58, %v889_v56 }
 0x1b5   :  { %v894_v61 = vmul.f32 0.0625, %v884_v59  ;;  %v892_v62 = vrot.slane %v891_v60, 1 }
 0x1b7   :  { %v896_v63 = vsub.f32 %v12433_v41, %v894_v61  ;;  %v897_v0 = vsub.f32 %v12432_v38, %v894_v61  ;;  %v893_v1 = vadd.f32 %v892_v62, %v891_v60  ;;  %v9563_v38 = vld [vmem:[%s16526_s4] ss:$0 sm:$0xff]  ;;  %v13056_v62 = vld [vmem:[%s16528_s2 + $0x8] sm:$0xff] }
 0x1b8   :  { %v13051_v61 = vld [vmem:[%s16528_s2] sm:$0xff] }
 0x1b9   :  { %v900_v2 = vmul.f32 %v896_v63, %v896_v63  ;;  %v901_v3 = vmul.f32 %v897_v0, %v897_v0  ;;  %v895_v5 = vmul.f32 0.0625, %v893_v1 }
 0x1bb   :  { %v904_v6 = vsel %vm875_vm0, %v900_v2, 0.0  ;;  %v905_v7 = vsel %vm875_vm0, %v901_v3, 0.0  ;;  %v898_v8 = vsub.f32 %v12435_v47, %v895_v5  ;;  %v899_v9 = vsub.f32 %v12434_v45, %v895_v5 }
 0x1bc   :  { %v906_v10 = vadd.f32 %v905_v7, %v904_v6  ;;  %v13069_v7 = vld [vmem:[%s16528_s2 + $0x10] sm:$0xff] }
 0x1bd   :  { %v902_v11 = vmul.f32 %v898_v8, %v898_v8  ;;  %v903_v14 = vmul.f32 %v899_v9, %v899_v9 }
 0x1be   :  { %v907_v17 = vrot.slane %v906_v10, 4 }
 0x1bf   :  { %v913_v18 = vsel %vm875_vm0, %v902_v11, 0.0  ;;  %v914_v19 = vsel %vm875_vm0, %v903_v14, 0.0  ;;  %v13089_v14 = vld [vmem:[%s16528_s2 + $0x20] sm:$0xff] }
 0x1c0   :  { %v908_v20 = vadd.f32 %v907_v17, %v906_v10  ;;  %v915_v21 = vadd.f32 %v914_v19, %v913_v18  ;;  %v13094_v17 = vld [vmem:[%s16528_s2 + $0x28] sm:$0xff]  ;;  %v1113_v18 = vand.u32 4294901760, %v13089_v14 }
 0x1c1   :  { %v1116_v19 = vand.u32 4294901760, %v13094_v17 }
 0x1c2   :  { %v909_v22 = vrot.slane %v908_v20, 2  ;;  %v916_v23 = vrot.slane %v915_v21, 4 }
 0x1c4   :  { %v910_v24 = vadd.f32 %v909_v22, %v908_v20  ;;  %v917_v25 = vadd.f32 %v916_v23, %v915_v21  ;;  %v13104_v21 = vpack.c.bf16 %v1116_v19, %v1113_v18 }
 0x1c6   :  { %v911_v26 = vrot.slane %v910_v24, 1  ;;  %v918_v28 = vrot.slane %v917_v25, 2 }
 0x1c8   :  { %v912_v29 = vadd.f32 %v911_v26, %v910_v24  ;;  %v919_v30 = vadd.f32 %v918_v28, %v917_v25  ;;  %v13109_v24 = vld [vmem:[%s16528_s2 + $0x30] sm:$0xff]  ;;  %v13114_v25 = vld [vmem:[%s16528_s2 + $0x38] sm:$0xff] }
 0x1c9   :  { %v1119_v28 = vand.u32 4294901760, %v13109_v24 }
 0x1ca   :  { %v922_v31 = vmul.f32 0.0625, %v912_v29  ;;  %v920_v32 = vrot.slane %v919_v30, 1  ;;  %v1122_v29 = vand.u32 4294901760, %v13114_v25 }
 0x1cc   :  { %v924_v33 = vadd.f32 1e-05, %v922_v31  ;;  %v921_v34 = vadd.f32 %v920_v32, %v919_v30 }
 0x1ce   :  { %12696 = vrsqrt.f32 %v924_v33  ;;  %v923_v35 = vmul.f32 0.0625, %v921_v34  ;;  %v13132_v33 = vpack.c.bf16 %v1122_v29, %v1119_v28 }
 0x1d0   :  { %v925_v36 = vadd.f32 1e-05, %v923_v35 }
 0x1d2   :  { %12698 = vrsqrt.f32 %v925_v36 }
 0x1d8   :  { %v12697_v37 = vpop.eup %12696 }
 0x1d9   :  { %v928_v39 = vmul.f32 %v12697_v37, %v896_v63  ;;  %v929_v41 = vmul.f32 %v12697_v37, %v897_v0  ;;  %v1101_v63 = vand.u32 4294901760, %v13051_v61  ;;  %v1104_v0 = vand.u32 4294901760, %v13056_v62 }
 0x1db   :  { %v939_v42 = vmul.f32 %v9563_v38, %v928_v39  ;;  %v940_v43 = vmul.f32 %v9563_v38, %v929_v41  ;;  %v13064_v5 = vpack.c.bf16 %v1104_v0, %v1101_v63  ;;  %v13138_v39 = vld [vmem:[%s16528_s2 + $0x40] sm:$0xff]  ;;  %v13143_v41 = vld [vmem:[%s16528_s2 + $0x48] sm:$0xff] }
 0x1dc   :  { %v12699_v44 = vpop.eup %12698 }
 0x1dd   :  { %v930_v45 = vmul.f32 %v12699_v44, %v898_v8  ;;  %v931_v46 = vmul.f32 %v12699_v44, %v899_v9  ;;  %v951_v47 = vadd.f32 %v9564_v40, %v940_v43  ;;  %v950_v48 = vadd.f32 %v9564_v40, %v939_v42  ;;  %v13074_v8 = vld [vmem:[%s16528_s2 + $0x18] sm:$0xff]  ;;  %11161 = vmatprep.subr.bf16.mxu1 %v13064_v5 }
 0x1de   :  { %v1107_v9 = vand.u32 4294901760, %v13069_v7  ;;  %v1110_v10 = vand.u32 4294901760, %v13074_v8  ;;  %11163 = vmatpush3.bf16.msra.mxu1 %v13064_v5  ;;  %v1125_v43 = vand.u32 4294901760, %v13138_v39  ;;  %v1128_v44 = vand.u32 4294901760, %v13143_v41 }
 0x1df   :  { %v941_v49 = vmul.f32 %v9563_v38, %v930_v45  ;;  %v9566_v50 = vmul.f32 -1.442695, %v951_v47  ;;  %v9565_v51 = vmul.f32 -1.442695, %v950_v48  ;;  %v942_v52 = vmul.f32 %v9563_v38, %v931_v46 }
 0x1e0   :  { %v13084_v11 = vpack.c.bf16 %v1110_v10, %v1107_v9 }
 0x1e1   :  { %v952_v53 = vadd.f32 %v9564_v40, %v941_v49  ;;  %12700 = vpow2.f32 %v9566_v50  ;;  %v953_v54 = vadd.f32 %v9564_v40, %v942_v52 }
 0x1e2   :  { %12702 = vpow2.f32 %v9565_v51  ;;  %11165 = vmatprep.subr.bf16.mxu1 %v13084_v11  ;;  %v13161_v51 = vpack.c.bf16 %v1128_v44, %v1125_v43 }
 0x1e3   :  { %v9567_v55 = vmul.f32 -1.442695, %v952_v53  ;;  %v9568_v56 = vmul.f32 -1.442695, %v953_v54  ;;  %11167 = vmatpush3.bf16.msra.mxu1 %v13084_v11 }
 0x1e4   :  { %11169 = vmatprep.subr.bf16.mxu1 %v13104_v21 }
 0x1e5   :  { %12704 = vpow2.f32 %v9567_v55  ;;  %v1079_v55 = vld [vmem:[%s16528_s2 + $0x58] sm:$0xff] }
 0x1e6   :  { %12706 = vpow2.f32 %v9568_v56  ;;  %v13176_v56 = vsub.f32 %v13051_v61, %v1101_v63 }
 0x1e7   :  { %11171 = vmatpush3.bf16.msra.mxu1 %v13104_v21 }
 0x1e8   :  { %11173 = vmatprep.subr.bf16.mxu1 %v13132_v33 }
 0x1eb   :  { %v12701_v57 = vpop.eup %12700  ;;  %11175 = vmatpush3.bf16.msra.mxu1 %v13132_v33 }
 0x1ec   :  { %v12703_v58 = vpop.eup %12702  ;;  %v967_v59 = vadd.f32 1.0, %v12701_v57  ;;  %v13181_v57 = vsub.f32 %v13056_v62, %v1104_v0  ;;  %11177 = vmatprep.subr.bf16.mxu1 %v13161_v51  ;;  %v13198_v0 = vsub.f32 %v13069_v7, %v1107_v9 }
 0x1ed   :  { %v966_v60 = vadd.f32 1.0, %v12703_v58 }
 0x1ee   :  { %12708 = vrcp.f32 %v967_v59  ;;  %v1227_v61 = vand.u32 4294901760, %v13181_v57  ;;  %v1234_v7 = vand.u32 4294901760, %v13198_v0 }
 0x1ef   :  { %v12705_v1 = vpop.eup %12704  ;;  %12710 = vrcp.f32 %v966_v60  ;;  %v1134_v60 = vand.u32 4294901760, %v1079_v55  ;;  %11179 = vmatpush3.bf16.msra.mxu1 %v13161_v51 }
 0x1f0   :  { %v12707_v2 = vpop.eup %12706  ;;  %v968_v3 = vadd.f32 1.0, %v12705_v1 }
 0x1f1   :  { %v969_v6 = vadd.f32 1.0, %v12707_v2 }
 0x1f2   :  { %12712 = vrcp.f32 %v968_v3  ;;  %v1220_v3 = vand.u32 4294901760, %v13176_v56 }
 0x1f3   :  { %12714 = vrcp.f32 %v969_v6  ;;  %v13203_v6 = vsub.f32 %v13074_v8, %v1110_v10 }
 0x1f5   :  { %v1241_v9 = vand.u32 4294901760, %v13203_v6 }
 0x1f8   :  { %v12709_v20 = vpop.eup %12708 }
 0x1f9   :  { %v12711_v22 = vpop.eup %12710  ;;  %v979_v23 = vmul.f32 %v12709_v20, %v951_v47  ;;  %v1221_v20 = vsub.f32 %v13176_v56, %v1220_v3 }
 0x1fa   :  { %v13116_v26 = vmul.f32 %v12711_v22, %v950_v48  ;;  %v1228_v22 = vsub.f32 %v13181_v57, %v1227_v61 }
 0x1fb   :  { %992 = vrot.lane.b32.xlu1 %v979_v23, %s12783_s26  ;;  %v1008_v30 = vmul.f32 %v12951_v15, %v979_v23  ;;  %v1040_v38 = vrot.slane %v979_v23, 1  ;;  %v1222_v8 = vand.u32 4294901760, %v1221_v20  ;;  %v1235_v23 = vsub.f32 %v13198_v0, %v1234_v7 }
 0x1fc   :  { %v12713_v31 = vpop.eup %12712  ;;  %990 = vrot.lane.b32.xlu0 %v13116_v26, %s12783_s26  ;;  %v1031_v32 = vmul.f32 %v12947_v13, %v13116_v26  ;;  %v1015_v37 = vrot.slane %v13116_v26, 7  ;;  %v1229_v10 = vand.u32 4294901760, %v1228_v22 }
 0x1fd   :  { %v12715_v34 = vpop.eup %12714  ;;  %v980_v35 = vmul.f32 %v12713_v31, %v952_v53  ;;  %v1016_v36 = vrot.slane %v1008_v30, 7  ;;  %v1242_v30 = vsub.f32 %v13203_v6, %v1241_v9  ;;  %v13226_v31 = vsub.f32 %v13089_v14, %v1113_v18 }
 0x1fe   :  { %v1039_v40 = vrot.slane %v1031_v32, 1  ;;  %v981_v42 = vmul.f32 %v12715_v34, %v953_v54  ;;  %v1078_v54 = vld [vmem:[%s16528_s2 + $0x50] sm:$0xff]  ;;  %v13231_v32 = vsub.f32 %v13094_v17, %v1116_v19  ;;  %v13234_v34 = vpack.c.bf16 %v1229_v10, %v1222_v8 }
 0x1ff   :  { %v1033_v45 = vmul.f32 %v12966_v27, %v980_v35  ;;  %v13152_v46 = vsel %vm195_vm5, %v1015_v37, %v1016_v36  ;;  %v1018_v47 = vrot.slane %v980_v35, 7  ;;  %v1131_v59 = vand.u32 4294901760, %v1078_v54 }
 0x200   :  { %v1041_v48 = vsel %vm221_vm1, %v1039_v40, %v1040_v38  ;;  %v1010_v49 = vmul.f32 %v12954_v16, %v981_v42  ;;  %v1044_v50 = vrot.slane %v981_v42, 1  ;;  %v1255_v40 = vand.u32 4294901760, %v13231_v32 }
 0x201   :  { %1046 = vrot.lane.b32.xlu0 %v1041_v48, %s12784_s28  ;;  %v1042_v52 = vrot.slane %v1033_v45, 1  ;;  %v13165_v53 = vsel %vm195_vm5, %v1016_v36, %v1018_v47  ;;  %v13193_v63 = vpack.c.bf16 %v1134_v60, %v1131_v59  ;;  %v1243_v36 = vand.u32 4294901760, %v1242_v30 }
 0x202   :  { %v1020_v58 = vrot.slane %v1010_v49, 7  ;;  %v1256_v18 = vsub.f32 %v13231_v32, %v1255_v40  ;;  %v13251_v19 = vsub.f32 %v13109_v24, %v1119_v28  ;;  %v13268_v24 = vsub.f32 %v13138_v39, %v1125_v43 }
 0x203   :  { %v1043_v1 = vsel %vm221_vm1, %v1040_v38, %v1042_v52  ;;  %v1045_v2 = vsel %vm221_vm1, %v1042_v52, %v1044_v50  ;;  %11181 = vmatprep.subr.bf16.mxu1 %v13193_v63  ;;  %v1248_v38 = vand.u32 4294901760, %v13226_v31 }
 0x204   :  { %1048 = vrot.lane.b32.xlu1 %v1043_v1, %s12784_s28  ;;  %v13191_v62 = vsel %vm195_vm5, %v1018_v47, %v1020_v58  ;;  %11183 = vmatpush3.bf16.msra.mxu1 %v13193_v63  ;;  %v1257_v47 = vand.u32 4294901760, %v1256_v18  ;;  %v1262_v48 = vand.u32 4294901760, %v13251_v19  ;;  %v16374_v58 = vand.u32 4294901760, %v13268_v24 }
 0x205   :  { %994 = vrot.lane.b32.xlu0 %v980_v35, %s12783_s26  ;;  %v1236_v35 = vand.u32 4294901760, %v1235_v23  ;;  %11185 = vmatprep.subr.bf16.mxu1 %v13234_v34  ;;  %v1249_v17 = vsub.f32 %v13226_v31, %v1248_v38  ;;  %v13314_v18 = vpack.c.bf16 %v13231_v32, %v13226_v31  ;;  %v1818_v31 = vld [vmem:[%s16533_s3] sm:$0xff] }
 0x206   :  { %v1263_v52 = vsub.f32 %v13251_v19, %v1262_v48  ;;  %v1277_v39 = vsub.f32 %v13268_v24, %v16374_v58  ;;  %v12752_v32 = vld [vmem:[%s16519_s6] sm:$0xff] }
 0x207   :  { %v13240_v14 = vpack.c.bf16 %v1243_v36, %v1236_v35  ;;  %v1250_v45 = vand.u32 4294901760, %v1249_v17  ;;  %v13306_v36 = vpack.c.bf16 %v13181_v57, %v13176_v56  ;;  %v13310_v17 = vpack.c.bf16 %v13203_v6, %v13198_v0 }
 0x208   :  { %996 = vrot.lane.b32.xlu1 %v981_v42, %s12783_s26  ;;  %v13256_v42 = vsub.f32 %v13114_v25, %v1122_v29  ;;  %v13273_v25 = vsub.f32 %v13143_v41, %v1128_v44  ;;  %v1264_v29 = vand.u32 4294901760, %v1263_v52  ;;  %v13286_v41 = vsub.f32 %v1078_v54, %v1131_v59 }
 0x209   :  { %1050 = vrot.lane.b32.xlu0 %v1045_v2, %s12784_s28  ;;  %v13288_v44 = vsub.f32 %v1079_v55, %v1134_v60  ;;  %v1278_v22 = vand.u32 4294901760, %v1277_v39  ;;  %v11264_v56 = vpack.c.bf16 %v1255_v40, %v1248_v38  ;;  %v1826_v38 = vsel %vm209_vm10, %v12752_v32, 0 }
 0x20a   :  { %v1269_v49 = vand.u32 4294901760, %v13256_v42  ;;  %v16373_v1 = vand.u32 4294901760, %v13273_v25  ;;  %v16372_v10 = vand.u32 4294901760, %v13286_v41  ;;  %v16531_v6 = vand.u32 4294901760, %v13286_v41 }
 0x20b   :  { %v16371_v23 = vand.u32 4294901760, %v13288_v44  ;;  %v13326_v52 = vpack.c.bf16 %v13288_v44, %v13286_v41  ;;  %v13461_v40 = vand.u32 4294901760, %v1826_v38 }
 0x20c   :  { %1052 = vrot.lane.b32.xlu1 %v1044_v50, %s12784_s28  ;;  %v13260_v50 = vpack.c.bf16 %v1257_v47, %v1250_v45  ;;  %v1270_v28 = vsub.f32 %v13256_v42, %v1269_v49  ;;  %v1284_v43 = vsub.f32 %v13273_v25, %v16373_v1  ;;  %v1291_v35 = vsub.f32 %v13286_v41, %v16372_v10 }
 0x20d   :  { %v1298_v54 = vsub.f32 %v13288_v44, %v16371_v23  ;;  %v13318_v45 = vpack.c.bf16 %v13256_v42, %v13251_v19  ;;  %v13322_v47 = vpack.c.bf16 %v13273_v25, %v13268_v24  ;;  %v11268_v57 = vpack.c.bf16 %v1269_v49, %v1262_v48  ;;  %v12754_v19 = vld [vmem:[%s16519_s6 + $0x10] sm:$0xff] }
 0x20e   :  { %v1271_v2 = vand.u32 4294901760, %v1270_v28  ;;  %v1285_v8 = vand.u32 4294901760, %v1284_v43  ;;  %v1292_v55 = vand.u32 4294901760, %v1291_v35  ;;  %v1830_v42 = vsel %vm209_vm10, %v12754_v19, 0 }
 0x20f   :  { %v1299_v59 = vand.u32 4294901760, %v1298_v54 }
 0x210   :  { %v13290_v20 = vpack.c.bf16 %v1271_v2, %v1264_v29  ;;  %v13294_v30 = vpack.c.bf16 %v1285_v8, %v1278_v22 }
 0x211   :  { %v13302_v60 = vpack.c.bf16 %v1299_v59, %v1292_v55 }
 0x26d   :  { %v993_v28 = vpop.permute.xlu1 %992 }
 0x26e   :  { %1004 = vst.msk [vmem:[#allocation2 + $0x10] sm:$0xff] %vm1002_vm2, %v993_v28  ;;  %v991_v29 = vpop.permute.xlu0 %990 }
 0x26f   :  { %1003 = vst.msk [vmem:[#allocation2] sm:$0xff] %vm1002_vm2, %v991_v29 }
 0x270   :  { %1028 = vst.msk [vmem:[#allocation2 + $0x10] sm:$0xff] %vm875_vm0, %v13152_v46 }
 0x271   :  { %1027 = vst.msk [vmem:[#allocation2] sm:$0xfe] %vm1026_vm3, %v1015_v37 }
 0x273   :  { %v1047_v2 = vpop.permute.xlu0 %1046 }
 0x274   :  { %1059 = vst.msk [vmem:[#allocation2] sm:$0xff] %vm1058_vm4, %v1047_v2 }
 0x276   :  { %v1049_v39 = vpop.permute.xlu1 %1048 }
 0x277   :  { %1060 = vst.msk [vmem:[#allocation2 + $0x10] sm:$0xff] %vm1058_vm4, %v1049_v39  ;;  %v995_v43 = vpop.permute.xlu0 %994 }
 0x278   :  { %1005 = vst.msk [vmem:[#allocation2 + $0x20] sm:$0xff] %vm1002_vm2, %v995_v43 }
 0x279   :  { %1029 = vst.msk [vmem:[#allocation2 + $0x20] sm:$0xff] %vm875_vm0, %v13165_v53 }
 0x27a   :  { %v997_v22 = vpop.permute.xlu1 %996 }
 0x27b   :  { %v1064_v46 = vld [vmem:[#allocation2] sm:$0xff]  ;;  %1006 = vst.msk [vmem:[#allocation2 + $0x30] sm:$0xff] %vm1002_vm2, %v997_v22  ;;  %v1051_v26 = vpop.permute.xlu0 %1050 }
 0x27c   :  { %2413 = vst.msk [vmem:[#allocation2] sm:$0x1] %vm982_vm12, %v16375_v12  ;;  %v1089_v37 = vsel %vm1087_vm6, %v1064_v46, 0  ;;  %vm4571_vm12 = vcmask 522240  }
 0x27d   :  { %1061 = vst.msk [vmem:[#allocation2 + $0x20] sm:$0xff] %vm1058_vm4, %v1051_v26  ;;  %v13347_v8 = vand.u32 4294901760, %v1089_v37 }
 0x27e   :  { %1030 = vst.msk [vmem:[#allocation2 + $0x30] sm:$0xff] %vm875_vm0, %v13191_v62  ;;  %v1053_v53 = vpop.permute.xlu1 %1052  ;;  %v1065_v35 = vld [vmem:[#allocation2 + $0x10] sm:$0xff] }
 0x27f   :  { %1063 = vst.msk [vmem:[#allocation2 + $0x30] sm:$0x7f] %vm1062_vm7, %v1053_v53  ;;  %v13351_v54 = vsub.f32 %v1089_v37, %v13347_v8  ;;  %v1092_v55 = vsel %vm1087_vm6, %v1065_v35, 0 }
 0x280   :  { %v13354_v59 = vand.u32 4294901760, %v1092_v55 }
 0x281   :  { %v1179_v28 = vand.u32 4294901760, %v13351_v54 }
 0x282   :  { %v13358_v62 = vsub.f32 %v1092_v55, %v13354_v59 }
 0x283   :  { %v1180_v29 = vsub.f32 %v13351_v54, %v1179_v28 }
 0x284   :  { %v1066_v2 = vld [vmem:[#allocation2 + $0x20] sm:$0xff]  ;;  %v1189_v39 = vand.u32 4294901760, %v13358_v62 }
 0x285   :  { %v1095_v43 = vsel %vm1087_vm6, %v1066_v2, 0  ;;  %v1181_v22 = vand.u32 4294901760, %v1180_v29 }
 0x286   :  { %v13363_v46 = vand.u32 4294901760, %v1095_v43  ;;  %v1067_v26 = vld [vmem:[#allocation2 + $0x30] sm:$0xff]  ;;  %v1190_v37 = vsub.f32 %v13358_v62, %v1189_v39 }
 0x287   :  { %2414 = vst.msk [vmem:[#allocation2 + $0x37] sm:$0x1] %vm984_vm15, %v16375_v12  ;;  %10212 = vmatprep.mubr.f32.mxu1 %v1181_v22  ;;  %v1098_v35 = vsel %vm1087_vm6, %v1067_v26, 0 }
 0x288   :  { %v1198_v53 = vsub.f32 %v1095_v43, %v13363_v46  ;;  %v1191_v55 = vand.u32 4294901760, %v1190_v37  ;;  %v13372_v23 = vand.u32 4294901760, %v1098_v35 }
 0x28a   :  { %v1199_v2 = vand.u32 4294901760, %v1198_v53  ;;  %10213 = vmatmul.mubr.f32.vlgmr.msra.gmra.mrb[0].mxu1 %v1191_v55  ;;  %v1208_v29 = vsub.f32 %v1098_v35, %v13372_v23 }
 0x28b   :  { %11187 = vmatpush3.bf16.msra.mxu1 %v13234_v34  ;;  %v11260_v34 = vpack.c.bf16 %v1241_v9, %v1234_v7  ;;  %v16532_v7 = vand.u32 4294901760, %v13288_v44 }
 0x28c   :  { %v1200_v10 = vsub.f32 %v1198_v53, %v1199_v2  ;;  %11189 = vmatprep.subr.bf16.mxu1 %v13240_v14  ;;  %v1209_v1 = vand.u32 4294901760, %v1208_v29 }
 0x28d   :  { %v11276_v9 = vpack.c.bf16 %v16532_v7, %v16531_v6 }
 0x28e   :  { %v1201_v58 = vand.u32 4294901760, %v1200_v10  ;;  %v1210_v12 = vsub.f32 %v1208_v29, %v1209_v1 }
 0x28f   :  { %11191 = vmatpush3.bf16.msra.mxu1 %v13240_v14  ;;  %v12753_v14 = vld [vmem:[%s16519_s6 + $0x8] sm:$0xff] }
 0x290   :  { %10215 = vmatprep.mubr.f32.mxu1 %v1201_v58  ;;  %11193 = vmatprep.subr.bf16.mxu1 %v13260_v50  ;;  %v1211_v43 = vand.u32 4294901760, %v1210_v12  ;;  %v11256_v12 = vpack.c.bf16 %v1227_v61, %v1220_v3  ;;  %v16529_v3 = vand.u32 4294901760, %v13268_v24  ;;  %v16530_v61 = vand.u32 4294901760, %v13273_v25  ;;  %v12755_v24 = vld [vmem:[%s16519_s6 + $0x18] sm:$0xff]  ;;  %s16535_s6 = sld [smem:[#allocation35_spill]] }
 0x291   :  { %v1920_v25 = vand.u32 4294901760, %v1830_v42 }
 0x292   :  { %10216 = vmatmul.mubr.f32.gmra.mrb[2].mxu1 %v1211_v43  ;;  %v11272_v0 = vpack.c.bf16 %v16530_v61, %v16529_v3  ;;  %v2495_v43 = vld [vmem:[%s16534_s7 + $0x10] sm:$0xff]  ;;  %v2497_v61 = vld [vmem:[%s16534_s7 + $0x20] sm:$0xff] }
 0x293   :  { %11195 = vmatpush3.bf16.msra.mxu1 %v13260_v50  ;;  %10242 = vmatprep.mubr.f32.mxu1 %v13347_v8  ;;  %v1901_v50 = vsub.f32 %v1826_v38, %v13461_v40  ;;  %v1921_v44 = vsub.f32 %v1830_v42, %v1920_v25 }
 0x294   :  { %11197 = vmatprep.subr.bf16.mxu1 %v13290_v20 }
 0x297   :  { %11199 = vmatpush3.bf16.msra.mxu1 %v13290_v20  ;;  %v1902_v20 = vand.u32 4294901760, %v1901_v50 }
 0x298   :  { %11201 = vmatprep.subr.bf16.mxu1 %v13294_v30 }
 0x29b   :  { %11203 = vmatpush3.bf16.msra.mxu1 %v13294_v30 }
 0x29c   :  { %11205 = vmatprep.subr.bf16.mxu1 %v13302_v60 }
 0x29f   :  { %11207 = vmatpush3.bf16.msra.mxu1 %v13302_v60 }
 0x2a0   :  { %11209 = vmatprep.subr.bf16.mxu1 %v13306_v36 }
 0x2a2   :  { %10243 = vmatmul.mubr.f32.vlgmr.msra.gmra.mrb[0].mxu1 %v13354_v59 }
 0x2a3   :  { %10245 = vmatprep.mubr.f32.mxu1 %v13363_v46  ;;  %11211 = vmatpush3.bf16.msra.mxu1 %v13306_v36  ;;  %v1903_v36 = vsub.f32 %v1901_v50, %v1902_v20 }
 0x2a4   :  { %11213 = vmatprep.subr.bf16.mxu1 %v13310_v17 }
 0x2a6   :  { %10246 = vmatmul.mubr.f32.gmra.mrb[2].mxu1 %v13372_v23 }
 0x2a7   :  { %11215 = vmatpush3.bf16.msra.mxu1 %v13310_v17  ;;  %10272 = vmatprep.mubr.f32.mxu1 %v13351_v54  ;;  %v1922_v17 = vand.u32 4294901760, %v1921_v44 }
 0x2a8   :  { %11217 = vmatprep.subr.bf16.mxu1 %v13314_v18 }
 0x2ab   :  { %11219 = vmatpush3.bf16.msra.mxu1 %v13314_v18 }
 0x2ac   :  { %11221 = vmatprep.subr.bf16.mxu1 %v13318_v45 }
 0x2af   :  { %11223 = vmatpush3.bf16.msra.mxu1 %v13318_v45 }
 0x2b0   :  { %11225 = vmatprep.subr.bf16.mxu1 %v13322_v47 }
 0x2b3   :  { %11227 = vmatpush3.bf16.msra.mxu1 %v13322_v47  ;;  %v1923_v47 = vsub.f32 %v1921_v44, %v1922_v17 }
 0x2b4   :  { %11229 = vmatprep.subr.bf16.mxu1 %v13326_v52 }
 0x2b7   :  { %11231 = vmatpush3.bf16.msra.mxu1 %v13326_v52 }
 0x2b8   :  { %11233 = vmatprep.subr.bf16.mxu1 %v13064_v5 }
 0x2ba   :  { %10273 = vmatmul.mubr.f32.vlgmr.msra.gmra.mrb[0].mxu1 %v13358_v62 }
 0x2bb   :  { %10275 = vmatprep.mubr.f32.mxu1 %v1198_v53  ;;  %11235 = vmatpush3.bf16.msra.mxu1 %v13064_v5 }
 0x2bc   :  { %11237 = vmatprep.subr.bf16.mxu1 %v13084_v11 }
 0x2be   :  { %10276 = vmatmul.mubr.f32.gmra.mrb[2].mxu1 %v1208_v29 }
 0x2bf   :  { %11239 = vmatpush3.bf16.msra.mxu1 %v13084_v11  ;;  %10302 = vmatprep.mubr.f32.mxu1 %v1179_v28 }
 0x2c0   :  { %11241 = vmatprep.subr.bf16.mxu1 %v13104_v21 }
 0x2c3   :  { %11243 = vmatpush3.bf16.msra.mxu1 %v13104_v21 }
 0x2c4   :  { %11245 = vmatprep.subr.bf16.mxu1 %v13132_v33 }
 0x2c7   :  { %11247 = vmatpush3.bf16.msra.mxu1 %v13132_v33 }
 0x2c8   :  { %11249 = vmatprep.subr.bf16.mxu1 %v13161_v51 }
 0x2cb   :  { %11251 = vmatpush3.bf16.msra.mxu1 %v13161_v51 }
 0x2cc   :  { %11253 = vmatprep.subr.bf16.mxu1 %v13193_v63 }
 0x2cf   :  { %11255 = vmatpush3.bf16.msra.mxu1 %v13193_v63 }
 0x2d0   :  { %11257 = vmatprep.subr.bf16.mxu1 %v11256_v12 }
 0x2d2   :  { %10303 = vmatmul.mubr.f32.vlgmr.msra.gmra.mrb[0].mxu1 %v1189_v39 }
 0x2d3   :  { %10305 = vmatprep.mubr.f32.mxu1 %v1199_v2  ;;  %11259 = vmatpush3.bf16.msra.mxu1 %v11256_v12  ;;  %v2496_v12 = vld [vmem:[%s16534_s7 + $0x18] sm:$0xff] }
 0x2d4   :  { %11261 = vmatprep.subr.bf16.mxu1 %v11260_v34 }
 0x2d6   :  { %10306 = vmatmul.mubr.f32.gmra.mrb[2].mxu1 %v1209_v1 }
 0x2d7   :  { %11263 = vmatpush3.bf16.msra.mxu1 %v11260_v34  ;;  %10332 = vmatprep.mubr.f32.mxu1 %v13347_v8  ;;  %v2531_v34 = vand.u32 4294901760, %v2495_v43 }
 0x2d8   :  { %11265 = vmatprep.subr.bf16.mxu1 %v11264_v56 }
 0x2db   :  { %11267 = vmatpush3.bf16.msra.mxu1 %v11264_v56  ;;  %v2534_v56 = vand.u32 4294901760, %v2496_v12 }
 0x2dc   :  { %11269 = vmatprep.subr.bf16.mxu1 %v11268_v57 }
 0x2dd   :  { %v13532_v3 = vsub.f32 %v2496_v12, %v2534_v56 }
 0x2df   :  { %11271 = vmatpush3.bf16.msra.mxu1 %v11268_v57  ;;  %v13530_v57 = vsub.f32 %v2495_v43, %v2531_v34  ;;  %v2665_v7 = vand.u32 4294901760, %v13532_v3 }
 0x2e0   :  { %11273 = vmatprep.subr.bf16.mxu1 %v11272_v0 }
 0x2e1   :  { %v2658_v6 = vand.u32 4294901760, %v13530_v57  ;;  %v2666_v38 = vsub.f32 %v13532_v3, %v2665_v7 }
 0x2e3   :  { %11275 = vmatpush3.bf16.msra.mxu1 %v11272_v0  ;;  %v2498_v0 = vld [vmem:[%s16534_s7 + $0x28] sm:$0xff]  ;;  %v2659_v32 = vsub.f32 %v13530_v57, %v2658_v6  ;;  %v2667_v42 = vand.u32 4294901760, %v2666_v38 }
 0x2e4   :  { %11277 = vmatprep.subr.bf16.mxu1 %v11276_v9 }
 0x2e5   :  { %v2660_v19 = vand.u32 4294901760, %v2659_v32 }
 0x2e7   :  { %11279 = vmatpush3.bf16.msra.mxu1 %v11276_v9  ;;  %v2537_v9 = vand.u32 4294901760, %v2497_v61 }
 0x2e8   :  { %11281 = vmatprep.subr.bf16.mxu1 %v13064_v5 }
 0x2ea   :  { %10333 = vmatmul.mubr.f32.vlgmr.msra.gmra.mrb[0].mxu1 %v13354_v59 }
 0x2eb   :  { %10335 = vmatprep.mubr.f32.mxu1 %v13363_v46  ;;  %11283 = vmatpush3.bf16.msra.mxu1 %v13064_v5  ;;  %v13459_v5 = vand.u32 4294901760, %v1818_v31 }
 0x2ec   :  { %11285 = vmatprep.subr.bf16.mxu1 %v13084_v11 }
 0x2ed   :  { %v1942_v48 = vsub.f32 %v1818_v31, %v13459_v5  ;;  %v2540_v31 = vand.u32 4294901760, %v2498_v0 }
 0x2ee   :  { %10336 = vmatmul.mubr.f32.gmra.mrb[2].mxu1 %v13372_v23 }
 0x2ef   :  { %11287 = vmatpush3.bf16.msra.mxu1 %v13084_v11  ;;  %10362 = vmatprep.mubr.f32.mxu1 %v13347_v8  ;;  %v1828_v11 = vsel %vm209_vm10, %v12753_v14, 0  ;;  %v1943_v58 = vand.u32 4294901760, %v1942_v48  ;;  %v1924_v8 = vand.u32 4294901760, %v1923_v47  ;;  %v13555_v14 = vld [vmem:[%s16534_s7 + $0x30] sm:$0xff]  ;;  %v9570_v47 = vld [vmem:[%s16536_s1] ss:$0 sm:$0xff] }
 0x2f0   :  { %11289 = vmatprep.subr.bf16.mxu1 %v13104_v21  ;;  %v13474_v49 = vand.u32 4294901760, %v1828_v11 }
 0x2f1   :  { %v1944_v10 = vsub.f32 %v1942_v48, %v1943_v58 }
 0x2f2   :  { %v1911_v1 = vsub.f32 %v1828_v11, %v13474_v49  ;;  %v13560_v11 = vld [vmem:[%s16534_s7 + $0x38] sm:$0xff] }
 0x2f3   :  { %11291 = vmatpush3.bf16.msra.mxu1 %v13104_v21  ;;  %v1832_v21 = vsel %vm209_vm10, %v12755_v24, 0  ;;  %v2546_v24 = vand.u32 4294901760, %v13560_v11  ;;  %vm3242_vm10 = vcmask 523264  }
 0x2f4   :  { %11293 = vmatprep.subr.bf16.mxu1 %v13132_v33  ;;  %v1930_v41 = vand.u32 4294901760, %v1832_v21  ;;  %v1912_v30 = vand.u32 4294901760, %v1911_v1 }
 0x2f6   :  { %v1931_v60 = vsub.f32 %v1832_v21, %v1930_v41  ;;  %v1913_v18 = vsub.f32 %v1911_v1, %v1912_v30  ;;  %v11332_v21 = vpack.c.bf16 %v2667_v42, %v2660_v19 }
 0x2f7   :  { %11295 = vmatpush3.bf16.msra.mxu1 %v13132_v33  ;;  %v1945_v33 = vand.u32 4294901760, %v1944_v10  ;;  %v13592_v10 = vld [vmem:[%s16534_s7 + $0x48] sm:$0xff] }
 0x2f8   :  { %11297 = vmatprep.subr.bf16.mxu1 %v13161_v51  ;;  %v1932_v45 = vand.u32 4294901760, %v1931_v60  ;;  %v1914_v52 = vand.u32 4294901760, %v1913_v18 }
 0x2fb   :  { %11299 = vmatpush3.bf16.msra.mxu1 %v13161_v51  ;;  %v1904_v51 = vand.u32 4294901760, %v1903_v36 }
 0x2fc   :  { %11301 = vmatprep.subr.bf16.mxu1 %v13193_v63 }
 0x2ff   :  { %11303 = vmatpush3.bf16.msra.mxu1 %v13193_v63  ;;  %v1933_v63 = vsub.f32 %v1931_v60, %v1932_v45 }
 0x300   :  { %10368 = vmatprep.subr.mxu1 %v13459_v5 }
 0x301   :  { %v1934_v54 = vand.u32 4294901760, %v1933_v63  ;;  %v16537_v63 = vmov 0.0  }
 0x302   :  { %10363 = vmatmul.mubr.f32.vlgmr.msra.gmra.mrb[0].mxu1 %v13354_v59  ;;  %v2494_v59 = vld [vmem:[%s16534_s7 + $0x8] sm:$0xff]  ;;  %4503 = vst.msk [vmem:[#allocation2 + $0x3f] sm:$0x1] %vm4501_vm8, %v16537_v63 }
 0x303   :  { %10365 = vmatprep.mubr.f32.mxu1 %v13363_v46  ;;  %10369 = vmatpush3.msra.mxu1 %v13459_v5  ;;  %v2528_v62 = vand.u32 4294901760, %v2494_v59 }
 0x304   :  { %10376 = vmatprep.subr.mxu1 %v1945_v33 }
 0x305   :  { %v13512_v46 = vsub.f32 %v2494_v59, %v2528_v62 }
 0x306   :  { %10366 = vmatmul.mubr.f32.gmra.mrb[2].mxu1 %v13372_v23  ;;  %v2493_v23 = vld [vmem:[%s16534_s7] sm:$0xff] }
 0x307   :  { %10370 = vmatprep.mubr.f32.mxu1 %v1904_v51  ;;  %v2525_v28 = vand.u32 4294901760, %v2493_v23  ;;  %v2651_v37 = vand.u32 4294901760, %v13512_v46  ;;  %v9569_v51 = vld [vmem:[%s16535_s6] ss:$0 sm:$0xff] }
 0x309   :  { %v13508_v39 = vpack.c.bf16 %v2528_v62, %v2525_v28  ;;  %v13510_v22 = vsub.f32 %v2493_v23, %v2525_v28  ;;  %v2652_v35 = vsub.f32 %v13512_v46, %v2651_v37  ;;  %v2503_v28 = vld [vmem:[%s16534_s7 + $0x50] sm:$0xff]  ;;  %v2504_v62 = vld [vmem:[%s16534_s7 + $0x58] sm:$0xff] }
 0x30a   :  { %10371 = vmatmul.mubr.f32.vlgmr.msra.gmra.mrb[0].mxu1 %v1914_v52 }
 0x30b   :  { %10377 = vmatpush3.msra.mxu1 %v1945_v33  ;;  %10373 = vmatprep.mubr.f32.mxu1 %v1924_v8  ;;  %v2644_v26 = vand.u32 4294901760, %v13510_v22  ;;  %v2653_v2 = vand.u32 4294901760, %v2652_v35  ;;  %v13596_v33 = vpack.c.bf16 %v2540_v31, %v2537_v9 }
 0x30c   :  { %10384 = vmatprep.subr.mxu1 %v1942_v48 }
 0x30d   :  { %v2645_v53 = vsub.f32 %v13510_v22, %v2644_v26 }
 0x30e   :  { %10374 = vmatmul.mubr.f32.gmra.mrb[2].mxu1 %v1934_v54 }
 0x30f   :  { %10378 = vmatprep.mubr.f32.mxu1 %v13461_v40  ;;  %v2646_v55 = vand.u32 4294901760, %v2645_v53 }
 0x311   :  { %v11328_v29 = vpack.c.bf16 %v2653_v2, %v2646_v55  ;;  %v2555_v55 = vand.u32 4294901760, %v2503_v28  ;;  %v2558_v2 = vand.u32 4294901760, %v2504_v62 }
 0x312   :  { %10379 = vmatmul.mubr.f32.vlgmr.msra.gmra.mrb[0].mxu1 %v13474_v49 }
 0x313   :  { %10385 = vmatpush3.msra.mxu1 %v1942_v48  ;;  %10381 = vmatprep.mubr.f32.mxu1 %v1920_v25 }
 0x314   :  { %10392 = vmatprep.subr.mxu1 %v13459_v5  ;;  %11329 = vmatprep.subr.bf16.mxu0 %v11328_v29 }
 0x315   :  { %11331 = vmatpush3.bf16.msra.mxu0 %v11328_v29  ;;  %v12438_v29 = vadd.f32 %v9570_v47, %v9569_v51 }
 0x316   :  { %10382 = vmatmul.mubr.f32.gmra.mrb[2].mxu1 %v1930_v41  ;;  %11333 = vmatprep.subr.bf16.mxu0 %v11332_v21 }
 0x317   :  { %10386 = vmatprep.mubr.f32.mxu1 %v1901_v50  ;;  %v2543_v50 = vand.u32 4294901760, %v13555_v14 }
 0x319   :  { %11335 = vmatpush3.bf16.msra.mxu0 %v11332_v21 }
 0x31a   :  { %10387 = vmatmul.mubr.f32.vlgmr.msra.gmra.mrb[0].mxu1 %v1911_v1  ;;  %v13572_v1 = vpack.c.bf16 %v2534_v56, %v2531_v34 }
 0x31b   :  { %10393 = vmatpush3.msra.mxu1 %v13459_v5  ;;  %10389 = vmatprep.mubr.f32.mxu1 %v1921_v44  ;;  %v13582_v44 = vsub.f32 %v13560_v11, %v2546_v24 }
 0x31c   :  { %10400 = vmatprep.subr.mxu1 %v1943_v58 }
 0x31e   :  { %10390 = vmatmul.mubr.f32.gmra.mrb[2].mxu1 %v1931_v60 }
 0x31f   :  { %10394 = vmatprep.mubr.f32.mxu1 %v1902_v20  ;;  %v13587_v20 = vld [vmem:[%s16534_s7 + $0x40] sm:$0xff] }
 0x320   :  { %v2549_v36 = vand.u32 4294901760, %v13587_v20 }
 0x322   :  { %10395 = vmatmul.mubr.f32.vlgmr.msra.gmra.mrb[0].mxu1 %v1912_v30  ;;  %v13613_v8 = vsub.f32 %v13587_v20, %v2549_v36 }
 0x323   :  { %10401 = vmatpush3.msra.mxu1 %v1943_v58  ;;  %10397 = vmatprep.mubr.f32.mxu1 %v1922_v17  ;;  %v2552_v17 = vand.u32 4294901760, %v13592_v10 }
 0x324   :  { %10408 = vmatprep.subr.mxu1 %v13459_v5  ;;  %v2700_v53 = vand.u32 4294901760, %v13613_v8 }
 0x325   :  { %v13616_v54 = vsub.f32 %v13592_v10, %v2552_v17 }
 0x326   :  { %10398 = vmatmul.mubr.f32.gmra.mrb[2].mxu1 %v1932_v45  ;;  %v2693_v45 = vand.u32 4294901760, %v13582_v44  ;;  %v2701_v34 = vsub.f32 %v13613_v8, %v2700_v53 }
 0x327   :  { %10402 = vmatprep.mubr.f32.mxu1 %v13461_v40  ;;  %v2707_v35 = vand.u32 4294901760, %v13616_v54 }
 0x328   :  { %v2694_v59 = vsub.f32 %v13582_v44, %v2693_v45 }
 0x329   :  { %v2708_v56 = vsub.f32 %v13616_v54, %v2707_v35 }
 0x32a   :  { %10403 = vmatmul.mubr.f32.vlgmr.msra.gmra.mrb[0].mxu1 %v13474_v49  ;;  %v2695_v12 = vand.u32 4294901760, %v2694_v59 }
 0x32b   :  { %10409 = vmatpush3.msra.mxu1 %v13459_v5  ;;  %10405 = vmatprep.mubr.f32.mxu1 %v1920_v25  ;;  %v13548_v5 = vsub.f32 %v2497_v61, %v2537_v9  ;;  %v13640_v61 = vsub.f32 %v2503_v28, %v2555_v55  ;;  %v2709_v32 = vand.u32 4294901760, %v2708_v56 }
 0x32c   :  { %11305 = vmatprep.subr.bf16.mxu1 %v13508_v39 }
 0x32d   :  { %v2672_v48 = vand.u32 4294901760, %v13548_v5  ;;  %v2714_v19 = vand.u32 4294901760, %v13640_v61 }
 0x32e   :  { %10406 = vmatmul.mubr.f32.gmra.mrb[2].mxu1 %v1930_v41 }
 0x32f   :  { %10410 = vmatprep.mubr.f32.mxu1 %v13461_v40  ;;  %v13550_v40 = vsub.f32 %v2498_v0, %v2540_v31  ;;  %v13642_v0 = vsub.f32 %v2504_v62, %v2558_v2  ;;  %v2702_v31 = vand.u32 4294901760, %v2701_v34  ;;  %v13668_v62 = vpack.c.bf16 %v2546_v24, %v2543_v50 }
 0x332   :  { %10411 = vmatmul.mubr.f32.vlgmr.msra.gmra.mrb[0].mxu1 %v13474_v49  ;;  %v2679_v49 = vand.u32 4294901760, %v13550_v40 }
 0x333   :  { %10413 = vmatprep.mubr.f32.mxu1 %v1920_v25  ;;  %11307 = vmatpush3.bf16.msra.mxu1 %v13508_v39  ;;  %v2673_v25 = vsub.f32 %v13548_v5, %v2672_v48 }
 0x334   :  { %v2680_v58 = vsub.f32 %v13550_v40, %v2679_v49  ;;  %11309 = vmatprep.subr.bf16.mxu1 %v13572_v1 }
 0x335   :  { %v2674_v30 = vand.u32 4294901760, %v2673_v25  ;;  %v11344_v25 = vpack.c.bf16 %v2709_v32, %v2702_v31 }
 0x336   :  { %10414 = vmatmul.mubr.f32.gmra.mrb[2].mxu1 %v1930_v41  ;;  %v13577_v41 = vsub.f32 %v13555_v14, %v2543_v50  ;;  %v2681_v60 = vand.u32 4294901760, %v2680_v58  ;;  %v2721_v58 = vand.u32 4294901760, %v13642_v0 }
 0x337   :  { %11311 = vmatpush3.bf16.msra.mxu1 %v13572_v1 }
 0x338   :  { %v2686_v18 = vand.u32 4294901760, %v13577_v41  ;;  %v11336_v52 = vpack.c.bf16 %v2681_v60, %v2674_v30  ;;  %11313 = vmatprep.subr.bf16.mxu1 %v13596_v33 }
 0x33a   :  { %v2687_v23 = vsub.f32 %v13577_v41, %v2686_v18  ;;  %11337 = vmatprep.subr.bf16.mxu0 %v11336_v52 }
 0x33b   :  { %11339 = vmatpush3.bf16.msra.mxu0 %v11336_v52  ;;  %11315 = vmatpush3.bf16.msra.mxu1 %v13596_v33  ;;  %v2715_v52 = vsub.f32 %v13640_v61, %v2714_v19 }
 0x33c   :  { %v2688_v43 = vand.u32 4294901760, %v2687_v23  ;;  %11317 = vmatprep.subr.bf16.mxu1 %v13668_v62 }
 0x33e   :  { %v11340_v9 = vpack.c.bf16 %v2695_v12, %v2688_v43  ;;  %v2722_v43 = vsub.f32 %v13642_v0, %v2721_v58 }
 0x33f   :  { %11319 = vmatpush3.bf16.msra.mxu1 %v13668_v62 }
 0x340   :  { %11341 = vmatprep.subr.bf16.mxu0 %v11340_v9  ;;  %v2723_v32 = vand.u32 4294901760, %v2722_v43  ;;  %v13724_v43 = vpack.c.bf16 %v13642_v0, %v13640_v61  ;;  %v3268_v61 = vld [vmem:[%s16354_s13 + $0x38] sm:$0xff] }
 0x341   :  { %11343 = vmatpush3.bf16.msra.mxu0 %v11340_v9  ;;  %v13678_v9 = vpack.c.bf16 %v2552_v17, %v2549_v36  ;;  %v13690_v36 = vpack.c.bf16 %v2558_v2, %v2555_v55 }
 0x342   :  { %11345 = vmatprep.subr.bf16.mxu0 %v11344_v25 }
 0x343   :  { %11321 = vmatprep.subr.bf16.mxu1 %v13678_v9 }
 0x344   :  { %11323 = vmatpush3.bf16.msra.mxu1 %v13678_v9 }
 0x345   :  { %11347 = vmatpush3.bf16.msra.mxu0 %v11344_v25  ;;  %11325 = vmatprep.subr.bf16.mxu1 %v13690_v36 }
 0x348   :  { %11327 = vmatpush3.bf16.msra.mxu1 %v13690_v36 }
 0x405   :  { %v10412_v38 = vpop.f32.mrb[0].mxu1 }
 0x406   :  { %v13645_v42 = vadd.f32 %v12438_v29, %v10412_v38  ;;  %v2387_v21 = vpop.f32.mrb[1].mxu1 }
 0x407   :  { %v13648_v10 = vadd.f32 %v12438_v29, %v2387_v21 }
 0x408   :  { %v2436_v30 = vmul.f32 %v13645_v42, %v12951_v15  ;;  %2421 = vrot.lane.b32.xlu1 %v13645_v42, %s12783_s26  ;;  %v2467_v56 = vrot.slane %v13645_v42, 1 }
 0x409   :  { %v2443_v60 = vrot.slane %v13648_v10, 7  ;;  %2419 = vrot.lane.b32.xlu0 %v13648_v10, %s12783_s26  ;;  %v10415_v51 = vpop.f32.mrb[2].mxu1  ;;  %v2458_v47 = vmul.f32 %v13648_v10, %v12947_v13 }
 0x40a   :  { %v2444_v23 = vrot.slane %v2436_v30, 7  ;;  %v13662_v59 = vadd.f32 %v12438_v29, %v10415_v51  ;;  %v2399_v28 = vpop.f32.mrb[3].mxu1  ;;  %v11352_v51 = vpack.c.bf16 %v13512_v46, %v13510_v22  ;;  %v11408_v22 = vpack.c.bf16 %v2679_v49, %v2672_v48  ;;  %v3264_v48 = vld [vmem:[%s16354_s13 + $0x18] sm:$0xff] }
 0x40b   :  { %v13673_v12 = vadd.f32 %v12438_v29, %v2399_v28  ;;  %v2466_v34 = vrot.slane %v2458_v47, 1  ;;  %v2716_v29 = vand.u32 4294901760, %v2715_v52  ;;  %v11356_v47 = vpack.c.bf16 %v13532_v3, %v13530_v57  ;;  %v3262_v57 = vld [vmem:[%s16354_s13 + $0x8] sm:$0xff] }
 0x40c   :  { %v2438_v14 = vmul.f32 %v13662_v59, %v12954_v16  ;;  %v2445_v11 = vsel %vm195_vm5, %v2443_v60, %v2444_v23  ;;  %v2471_v21 = vrot.slane %v13662_v59, 1  ;;  %v11360_v52 = vpack.c.bf16 %v13550_v40, %v13548_v5  ;;  %v3263_v40 = vld [vmem:[%s16354_s13 + $0x10] sm:$0xff] }
 0x40d   :  { %v2446_v50 = vrot.slane %v13673_v12, 7  ;;  %v2468_v24 = vsel %vm221_vm1, %v2466_v34, %v2467_v56  ;;  %v2460_v20 = vmul.f32 %v13673_v12, %v12966_v27  ;;  %v11348_v30 = vpack.c.bf16 %v2723_v32, %v2716_v29 }
 0x40e   :  { %v2448_v31 = vrot.slane %v2438_v14, 7  ;;  %2473 = vrot.lane.b32.xlu0 %v2468_v24, %s12784_s28  ;;  %v13720_v28 = vpack.c.bf16 %v13616_v54, %v13613_v8  ;;  %v11412_v46 = vpack.c.bf16 %v2693_v45, %v2686_v18  ;;  %v16377_v5 = vmov 0.0|0.0  }
 0x40f   :  { %v2447_v17 = vsel %vm195_vm5, %v2444_v23, %v2446_v50  ;;  %v2469_v38 = vrot.slane %v2460_v20, 1  ;;  %11349 = vmatprep.subr.bf16.mxu0 %v11348_v30  ;;  %v13715_v23 = vpack.c.bf16 %v13582_v44, %v13577_v41  ;;  %11520 = vmatprep.subr.bf16.mxu1 %v16377_v5  ;;  %v3282_v49 = vand.u32 4294901760, %v3263_v40  ;;  %v3265_v44 = vld [vmem:[%s16354_s13 + $0x20] sm:$0xff] }
 0x410   :  { %v2449_v25 = vsel %vm195_vm5, %v2446_v50, %v2448_v31  ;;  %11351 = vmatpush3.bf16.msra.mxu0 %v11348_v30  ;;  %v3288_v18 = vand.u32 4294901760, %v3265_v44 }
 0x411   :  { %v2470_v55 = vsel %vm221_vm1, %v2467_v56, %v2469_v38  ;;  %v2472_v2 = vsel %vm221_vm1, %v2469_v38, %v2471_v21  ;;  %11353 = vmatprep.subr.bf16.mxu0 %v11352_v51 }
 0x412   :  { %2423 = vrot.lane.b32.xlu0 %v13673_v12, %s12783_s26  ;;  %2475 = vrot.lane.b32.xlu1 %v2470_v55, %s12784_s28 }
 0x416   :  { %2477 = vrot.lane.b32.xlu0 %v2472_v2, %s12784_s28  ;;  %2425 = vrot.lane.b32.xlu1 %v13662_v59, %s12783_s26 }
 0x41a   :  { %2479 = vrot.lane.b32.xlu1 %v2471_v21, %s12784_s28 }
 0x47a   :  { %v2422_v34 = vpop.permute.xlu1 %2421 }
 0x47b   :  { %2432 = vst.msk [vmem:[#allocation2 + $0x10] sm:$0xff] %vm1002_vm2, %v2422_v34  ;;  %v2420_v56 = vpop.permute.xlu0 %2419 }
 0x47c   :  { %2431 = vst.msk [vmem:[#allocation2] sm:$0xff] %vm1002_vm2, %v2420_v56 }
 0x47d   :  { %2455 = vst.msk [vmem:[#allocation2 + $0x10] sm:$0xff] %vm875_vm0, %v2445_v11 }
 0x47e   :  { %2454 = vst.msk [vmem:[#allocation2] sm:$0xfe] %vm1026_vm3, %v2443_v60 }
 0x480   :  { %v2474_v14 = vpop.permute.xlu0 %2473 }
 0x481   :  { %2485 = vst.msk [vmem:[#allocation2] sm:$0xff] %vm1058_vm4, %v2474_v14 }
 0x484   :  { %v2424_v50 = vpop.permute.xlu0 %2423  ;;  %v2476_v24 = vpop.permute.xlu1 %2475 }
 0x485   :  { %2433 = vst.msk [vmem:[#allocation2 + $0x20] sm:$0xff] %vm1002_vm2, %v2424_v50 }
 0x486   :  { %2486 = vst.msk [vmem:[#allocation2 + $0x10] sm:$0xff] %vm1058_vm4, %v2476_v24 }
 0x487   :  { %2456 = vst.msk [vmem:[#allocation2 + $0x20] sm:$0xff] %vm875_vm0, %v2447_v17 }
 0x488   :  { %v2489_v29 = vld [vmem:[#allocation2] sm:$0xff]  ;;  %v2478_v31 = vpop.permute.xlu0 %2477  ;;  %v2426_v11 = vpop.permute.xlu1 %2425 }
 0x489   :  { %4502 = vst.msk [vmem:[#allocation2] sm:$0x1] %vm4501_vm8, %v16537_v63  ;;  %v2513_v60 = vsel %vm1087_vm6, %v2489_v29, 0 }
 0x48a   :  { %2487 = vst.msk [vmem:[#allocation2 + $0x20] sm:$0xff] %vm1058_vm4, %v2478_v31  ;;  %v13739_v20 = vand.u32 4294901760, %v2513_v60 }
 0x48b   :  { %2434 = vst.msk [vmem:[#allocation2 + $0x30] sm:$0xff] %vm1002_vm2, %v2426_v11 }
 0x48c   :  { %2457 = vst.msk [vmem:[#allocation2 + $0x30] sm:$0xff] %vm875_vm0, %v2449_v25  ;;  %10470 = vmatprep.mubr.f32.mxu0 %v13739_v20  ;;  %v2602_v17 = vsub.f32 %v2513_v60, %v13739_v20  ;;  %v2480_v32 = vpop.permute.xlu1 %2479 }
 0x48d   :  { %v2490_v38 = vld [vmem:[#allocation2 + $0x10] sm:$0xff]  ;;  %2488 = vst.msk [vmem:[#allocation2 + $0x30] sm:$0x7f] %vm1062_vm7, %v2480_v32 }
 0x48e   :  { %v2516_v21 = vsel %vm1087_vm6, %v2490_v38, 0  ;;  %v2603_v30 = vand.u32 4294901760, %v2602_v17 }
 0x48f   :  { %v13746_v55 = vand.u32 4294901760, %v2516_v21 }
 0x490   :  { %v2604_v2 = vsub.f32 %v2602_v17, %v2603_v30 }
 0x491   :  { %v2491_v34 = vld [vmem:[#allocation2 + $0x20] sm:$0xff]  ;;  %v2612_v56 = vsub.f32 %v2516_v21, %v13746_v55  ;;  %10471 = vmatmul.mubr.f32.vlgmr.msra.gmra.mrb[4].mxu0 %v13746_v55 }
 0x492   :  { %v2519_v25 = vsel %vm1087_vm6, %v2491_v34, 0  ;;  %11355 = vmatpush3.bf16.msra.mxu0 %v11352_v51  ;;  %v2605_v14 = vand.u32 4294901760, %v2604_v2 }
 0x493   :  { %v13751_v50 = vand.u32 4294901760, %v2519_v25  ;;  %11357 = vmatprep.subr.bf16.mxu0 %v11356_v47  ;;  %v2613_v24 = vand.u32 4294901760, %v2612_v56 }
 0x494   :  { %10440 = vmatprep.mubr.f32.mxu1 %v2605_v14  ;;  %v2492_v11 = vld [vmem:[#allocation2 + $0x30] sm:$0xff] }
 0x495   :  { %10473 = vmatprep.mubr.f32.mxu0 %v13751_v50  ;;  %v2622_v29 = vsub.f32 %v2519_v25, %v13751_v50  ;;  %v2614_v31 = vsub.f32 %v2612_v56, %v2613_v24  ;;  %v2522_v60 = vsel %vm1087_vm6, %v2492_v11, 0 }
 0x496   :  { %11359 = vmatpush3.bf16.msra.mxu0 %v11356_v47  ;;  %v13756_v21 = vand.u32 4294901760, %v2522_v60 }
 0x497   :  { %v2623_v32 = vand.u32 4294901760, %v2622_v29  ;;  %11361 = vmatprep.subr.bf16.mxu0 %v11360_v52  ;;  %v2615_v38 = vand.u32 4294901760, %v2614_v31  ;;  %v3388_v31 = vsub.f32 %v3265_v44, %v3288_v18 }
 0x498   :  { %10474 = vmatmul.mubr.f32.gmra.mrb[6].mxu0 %v13756_v21  ;;  %v2632_v2 = vsub.f32 %v2522_v60, %v13756_v21 }
 0x499   :  { %v2624_v51 = vsub.f32 %v2622_v29, %v2623_v32  ;;  %10441 = vmatmul.mubr.f32.vlgmr.msra.gmra.mrb[4].mxu1 %v2615_v38  ;;  %10500 = vmatprep.mubr.f32.mxu0 %v2602_v17  ;;  %v3389_v38 = vand.u32 4294901760, %v3388_v31 }
 0x49a   :  { %11363 = vmatpush3.bf16.msra.mxu0 %v11360_v52  ;;  %v2633_v25 = vand.u32 4294901760, %v2632_v2  ;;  %v11400_v52 = vpack.c.bf16 %v2651_v37, %v2644_v26  ;;  %v11416_v26 = vpack.c.bf16 %v2707_v35, %v2700_v53  ;;  %v11420_v37 = vpack.c.bf16 %v2721_v58, %v2714_v19  ;;  %v3267_v35 = vld [vmem:[%s16354_s13 + $0x30] sm:$0xff] }
 0x49b   :  { %v2625_v34 = vand.u32 4294901760, %v2624_v51  ;;  %11365 = vmatprep.subr.bf16.mxu0 %v13715_v23  ;;  %v3294_v0 = vand.u32 4294901760, %v3267_v35  ;;  %v3297_v19 = vand.u32 4294901760, %v3268_v61 }
 0x49c   :  { %v2634_v47 = vsub.f32 %v2632_v2, %v2633_v25 }
 0x49d   :  { %10443 = vmatprep.mubr.f32.mxu1 %v2625_v34  ;;  %v3402_v34 = vsub.f32 %v3267_v35, %v3294_v0 }
 0x49e   :  { %11367 = vmatpush3.bf16.msra.mxu0 %v13715_v23  ;;  %v2635_v14 = vand.u32 4294901760, %v2634_v47  ;;  %v11404_v23 = vpack.c.bf16 %v2665_v7, %v2658_v6  ;;  %v3279_v6 = vand.u32 4294901760, %v3262_v57 }
 0x49f   :  { %11369 = vmatprep.subr.bf16.mxu0 %v13720_v28 }
 0x4a0   :  { %10444 = vmatmul.mubr.f32.gmra.mrb[6].mxu1 %v2635_v14  ;;  %v3367_v53 = vsub.f32 %v3262_v57, %v3279_v6 }
 0x4a1   :  { %10726 = vmatprep.mubr.msk.f32.mxu1 %vm12786_vm9, %v16537_v63 }
 0x4a2   :  { %11371 = vmatpush3.bf16.msra.mxu0 %v13720_v28 }
 0x4a3   :  { %11373 = vmatprep.subr.bf16.mxu0 %v13724_v43 }
 0x4a6   :  { %11375 = vmatpush3.bf16.msra.mxu0 %v13724_v43  ;;  %v3374_v43 = vsub.f32 %v3263_v40, %v3282_v49 }
 0x4a7   :  { %11377 = vmatprep.subr.bf16.mxu0 %v13508_v39 }
 0x4a9   :  { %10501 = vmatmul.mubr.f32.vlgmr.msra.gmra.mrb[4].mxu0 %v2612_v56 }
 0x4aa   :  { %10503 = vmatprep.mubr.f32.mxu0 %v2622_v29  ;;  %11379 = vmatpush3.bf16.msra.mxu0 %v13508_v39 }
 0x4ab   :  { %11381 = vmatprep.subr.bf16.mxu0 %v13572_v1 }
 0x4ad   :  { %10504 = vmatmul.mubr.f32.gmra.mrb[6].mxu0 %v2632_v2  ;;  %v3390_v2 = vsub.f32 %v3388_v31, %v3389_v38 }
 0x4ae   :  { %11383 = vmatpush3.bf16.msra.mxu0 %v13572_v1  ;;  %10530 = vmatprep.mubr.f32.mxu0 %v2603_v30 }
 0x4af   :  { %11385 = vmatprep.subr.bf16.mxu0 %v13596_v33 }
 0x4b2   :  { %11387 = vmatpush3.bf16.msra.mxu0 %v13596_v33 }
 0x4b3   :  { %11389 = vmatprep.subr.bf16.mxu0 %v13668_v62 }
 0x4b6   :  { %11391 = vmatpush3.bf16.msra.mxu0 %v13668_v62 }
 0x4b7   :  { %11393 = vmatprep.subr.bf16.mxu0 %v13678_v9 }
 0x4ba   :  { %11395 = vmatpush3.bf16.msra.mxu0 %v13678_v9 }
 0x4bb   :  { %11397 = vmatprep.subr.bf16.mxu0 %v13690_v36 }
 0x4be   :  { %11399 = vmatpush3.bf16.msra.mxu0 %v13690_v36 }
 0x4bf   :  { %11401 = vmatprep.subr.bf16.mxu0 %v11400_v52 }
 0x4c1   :  { %10531 = vmatmul.mubr.f32.vlgmr.msra.gmra.mrb[4].mxu0 %v2613_v24 }
 0x4c2   :  { %10533 = vmatprep.mubr.f32.mxu0 %v2623_v32  ;;  %11403 = vmatpush3.bf16.msra.mxu0 %v11400_v52  ;;  %v3391_v52 = vand.u32 4294901760, %v3390_v2 }
 0x4c3   :  { %11405 = vmatprep.subr.bf16.mxu0 %v11404_v23 }
 0x4c5   :  { %10534 = vmatmul.mubr.f32.gmra.mrb[6].mxu0 %v2633_v25  ;;  %v3409_v25 = vsub.f32 %v3268_v61, %v3297_v19 }
 0x4c6   :  { %11407 = vmatpush3.bf16.msra.mxu0 %v11404_v23  ;;  %10560 = vmatprep.mubr.f32.mxu0 %v13739_v20  ;;  %v3403_v23 = vand.u32 4294901760, %v3402_v34 }
 0x4c7   :  { %11409 = vmatprep.subr.bf16.mxu0 %v11408_v22 }
 0x4ca   :  { %11411 = vmatpush3.bf16.msra.mxu0 %v11408_v22  ;;  %v3410_v22 = vand.u32 4294901760, %v3409_v25 }
 0x4cb   :  { %11413 = vmatprep.subr.bf16.mxu0 %v11412_v46 }
 0x4ce   :  { %11415 = vmatpush3.bf16.msra.mxu0 %v11412_v46 }
 0x4cf   :  { %11417 = vmatprep.subr.bf16.mxu0 %v11416_v26 }
 0x4d2   :  { %11419 = vmatpush3.bf16.msra.mxu0 %v11416_v26 }
 0x4d3   :  { %11421 = vmatprep.subr.bf16.mxu0 %v11420_v37 }
 0x4d6   :  { %11423 = vmatpush3.bf16.msra.mxu0 %v11420_v37  ;;  %v3404_v37 = vsub.f32 %v3402_v34, %v3403_v23 }
 0x4d7   :  { %11425 = vmatprep.subr.bf16.mxu0 %v13508_v39 }
 0x4d9   :  { %10561 = vmatmul.mubr.f32.vlgmr.msra.gmra.mrb[4].mxu0 %v13746_v55 }
 0x4da   :  { %10563 = vmatprep.mubr.f32.mxu0 %v13751_v50  ;;  %11427 = vmatpush3.bf16.msra.mxu0 %v13508_v39  ;;  %v3261_v39 = vld [vmem:[%s16354_s13] sm:$0xff] }
 0x4db   :  { %11429 = vmatprep.subr.bf16.mxu0 %v13572_v1  ;;  %v3276_v3 = vand.u32 4294901760, %v3261_v39 }
 0x4dd   :  { %10564 = vmatmul.mubr.f32.gmra.mrb[6].mxu0 %v13756_v21  ;;  %v13828_v7 = vpack.c.bf16 %v3279_v6, %v3276_v3  ;;  %v3360_v54 = vsub.f32 %v3261_v39, %v3276_v3  ;;  %v3411_v39 = vsub.f32 %v3409_v25, %v3410_v22  ;;  %v3405_v3 = vand.u32 4294901760, %v3404_v37 }
 0x4de   :  { %11431 = vmatpush3.bf16.msra.mxu0 %v13572_v1  ;;  %10590 = vmatprep.mubr.f32.mxu0 %v13739_v20  ;;  %v3285_v1 = vand.u32 4294901760, %v3264_v48 }
 0x4df   :  { %11433 = vmatprep.subr.bf16.mxu0 %v13596_v33  ;;  %11522 = vmatpush3.bf16.msra.mxu1 %v13828_v7  ;;  %v3361_v58 = vand.u32 4294901760, %v3360_v54  ;;  %v3412_v6 = vand.u32 4294901760, %v3411_v39 }
 0x4e0   :  { %11523 = vmatprep.subr.bf16.mxu1 %v16377_v5  ;;  %v13842_v41 = vpack.c.bf16 %v3285_v1, %v3282_v49  ;;  %v3381_v20 = vsub.f32 %v3264_v48, %v3285_v1  ;;  %v13884_v1 = vpack.c.bf16 %v3367_v53, %v3360_v54 }
 0x4e1   :  { %v13882_v40 = vpack.c.bf16 %v3412_v6, %v3405_v3 }
 0x4e2   :  { %11435 = vmatpush3.bf16.msra.mxu0 %v13596_v33  ;;  %v3266_v33 = vld [vmem:[%s16354_s13 + $0x28] sm:$0xff]  ;;  %v3382_v56 = vand.u32 4294901760, %v3381_v20  ;;  %v13886_v44 = vpack.c.bf16 %v3381_v20, %v3374_v43 }
 0x4e3   :  { %11437 = vmatprep.subr.bf16.mxu0 %v13668_v62  ;;  %v3291_v45 = vand.u32 4294901760, %v3266_v33  ;;  %11525 = vmatpush3.bf16.msra.mxu1 %v13842_v41 }
 0x4e4   :  { %11526 = vmatprep.subr.bf16.mxu1 %v16377_v5  ;;  %v3383_v29 = vsub.f32 %v3381_v20, %v3382_v56 }
 0x4e5   :  { %v13854_v8 = vpack.c.bf16 %v3291_v45, %v3288_v18  ;;  %v3395_v11 = vsub.f32 %v3266_v33, %v3291_v45  ;;  %v13890_v18 = vpack.c.bf16 %v3409_v25, %v3402_v34 }
 0x4e6   :  { %11439 = vmatpush3.bf16.msra.mxu0 %v13668_v62  ;;  %v3368_v62 = vand.u32 4294901760, %v3367_v53  ;;  %v3384_v32 = vand.u32 4294901760, %v3383_v29 }
 0x4e7   :  { %11441 = vmatprep.subr.bf16.mxu0 %v13678_v9  ;;  %11528 = vmatpush3.bf16.msra.mxu1 %v13854_v8  ;;  %v13888_v33 = vpack.c.bf16 %v3395_v11, %v3388_v31 }
 0x4e8   :  { %11529 = vmatprep.subr.bf16.mxu1 %v16377_v5  ;;  %v3369_v28 = vsub.f32 %v3367_v53, %v3368_v62  ;;  %v13892_v45 = vpack.c.bf16 %v3368_v62, %v3361_v58 }
 0x4ea   :  { %11443 = vmatpush3.bf16.msra.mxu0 %v13678_v9  ;;  %v13867_v9 = vpack.c.bf16 %v3297_v19, %v3294_v0  ;;  %v3370_v30 = vand.u32 4294901760, %v3369_v28  ;;  %v13898_v0 = vpack.c.bf16 %v3410_v22, %v3403_v23  ;;  %v9571_v19 = vld [vmem:[%s16351_s10] ss:$0 sm:$0xff] }
 0x4eb   :  { %11445 = vmatprep.subr.bf16.mxu0 %v13690_v36 }
 0x4ec   :  { %11531 = vmatpush3.bf16.msra.mxu1 %v13867_v9 }
 0x4ed   :  { %11532 = vmatprep.subr.bf16.mxu1 %v16377_v5 }
 0x4ee   :  { %11447 = vmatpush3.bf16.msra.mxu0 %v13690_v36  ;;  %v3362_v36 = vsub.f32 %v3360_v54, %v3361_v58 }
 0x4ef   :  { %11448 = vmatprep.subr.bf16.mxu0 %v16377_v5 }
 0x4f0   :  { %v3363_v17 = vand.u32 4294901760, %v3362_v36 }
 0x4f1   :  { %10591 = vmatmul.mubr.f32.vlgmr.msra.gmra.mrb[4].mxu0 %v13746_v55  ;;  %v3375_v55 = vand.u32 4294901760, %v3374_v43 }
 0x4f2   :  { %10593 = vmatprep.mubr.f32.mxu0 %v13751_v50  ;;  %11450 = vmatpush3.bf16.msra.mxu0 %v13828_v7  ;;  %v13876_v50 = vpack.c.bf16 %v3370_v30, %v3363_v17 }
 0x4f3   :  { %11451 = vmatprep.subr.bf16.mxu0 %v16377_v5  ;;  %v3376_v24 = vsub.f32 %v3374_v43, %v3375_v55  ;;  %v13894_v35 = vpack.c.bf16 %v3382_v56, %v3375_v55 }
 0x4f5   :  { %10594 = vmatmul.mubr.f32.gmra.mrb[6].mxu0 %v13756_v21  ;;  %v3377_v60 = vand.u32 4294901760, %v3376_v24  ;;  %v3396_v21 = vand.u32 4294901760, %v3395_v11 }
 0x4f6   :  { %11453 = vmatpush3.bf16.msra.mxu0 %v13842_v41  ;;  %10612 = vmatprep.mubr.msk.f32.mxu0 %vm12786_vm9, %v16537_v63 }
 0x4f7   :  { %11454 = vmatprep.subr.bf16.mxu0 %v16377_v5  ;;  %v13878_v51 = vpack.c.bf16 %v3384_v32, %v3377_v60  ;;  %v3397_v47 = vsub.f32 %v3395_v11, %v3396_v21  ;;  %v13896_v61 = vpack.c.bf16 %v3396_v21, %v3389_v38 }
 0x4f9   :  { %v3398_v26 = vand.u32 4294901760, %v3397_v47 }
 0x4fa   :  { %11456 = vmatpush3.bf16.msra.mxu0 %v13854_v8 }
 0x4fb   :  { %11457 = vmatprep.subr.bf16.mxu0 %v16377_v5  ;;  %v13880_v57 = vpack.c.bf16 %v3398_v26, %v3391_v52 }
 0x4fe   :  { %11459 = vmatpush3.bf16.msra.mxu0 %v13867_v9 }
 0x4ff   :  { %11460 = vmatprep.subr.bf16.mxu0 %v16377_v5 }
 0x56c   :  { %v10442_v14 = vpop.f32.mrb[4].mxu1 }
 0x56d   :  { %v2607_v46 = vpop.f32.mrb[5].mxu1  ;;  %v2618_v54 = vadd.f32 %v10442_v14, %v9571_v19 }
 0x56e   :  { %v2608_v53 = vadd.f32 %v9571_v19, %v2607_v46 }
 0x573   :  { %v10445_v48 = vpop.f32.mrb[6].mxu1 }
 0x574   :  { %v2627_v49 = vpop.f32.mrb[7].mxu1  ;;  %v2638_v58 = vadd.f32 %v10445_v48, %v9571_v19 }
 0x575   :  { %v2628_v17 = vadd.f32 %v9571_v19, %v2627_v49 }
 0x5c4   :  { %v10592_v36 = vpop.f32.mrb[4].mxu0 }
 0x5c5   :  { %v13903_v28 = vadd.f32 %v10592_v36, %v2618_v54  ;;  %v3220_v43 = vpop.f32.mrb[5].mxu0  ;;  %v12787_v54 = vmov 1966171168  }
 0x5c6   :  { %v13905_v20 = vadd.f32 %v3220_v43, %v2608_v53  ;;  %v3814_v53 = vunpack.c.l.s4 %v12787_v54 }
 0x5c7   :  { %v3244_v62 = vsel %vm3242_vm10, %v13903_v28, 0.0 }
 0x5c8   :  { %v3243_v30 = vsel %vm3242_vm10, %v13905_v20, 0.0  ;;  %v10595_v55 = vpop.f32.mrb[6].mxu0  ;;  %v3815_v36 = vunpack.c.0.s8 %v3814_v53 }
 0x5c9   :  { %v3245_v56 = vadd.f32 %v3244_v62, %v3243_v30  ;;  %v13911_v24 = vadd.f32 %v10595_v55, %v2638_v58  ;;  %v3232_v29 = vpop.f32.mrb[7].mxu0 }
 0x5ca   :  { %v13913_v31 = vadd.f32 %v3232_v29, %v2628_v17  ;;  %v13972_v43 = vsub.s32 %v3815_v36, %v12935_v4  ;;  %v13976_v17 = vsub.s32 0, %v12935_v4 }
 0x5cb   :  { %v3246_v11 = vrot.slane %v3245_v56, 4  ;;  %v3253_v60 = vsel %vm3242_vm10, %v13911_v24, 0.0 }
 0x5cc   :  { %v3252_v32 = vsel %vm3242_vm10, %v13913_v31, 0.0  ;;  %16538 = vst [vmem:[#allocation10_spill] sm:$0xff] %v13972_v43  ;;  %16539 = vst [vmem:[#allocation11_spill] sm:$0xff] %v13976_v17 }
 0x5cd   :  { %v3247_v38 = vadd.f32 %v3246_v11, %v3245_v56  ;;  %v3254_v21 = vadd.f32 %v3253_v60, %v3252_v32 }
 0x5cf   :  { %v3248_v2 = vrot.slane %v3247_v38, 2  ;;  %v3255_v34 = vrot.slane %v3254_v21, 4 }
 0x5d1   :  { %v3249_v25 = vadd.f32 %v3248_v2, %v3247_v38  ;;  %v3256_v47 = vadd.f32 %v3255_v34, %v3254_v21 }
 0x5d3   :  { %v3257_v14 = vrot.slane %v3256_v47, 2  ;;  %v3250_v52 = vrot.slane %v3249_v25, 1 }
 0x5d5   :  { %v3258_v23 = vadd.f32 %v3257_v14, %v3256_v47  ;;  %v3251_v46 = vadd.f32 %v3250_v52, %v3249_v25 }
 0x5d7   :  { %v3259_v22 = vrot.slane %v3258_v23, 1 }
 0x5d9   :  { %v3260_v26 = vadd.f32 %v3259_v22, %v3258_v23 }
 0x5db   :  { %v3272_v37 = vsel %vm3271_vm11, %v3260_v26, %v3251_v46 }
 0x5dc   :  { %v3273_v39 = vsel %vm3242_vm10, %v3272_v37, 0 }
 0x5dd   :  { %v3348_v3 = vand.u32 4294901760, %v3273_v39 }
 0x5df   :  { %v3349_v6 = vsub.f32 %v3273_v39, %v3348_v3 }
 0x5e1   :  { %v3350_v48 = vand.u32 4294901760, %v3349_v6 }
 0x5e3   :  { %v3351_v49 = vsub.f32 %v3349_v6, %v3350_v48 }
 0x5e5   :  { %v3352_v19 = vand.u32 4294901760, %v3351_v49 }
 0x5e7   :  { %10613 = vmatmul.mubr.f32.vlgmr.msra.gmra.mrb[8].mxu0 %v3352_v19 }
 0x5e8   :  { %11462 = vmatpush3.bf16.msra.mxu0 %v13876_v50  ;;  %10631 = vmatprep.mubr.msk.f32.mxu0 %vm12786_vm9, %v16537_v63 }
 0x5e9   :  { %11463 = vmatprep.subr.bf16.mxu0 %v16377_v5 }
 0x5ec   :  { %11465 = vmatpush3.bf16.msra.mxu0 %v13878_v51 }
 0x5ed   :  { %11466 = vmatprep.subr.bf16.mxu0 %v16377_v5 }
 0x5f0   :  { %11468 = vmatpush3.bf16.msra.mxu0 %v13880_v57 }
 0x5f1   :  { %11469 = vmatprep.subr.bf16.mxu0 %v16377_v5 }
 0x5f4   :  { %11471 = vmatpush3.bf16.msra.mxu0 %v13882_v40 }
 0x5f5   :  { %11472 = vmatprep.subr.bf16.mxu0 %v16377_v5 }
 0x5f7   :  { %10632 = vmatmul.mubr.f32.vlgmr.msra.gmra.mrb[8].mxu0 %v3348_v3 }
 0x5f8   :  { %11474 = vmatpush3.bf16.msra.mxu0 %v13884_v1  ;;  %10650 = vmatprep.mubr.msk.f32.mxu0 %vm12786_vm9, %v16537_v63 }
 0x5f9   :  { %11475 = vmatprep.subr.bf16.mxu0 %v16377_v5 }
 0x5fc   :  { %11477 = vmatpush3.bf16.msra.mxu0 %v13886_v44 }
 0x5fd   :  { %11478 = vmatprep.subr.bf16.mxu0 %v16377_v5 }
 0x600   :  { %11480 = vmatpush3.bf16.msra.mxu0 %v13888_v33 }
 0x601   :  { %11481 = vmatprep.subr.bf16.mxu0 %v16377_v5 }
 0x604   :  { %11483 = vmatpush3.bf16.msra.mxu0 %v13890_v18 }
 0x605   :  { %11484 = vmatprep.subr.bf16.mxu0 %v16377_v5 }
 0x607   :  { %10651 = vmatmul.mubr.f32.vlgmr.msra.gmra.mrb[8].mxu0 %v3349_v6 }
 0x608   :  { %11486 = vmatpush3.bf16.msra.mxu0 %v13828_v7  ;;  %10669 = vmatprep.mubr.msk.f32.mxu0 %vm12786_vm9, %v16537_v63 }
 0x609   :  { %11487 = vmatprep.subr.bf16.mxu0 %v16377_v5 }
 0x60c   :  { %11489 = vmatpush3.bf16.msra.mxu0 %v13842_v41 }
 0x60d   :  { %11490 = vmatprep.subr.bf16.mxu0 %v16377_v5 }
 0x610   :  { %11492 = vmatpush3.bf16.msra.mxu0 %v13854_v8 }
 0x611   :  { %11493 = vmatprep.subr.bf16.mxu0 %v16377_v5 }
 0x614   :  { %11495 = vmatpush3.bf16.msra.mxu0 %v13867_v9 }
 0x615   :  { %11496 = vmatprep.subr.bf16.mxu0 %v16377_v5 }
 0x617   :  { %10670 = vmatmul.mubr.f32.vlgmr.msra.gmra.mrb[8].mxu0 %v3350_v48 }
 0x618   :  { %11498 = vmatpush3.bf16.msra.mxu0 %v13892_v45  ;;  %10688 = vmatprep.mubr.msk.f32.mxu0 %vm12786_vm9, %v16537_v63 }
 0x619   :  { %11499 = vmatprep.subr.bf16.mxu0 %v16377_v5 }
 0x61c   :  { %11501 = vmatpush3.bf16.msra.mxu0 %v13894_v35 }
 0x61d   :  { %11502 = vmatprep.subr.bf16.mxu0 %v16377_v5 }
 0x620   :  { %11504 = vmatpush3.bf16.msra.mxu0 %v13896_v61 }
 0x621   :  { %11505 = vmatprep.subr.bf16.mxu0 %v16377_v5 }
 0x624   :  { %11507 = vmatpush3.bf16.msra.mxu0 %v13898_v0 }
 0x625   :  { %11508 = vmatprep.subr.bf16.mxu0 %v16377_v5 }
 0x627   :  { %10689 = vmatmul.mubr.f32.vlgmr.msra.gmra.mrb[8].mxu0 %v3348_v3 }
 0x628   :  { %11510 = vmatpush3.bf16.msra.mxu0 %v13828_v7  ;;  %10707 = vmatprep.mubr.msk.f32.mxu0 %vm12786_vm9, %v16537_v63 }
 0x629   :  { %11511 = vmatprep.subr.bf16.mxu0 %v16377_v5 }
 0x62c   :  { %11513 = vmatpush3.bf16.msra.mxu0 %v13842_v41 }
 0x62d   :  { %11514 = vmatprep.subr.bf16.mxu0 %v16377_v5 }
 0x630   :  { %11516 = vmatpush3.bf16.msra.mxu0 %v13854_v8 }
 0x631   :  { %11517 = vmatprep.subr.bf16.mxu0 %v16377_v5 }
 0x634   :  { %11519 = vmatpush3.bf16.msra.mxu0 %v13867_v9 }
 0x635   :  { %11592 = vmatprep.subr.bf16.mxu0 %v16377_v5 }
 0x637   :  { %10708 = vmatmul.mubr.f32.vlgmr.msra.gmra.mrb[8].mxu0 %v3348_v3 }
 0x70a   :  { %v3808_v58 = vpop.f32.mrb[8].mxu0 }
 0x70b   :  { %v3819_v62 = vrot.slane %v3808_v58, %v13972_v43  ;;  %v10709_v30 = vpop.f32.mrb[9].mxu0 }
 0x70d   :  { %v3820_v55 = vcombine.high %v3819_v62, %v3819_v62  ;;  %v3827_v56 = vrot.slane %v3819_v62, %v13972_v43 }
 0x70f   :  { %v3834_v29 = vrot.slane %v3820_v55, %v13972_v43  ;;  %v3838_v11 = vrot.slane %v3827_v56, %v13976_v17 }
 0x711   :  { %v3842_v60 = vrot.slane %v3834_v29, %v13976_v17  ;;  %v13983_v32 = vsub.f32 %v13905_v20, %v3838_v11  ;;  %v13986_v38 = vsub.f32 %v13903_v28, %v3838_v11  ;;  %v5565_v11 = vsel %vm875_vm0, %v13673_v12, 0 }
 0x713   :  { %v13989_v21 = vsub.f32 %v13913_v31, %v3842_v60  ;;  %v13992_v4 = vsub.f32 %v13911_v24, %v3842_v60  ;;  %v3849_v2 = vmul.f32 %v13983_v32, %v13983_v32  ;;  %v3850_v34 = vmul.f32 %v13986_v38, %v13986_v38 }
 0x715   :  { %v3851_v25 = vmul.f32 %v13989_v21, %v13989_v21  ;;  %v3852_v20 = vmul.f32 %v13992_v4, %v13992_v4  ;;  %v3853_v28 = vsel %vm3242_vm10, %v3849_v2, 0.0  ;;  %v3854_v31 = vsel %vm3242_vm10, %v3850_v34, 0.0 }
 0x716   :  { %v3855_v47 = vadd.f32 %v3854_v31, %v3853_v28 }
 0x717   :  { %v3862_v24 = vsel %vm3242_vm10, %v3851_v25, 0.0  ;;  %v3863_v14 = vsel %vm3242_vm10, %v3852_v20, 0.0  ;;  %v14096_v20 = vand.u32 4294901760, %v5565_v11 }
 0x718   :  { %v3856_v52 = vrot.slane %v3855_v47, 4  ;;  %v3864_v23 = vadd.f32 %v3863_v14, %v3862_v24 }
 0x71a   :  { %v3857_v22 = vadd.f32 %v3856_v52, %v3855_v47  ;;  %v3865_v46 = vrot.slane %v3864_v23, 4  ;;  %v5659_v52 = vsub.f32 %v5565_v11, %v14096_v20 }
 0x71c   :  { %v3858_v26 = vrot.slane %v3857_v22, 2  ;;  %v3866_v37 = vadd.f32 %v3865_v46, %v3864_v23 }
 0x71e   :  { %v3859_v39 = vadd.f32 %v3858_v26, %v3857_v22  ;;  %v3867_v3 = vrot.slane %v3866_v37, 2 }
 0x720   :  { %v3860_v6 = vrot.slane %v3859_v39, 1  ;;  %v3868_v48 = vadd.f32 %v3867_v3, %v3866_v37 }
 0x722   :  { %v3869_v49 = vrot.slane %v3868_v48, 1  ;;  %v3861_v19 = vadd.f32 %v3860_v6, %v3859_v39 }
 0x724   :  { %v3870_v54 = vadd.f32 %v3869_v49, %v3868_v48  ;;  %v5660_v48 = vand.u32 4294901760, %v5659_v52 }
 0x726   :  { %v3873_v53 = vsel %vm3271_vm11, %v3870_v54, %v3861_v19 }
 0x727   :  { %v3874_v36 = vsel %vm3242_vm10, %v3873_v53, 0 }
 0x728   :  { %v14008_v58 = vand.u32 4294901760, %v3874_v36 }
 0x72a   :  { %v3950_v62 = vsub.f32 %v3874_v36, %v14008_v58  ;;  %v5661_v36 = vsub.f32 %v5659_v52, %v5660_v48 }
 0x72c   :  { %v3951_v30 = vand.u32 4294901760, %v3950_v62 }
 0x72e   :  { %v3952_v55 = vsub.f32 %v3950_v62, %v3951_v30 }
 0x730   :  { %v3953_v56 = vand.u32 4294901760, %v3952_v55 }
 0x732   :  { %10727 = vmatmul.mubr.f32.vlgmr.msra.gmra.mrb[8].mxu1 %v3953_v56  ;;  %v5662_v56 = vand.u32 4294901760, %v5661_v36 }
 0x733   :  { %11534 = vmatpush3.bf16.msra.mxu1 %v13876_v50  ;;  %10745 = vmatprep.mubr.msk.f32.mxu1 %vm12786_vm9, %v16537_v63  ;;  %v5550_v50 = vld [vmem:[%s16357_s16] sm:$0xff] }
 0x734   :  { %11535 = vmatprep.subr.bf16.mxu1 %v16377_v5 }
 0x737   :  { %11537 = vmatpush3.bf16.msra.mxu1 %v13878_v51  ;;  %v5551_v51 = vld [vmem:[%s16357_s16 + $0x8] sm:$0xff] }
 0x738   :  { %11538 = vmatprep.subr.bf16.mxu1 %v16377_v5 }
 0x73b   :  { %11540 = vmatpush3.bf16.msra.mxu1 %v13880_v57  ;;  %v5561_v57 = vsel %vm875_vm0, %v13648_v10, 0  ;;  %v5563_v10 = vsel %vm875_vm0, %v13645_v42, 0 }
 0x73c   :  { %11541 = vmatprep.subr.bf16.mxu1 %v16377_v5  ;;  %v14084_v42 = vand.u32 4294901760, %v5563_v10 }
 0x73e   :  { %v14100_v28 = vsub.f32 %v5563_v10, %v14084_v42 }
 0x73f   :  { %11543 = vmatpush3.bf16.msra.mxu1 %v13882_v40  ;;  %v5570_v40 = vand.u32 4294901760, %v5550_v50 }
 0x740   :  { %11544 = vmatprep.subr.bf16.mxu1 %v16377_v5  ;;  %v5650_v22 = vand.u32 4294901760, %v14100_v28 }
 0x742   :  { %10746 = vmatmul.mubr.f32.vlgmr.msra.gmra.mrb[8].mxu1 %v14008_v58 }
 0x743   :  { %11546 = vmatpush3.bf16.msra.mxu1 %v13884_v1  ;;  %10764 = vmatprep.mubr.msk.f32.mxu1 %vm12786_vm9, %v16537_v63  ;;  %v5573_v1 = vand.u32 4294901760, %v5551_v51 }
 0x744   :  { %11547 = vmatprep.subr.bf16.mxu1 %v16377_v5 }
 0x747   :  { %11549 = vmatpush3.bf16.msra.mxu1 %v13886_v44  ;;  %v14060_v44 = vand.u32 4294901760, %v5561_v57 }
 0x748   :  { %11550 = vmatprep.subr.bf16.mxu1 %v16377_v5 }
 0x749   :  { %v14080_v29 = vsub.f32 %v5561_v57, %v14060_v44 }
 0x74b   :  { %11552 = vmatpush3.bf16.msra.mxu1 %v13888_v33  ;;  %v5552_v33 = vld [vmem:[%s16357_s16 + $0x10] sm:$0xff]  ;;  %v5640_v12 = vand.u32 4294901760, %v14080_v29 }
 0x74c   :  { %11553 = vmatprep.subr.bf16.mxu1 %v16377_v5 }
 0x74f   :  { %11555 = vmatpush3.bf16.msra.mxu1 %v13890_v18  ;;  %v5553_v18 = vld [vmem:[%s16357_s16 + $0x18] sm:$0xff] }
 0x750   :  { %11556 = vmatprep.subr.bf16.mxu1 %v16377_v5 }
 0x752   :  { %10765 = vmatmul.mubr.f32.vlgmr.msra.gmra.mrb[8].mxu1 %v3950_v62 }
 0x753   :  { %11558 = vmatpush3.bf16.msra.mxu1 %v13828_v7  ;;  %10783 = vmatprep.mubr.msk.f32.mxu1 %vm12786_vm9, %v16537_v63 }
 0x754   :  { %11559 = vmatprep.subr.bf16.mxu1 %v16377_v5 }
 0x757   :  { %11561 = vmatpush3.bf16.msra.mxu1 %v13842_v41 }
 0x758   :  { %11562 = vmatprep.subr.bf16.mxu1 %v16377_v5 }
 0x75b   :  { %11564 = vmatpush3.bf16.msra.mxu1 %v13854_v8 }
 0x75c   :  { %11565 = vmatprep.subr.bf16.mxu1 %v16377_v5 }
 0x75f   :  { %11567 = vmatpush3.bf16.msra.mxu1 %v13867_v9 }
 0x760   :  { %11568 = vmatprep.subr.bf16.mxu1 %v16377_v5 }
 0x762   :  { %10784 = vmatmul.mubr.f32.vlgmr.msra.gmra.mrb[8].mxu1 %v3951_v30 }
 0x763   :  { %11570 = vmatpush3.bf16.msra.mxu1 %v13892_v45  ;;  %10802 = vmatprep.mubr.msk.f32.mxu1 %vm12786_vm9, %v16537_v63  ;;  %v5576_v45 = vand.u32 4294901760, %v5552_v33 }
 0x764   :  { %11571 = vmatprep.subr.bf16.mxu1 %v16377_v5 }
 0x765   :  { %v14092_v34 = vsub.f32 %v5552_v33, %v5576_v45  ;;  %v4582_v33 = vld [vmem:[%s16355_s14 + $0x8] sm:$0xff] }
 0x766   :  { %v4628_v10 = vand.u32 4294901760, %v4582_v33 }
 0x767   :  { %11573 = vmatpush3.bf16.msra.mxu1 %v13894_v35  ;;  %v5579_v35 = vand.u32 4294901760, %v5553_v18  ;;  %v5695_v24 = vand.u32 4294901760, %v14092_v34 }
 0x768   :  { %11574 = vmatprep.subr.bf16.mxu1 %v16377_v5 }
 0x769   :  { %v14094_v25 = vsub.f32 %v5553_v18, %v5579_v35  ;;  %v14121_v23 = vpack.c.bf16 %v5579_v35, %v5576_v45  ;;  %v5696_v39 = vsub.f32 %v14092_v34, %v5695_v24  ;;  %v4584_v45 = vld [vmem:[%s16355_s14 + $0x18] sm:$0xff] }
 0x76b   :  { %11576 = vmatpush3.bf16.msra.mxu1 %v13896_v61  ;;  %v14075_v61 = vsub.f32 %v5550_v50, %v5570_v40  ;;  %v5702_v14 = vand.u32 4294901760, %v14094_v25  ;;  %v5697_v54 = vand.u32 4294901760, %v5696_v39  ;;  %v4594_v39 = vld [vmem:[%s16355_s14 + $0x68] sm:$0xff] }
 0x76c   :  { %11577 = vmatprep.subr.bf16.mxu1 %v16377_v5 }
 0x76d   :  { %v5681_v60 = vand.u32 4294901760, %v14075_v61  ;;  %v5703_v3 = vsub.f32 %v14094_v25, %v5702_v14 }
 0x76f   :  { %11579 = vmatpush3.bf16.msra.mxu1 %v13898_v0  ;;  %v14077_v0 = vsub.f32 %v5551_v51, %v5573_v1  ;;  %v5682_v31 = vsub.f32 %v14075_v61, %v5681_v60  ;;  %v5704_v53 = vand.u32 4294901760, %v5703_v3  ;;  %v11828_v51 = vpack.c.bf16 %v14094_v25, %v14092_v34  ;;  %v4595_v3 = vld [vmem:[%s16355_s14 + $0x70] sm:$0xff] }
 0x770   :  { %11580 = vmatprep.subr.bf16.mxu1 %v16377_v5 }
 0x771   :  { %v5688_v2 = vand.u32 4294901760, %v14077_v0  ;;  %v5683_v26 = vand.u32 4294901760, %v5682_v31  ;;  %v11820_v55 = vpack.c.bf16 %v5704_v53, %v5697_v54  ;;  %v11824_v50 = vpack.c.bf16 %v14077_v0, %v14075_v61  ;;  %v4585_v61 = vld [vmem:[%s16355_s14 + $0x20] sm:$0xff] }
 0x772   :  { %10803 = vmatmul.mubr.f32.vlgmr.msra.gmra.mrb[8].mxu1 %v14008_v58  ;;  %v4637_v11 = vand.u32 4294901760, %v4585_v61 }
 0x773   :  { %11582 = vmatpush3.bf16.msra.mxu1 %v13828_v7  ;;  %10821 = vmatprep.mubr.msk.f32.mxu1 %vm12786_vm9, %v16537_v63  ;;  %v5567_v7 = vsel %vm875_vm0, %v13662_v59, 0  ;;  %v5689_v47 = vsub.f32 %v14077_v0, %v5688_v2  ;;  %v11840_v57 = vpack.c.bf16 %v5688_v2, %v5681_v60  ;;  %v4586_v0 = vld [vmem:[%s16355_s14 + $0x28] sm:$0xff]  ;;  %v4588_v60 = vld [vmem:[%s16355_s14 + $0x38] sm:$0xff]  ;;  %v4589_v2 = vld [vmem:[%s16355_s14 + $0x40] sm:$0xff] }
 0x774   :  { %11583 = vmatprep.subr.bf16.mxu1 %v16377_v5  ;;  %v14102_v59 = vand.u32 4294901760, %v5567_v7 }
 0x775   :  { %v5690_v37 = vand.u32 4294901760, %v5689_v47 }
 0x776   :  { %v5669_v46 = vsub.f32 %v5567_v7, %v14102_v59  ;;  %v4587_v7 = vld [vmem:[%s16355_s14 + $0x30] sm:$0xff] }
 0x777   :  { %11585 = vmatpush3.bf16.msra.mxu1 %v13842_v41  ;;  %v14105_v41 = vpack.c.bf16 %v5573_v1, %v5570_v40  ;;  %v11816_v49 = vpack.c.bf16 %v5690_v37, %v5683_v26  ;;  %v11844_v40 = vpack.c.bf16 %v5702_v14, %v5695_v24  ;;  %v4581_v1 = vld [vmem:[%s16355_s14] sm:$0xff]  ;;  %v14214_v24 = vsub.f32 %v4585_v61, %v4637_v11 }
 0x778   :  { %11586 = vmatprep.subr.bf16.mxu1 %v16377_v5  ;;  %v5670_v19 = vand.u32 4294901760, %v5669_v46  ;;  %v4625_v18 = vand.u32 4294901760, %v4581_v1  ;;  %v4593_v14 = vld [vmem:[%s16355_s14 + $0x60] sm:$0xff] }
 0x77a   :  { %v5671_v30 = vsub.f32 %v5669_v46, %v5670_v19  ;;  %v14193_v34 = vpack.c.bf16 %v4628_v10, %v4625_v18  ;;  %v14195_v25 = vsub.f32 %v4581_v1, %v4625_v18 }
 0x77b   :  { %11588 = vmatpush3.bf16.msra.mxu1 %v13854_v8  ;;  %v5641_v8 = vsub.f32 %v14080_v29, %v5640_v12 }
 0x77c   :  { %11589 = vmatprep.subr.bf16.mxu1 %v16377_v5  ;;  %16540 = vst [vmem:[#allocation12_spill] sm:$0xff] %v14193_v34  ;;  %11594 = vmatpush1.bf16.msra.mxu0 %v14193_v34 }
 0x77d   :  { %v5642_v6 = vand.u32 4294901760, %v5641_v8  ;;  %11595 = vmatprep.subr.bf16.mxu0 %v16377_v5 }
 0x77f   :  { %11591 = vmatpush3.bf16.msra.mxu1 %v13867_v9  ;;  %v5651_v9 = vsub.f32 %v14100_v28, %v5650_v22 }
 0x780   :  { %11809 = vmatprep.subr.bf16.mxu1 %v14105_v41 }
 0x781   :  { %v5652_v62 = vand.u32 4294901760, %v5651_v9 }
 0x782   :  { %10822 = vmatmul.mubr.f32.vlgmr.msra.gmra.mrb[8].mxu1 %v14008_v58  ;;  %v5672_v58 = vand.u32 4294901760, %v5671_v30  ;;  %v4664_v30 = vand.u32 4294901760, %v4594_v39 }
 0x783   :  { %11811 = vmatpush3.bf16.msra.mxu1 %v14105_v41  ;;  %10832 = vmatprep.mubr.f32.mxu1 %v5642_v6 }
 0x784   :  { %11813 = vmatprep.subr.bf16.mxu1 %v14121_v23 }
 0x787   :  { %11815 = vmatpush3.bf16.msra.mxu1 %v14121_v23 }
 0x788   :  { %11817 = vmatprep.subr.bf16.mxu1 %v11816_v49 }
 0x78a   :  { %10833 = vmatmul.mubr.f32.vlgmr.msra.gmra.mrb[10].mxu1 %v5652_v62 }
 0x78b   :  { %10835 = vmatprep.mubr.f32.mxu1 %v5662_v56  ;;  %11819 = vmatpush3.bf16.msra.mxu1 %v11816_v49  ;;  %v4661_v49 = vand.u32 4294901760, %v4593_v14  ;;  %v4667_v56 = vand.u32 4294901760, %v4595_v3 }
 0x78c   :  { %11821 = vmatprep.subr.bf16.mxu1 %v11820_v55 }
 0x78e   :  { %10836 = vmatmul.mubr.f32.gmra.mrb[12].mxu1 %v5672_v58 }
 0x78f   :  { %11823 = vmatpush3.bf16.msra.mxu1 %v11820_v55  ;;  %10846 = vmatprep.mubr.f32.mxu1 %v14060_v44  ;;  %v14247_v55 = vsub.f32 %v4593_v14, %v4661_v49 }
 0x790   :  { %11825 = vmatprep.subr.bf16.mxu1 %v11824_v50 }
 0x792   :  { %10847 = vmatmul.mubr.f32.vlgmr.msra.gmra.mrb[10].mxu1 %v14084_v42 }
 0x793   :  { %10849 = vmatprep.mubr.f32.mxu1 %v14096_v20  ;;  %11827 = vmatpush3.bf16.msra.mxu1 %v11824_v50  ;;  %v14250_v50 = vsub.f32 %v4594_v39, %v4664_v30 }
 0x794   :  { %11829 = vmatprep.subr.bf16.mxu1 %v11828_v51 }
 0x796   :  { %10850 = vmatmul.mubr.f32.gmra.mrb[12].mxu1 %v14102_v59 }
 0x797   :  { %11831 = vmatpush3.bf16.msra.mxu1 %v11828_v51  ;;  %10860 = vmatprep.mubr.f32.mxu1 %v14080_v29  ;;  %v4634_v29 = vand.u32 4294901760, %v4584_v45  ;;  %v14252_v51 = vsub.f32 %v4595_v3, %v4667_v56 }
 0x798   :  { %11833 = vmatprep.subr.bf16.mxu1 %v14105_v41 }
 0x799   :  { %v14212_v47 = vsub.f32 %v4584_v45, %v4634_v29 }
 0x79a   :  { %10861 = vmatmul.mubr.f32.vlgmr.msra.gmra.mrb[10].mxu1 %v14100_v28  ;;  %v4590_v28 = vld [vmem:[%s16355_s14 + $0x48] sm:$0xff] }
 0x79b   :  { %10863 = vmatprep.mubr.f32.mxu1 %v5659_v52  ;;  %11835 = vmatpush3.bf16.msra.mxu1 %v14105_v41  ;;  %v4643_v52 = vand.u32 4294901760, %v4587_v7 }
 0x79c   :  { %11837 = vmatprep.subr.bf16.mxu1 %v14121_v23 }
 0x79d   :  { %v14229_v6 = vsub.f32 %v4587_v7, %v4643_v52 }
 0x79e   :  { %10864 = vmatmul.mubr.f32.gmra.mrb[12].mxu1 %v5669_v46  ;;  %v4652_v46 = vand.u32 4294901760, %v4590_v28 }
 0x79f   :  { %11839 = vmatpush3.bf16.msra.mxu1 %v14121_v23  ;;  %10874 = vmatprep.mubr.f32.mxu1 %v5640_v12 }
 0x7a0   :  { %11841 = vmatprep.subr.bf16.mxu1 %v11840_v57  ;;  %v14240_v53 = vsub.f32 %v4590_v28, %v4652_v46 }
 0x7a2   :  { %10875 = vmatmul.mubr.f32.vlgmr.msra.gmra.mrb[10].mxu1 %v5650_v22  ;;  %v4649_v22 = vand.u32 4294901760, %v4589_v2 }
 0x7a3   :  { %10877 = vmatprep.mubr.f32.mxu1 %v5660_v48  ;;  %11843 = vmatpush3.bf16.msra.mxu1 %v11840_v57 }
 0x7a4   :  { %11845 = vmatprep.subr.bf16.mxu1 %v11844_v40  ;;  %v14233_v9 = vsub.f32 %v4589_v2, %v4649_v22  ;;  %v14261_v1 = vpack.c.bf16 %v4652_v46, %v4649_v22 }
 0x7a6   :  { %10878 = vmatmul.mubr.f32.gmra.mrb[12].mxu1 %v5670_v19  ;;  %v4596_v19 = vld [vmem:[%s16355_s14 + $0x78] sm:$0xff]  ;;  %16544 = vst [vmem:[#allocation16_spill] sm:$0xff] %v14261_v1 }
 0x7a7   :  { %11847 = vmatpush3.bf16.msra.mxu1 %v11844_v40  ;;  %10888 = vmatprep.mubr.f32.mxu1 %v14060_v44  ;;  %v4670_v58 = vand.u32 4294901760, %v4596_v19 }
 0x7a8   :  { %11849 = vmatprep.subr.bf16.mxu1 %v14105_v41 }
 0x7a9   :  { %v14254_v57 = vsub.f32 %v4596_v19, %v4670_v58  ;;  %v14273_v18 = vpack.c.bf16 %v4670_v58, %v4667_v56 }
 0x7aa   :  { %10889 = vmatmul.mubr.f32.vlgmr.msra.gmra.mrb[10].mxu1 %v14084_v42 }
 0x7ab   :  { %10891 = vmatprep.mubr.f32.mxu1 %v14096_v20  ;;  %11851 = vmatpush3.bf16.msra.mxu1 %v14105_v41  ;;  %v4592_v41 = vld [vmem:[%s16355_s14 + $0x58] sm:$0xff]  ;;  %16547 = vst [vmem:[#allocation19_spill] sm:$0xff] %v14273_v18 }
 0x7ac   :  { %11853 = vmatprep.subr.bf16.mxu1 %v14121_v23  ;;  %v4658_v37 = vand.u32 4294901760, %v4592_v41 }
 0x7ae   :  { %10892 = vmatmul.mubr.f32.gmra.mrb[12].mxu1 %v14102_v59  ;;  %v14245_v62 = vsub.f32 %v4592_v41, %v4658_v37  ;;  %v9573_v41 = vld [vmem:[%s16353_s12] ss:$0 sm:$0xff] }
 0x7af   :  { %11855 = vmatpush3.bf16.msra.mxu1 %v14121_v23  ;;  %10902 = vmatprep.mubr.f32.mxu1 %v14060_v44  ;;  %v4583_v44 = vld [vmem:[%s16355_s14 + $0x10] sm:$0xff]  ;;  %v4646_v23 = vand.u32 4294901760, %v4588_v60 }
 0x7b0   :  { %11856 = vmatprep.subr.bf16.mxu1 %v16377_v5  ;;  %v4631_v35 = vand.u32 4294901760, %v4583_v44 }
 0x7b1   :  { %v14231_v48 = vsub.f32 %v4588_v60, %v4646_v23  ;;  %v14257_v40 = vpack.c.bf16 %v4646_v23, %v4643_v52  ;;  %v9572_v60 = vld [vmem:[%s16352_s11] ss:$0 sm:$0xff] }
 0x7b2   :  { %10903 = vmatmul.mubr.f32.vlgmr.msra.gmra.mrb[10].mxu1 %v14084_v42  ;;  %v4640_v42 = vand.u32 4294901760, %v4586_v0  ;;  %v14199_v12 = vsub.f32 %v4583_v44, %v4631_v35  ;;  %v14210_v31 = vpack.c.bf16 %v4634_v29, %v4631_v35  ;;  %v14269_v44 = vpack.c.bf16 %v4664_v30, %v4661_v49 }
 0x7b3   :  { %10905 = vmatprep.mubr.f32.mxu1 %v14096_v20  ;;  %v14197_v20 = vsub.f32 %v4582_v33, %v4628_v10  ;;  %16543 = vst [vmem:[#allocation15_spill] sm:$0xff] %v14257_v40 }
 0x7b4   :  { %16541 = vst [vmem:[#allocation13_spill] sm:$0xff] %v14210_v31  ;;  %v14220_v8 = vsub.f32 %v4586_v0, %v4640_v42  ;;  %v14238_v54 = vpack.c.bf16 %v4640_v42, %v4637_v11  ;;  %11597 = vmatpush1.bf16.msra.mxu0 %v14210_v31  ;;  %16546 = vst [vmem:[#allocation18_spill] sm:$0xff] %v14269_v44 }
 0x7b5   :  { %11598 = vmatprep.subr.bf16.mxu0 %v16377_v5 }
 0x7b6   :  { %10906 = vmatmul.mubr.f32.gmra.mrb[12].mxu1 %v14102_v59  ;;  %v4591_v59 = vld [vmem:[%s16355_s14 + $0x50] sm:$0xff]  ;;  %16542 = vst [vmem:[#allocation14_spill] sm:$0xff] %v14238_v54 }
 0x7b7   :  { %v4655_v26 = vand.u32 4294901760, %v4591_v59 }
 0x7b8   :  { %11600 = vmatpush1.bf16.msra.mxu0 %v14238_v54 }
 0x7b9   :  { %v14242_v36 = vsub.f32 %v4591_v59, %v4655_v26  ;;  %11601 = vmatprep.subr.bf16.mxu0 %v16377_v5  ;;  %v14265_v33 = vpack.c.bf16 %v4658_v37, %v4655_v26 }
 0x7bb   :  { %16545 = vst [vmem:[#allocation17_spill] sm:$0xff] %v14265_v33 }
 0x7bc   :  { %11603 = vmatpush1.bf16.msra.mxu0 %v14257_v40 }
 0x7bd   :  { %11604 = vmatprep.subr.bf16.mxu0 %v16377_v5 }
 0x7c0   :  { %11606 = vmatpush1.bf16.msra.mxu0 %v14261_v1 }
 0x7c1   :  { %11607 = vmatprep.subr.bf16.mxu0 %v16377_v5 }
 0x7c4   :  { %11609 = vmatpush1.bf16.msra.mxu0 %v14265_v33 }
 0x7c5   :  { %11610 = vmatprep.subr.bf16.mxu0 %v16377_v5 }
 0x7c8   :  { %11612 = vmatpush1.bf16.msra.mxu0 %v14269_v44 }
 0x7c9   :  { %11613 = vmatprep.subr.bf16.mxu0 %v16377_v5 }
 0x7cc   :  { %11615 = vmatpush1.bf16.msra.mxu0 %v14273_v18 }
 0x7cd   :  { %11616 = vmatprep.subr.bf16.mxu0 %v16377_v5 }
 0x855   :  { %v4409_v10 = vpop.f32.mrb[8].mxu1 }
 0x856   :  { %v12452_v45 = vadd.f32 1e-05, %v4409_v10  ;;  %v10823_v35 = vpop.f32.mrb[9].mxu1 }
 0x857   :  { %v4598_v35 = vld [vmem:[%s16355_s14 + $0x88] sm:$0xff] }
 0x858   :  { %12716 = vrsqrt.f32 %v12452_v45  ;;  %v4597_v45 = vld [vmem:[%s16355_s14 + $0x80] sm:$0xff] }
 0x862   :  { %v12717_v61 = vpop.eup %12716 }
 0x863   :  { %v4421_v0 = vrot.slane %v12717_v61, %v13972_v43 }
 0x865   :  { %v4422_v29 = vcombine.high %v4421_v0, %v4421_v0  ;;  %v4429_v11 = vrot.slane %v4421_v0, %v13972_v43 }
 0x867   :  { %v4440_v42 = vrot.slane %v4429_v11, %v13976_v17  ;;  %v4436_v7 = vrot.slane %v4422_v29, %v13972_v43  ;;  %v4673_v29 = vand.u32 4294901760, %v4597_v45  ;;  %v4676_v11 = vand.u32 4294901760, %v4598_v35 }
 0x869   :  { %v4448_v2 = vmul.f32 %v4440_v42, %v13986_v38  ;;  %v4447_v28 = vmul.f32 %v4440_v42, %v13983_v32  ;;  %v4444_v59 = vrot.slane %v4436_v7, %v13976_v17  ;;  %v14302_v7 = vpack.c.bf16 %v4676_v11, %v4673_v29 }
 0x86b   :  { %v4459_v14 = vmul.f32 %v9572_v60, %v4448_v2  ;;  %v4458_v52 = vmul.f32 %v9572_v60, %v4447_v28  ;;  %v4450_v23 = vmul.f32 %v4444_v59, %v13992_v4  ;;  %v4449_v22 = vmul.f32 %v4444_v59, %v13989_v21  ;;  %16548 = vst [vmem:[#allocation20_spill] sm:$0xff] %v14302_v7  ;;  %v4600_v2 = vld [vmem:[%s16355_s14 + $0x98] sm:$0xff] }
 0x86c   :  { %11618 = vmatpush1.bf16.msra.mxu0 %v14302_v7  ;;  %v4682_v59 = vand.u32 4294901760, %v4600_v2 }
 0x86d   :  { %v4470_v46 = vadd.f32 %v9573_v41, %v4459_v14  ;;  %v4469_v26 = vadd.f32 %v9573_v41, %v4458_v52  ;;  %v4461_v37 = vmul.f32 %v9572_v60, %v4450_v23  ;;  %v4460_v39 = vmul.f32 %v9572_v60, %v4449_v22  ;;  %v4599_v60 = vld [vmem:[%s16355_s14 + $0x90] sm:$0xff]  ;;  %11619 = vmatprep.subr.bf16.mxu0 %v16377_v5  ;;  %v4601_v52 = vld [vmem:[%s16355_s14 + $0xa0] sm:$0xff]  ;;  %v4602_v23 = vld [vmem:[%s16355_s14 + $0xa8] sm:$0xff] }
 0x86e   :  { %v4679_v28 = vand.u32 4294901760, %v4599_v60 }
 0x86f   :  { %v9575_v3 = vmul.f32 -1.442695, %v4470_v46  ;;  %v9574_v38 = vmul.f32 -1.442695, %v4469_v26  ;;  %v4472_v49 = vadd.f32 %v9573_v41, %v4461_v37  ;;  %v14293_v32 = vadd.f32 %v9573_v41, %v4460_v39 }
 0x870   :  { %v14312_v41 = vpack.c.bf16 %v4682_v59, %v4679_v28  ;;  %v4685_v37 = vand.u32 4294901760, %v4601_v52  ;;  %v4688_v39 = vand.u32 4294901760, %v4602_v23 }
 0x871   :  { %12718 = vpow2.f32 %v9575_v3  ;;  %v9577_v19 = vmul.f32 -1.442695, %v4472_v49  ;;  %v9576_v30 = vmul.f32 -1.442695, %v14293_v32 }
 0x872   :  { %12720 = vpow2.f32 %v9574_v38  ;;  %16549 = vst [vmem:[#allocation21_spill] sm:$0xff] %v14312_v41  ;;  %11621 = vmatpush1.bf16.msra.mxu0 %v14312_v41  ;;  %v14326_v38 = vsub.f32 %v4597_v45, %v4673_v29  ;;  %v14342_v45 = vpack.c.bf16 %v4688_v39, %v4685_v37 }
 0x873   :  { %12722 = vpow2.f32 %v9577_v19  ;;  %11622 = vmatprep.subr.bf16.mxu0 %v16377_v5  ;;  %v14328_v19 = vsub.f32 %v4598_v35, %v4676_v11  ;;  %v14344_v35 = vsub.f32 %v4601_v52, %v4685_v37  ;;  %v16555_v37 = vmov 0.0|0.0  }
 0x874   :  { %12724 = vpow2.f32 %v9576_v30  ;;  %v14330_v30 = vsub.f32 %v4599_v60, %v4679_v28  ;;  %16553 = vst [vmem:[#allocation25_spill] sm:$0xff] %v14342_v45 }
 0x876   :  { %11624 = vmatpush1.bf16.msra.mxu0 %v14342_v45 }
 0x877   :  { %11625 = vmatprep.subr.bf16.mxu0 %v16555_v37 }
 0x87b   :  { %v12719_v56 = vpop.eup %12718 }
 0x87c   :  { %v12721_v4 = vpop.eup %12720  ;;  %v4486_v58 = vadd.f32 1.0, %v12719_v56  ;;  %v14332_v56 = vsub.f32 %v4600_v2, %v4682_v59 }
 0x87d   :  { %v12723_v21 = vpop.eup %12722  ;;  %v4485_v10 = vadd.f32 1.0, %v12721_v4  ;;  %v4603_v4 = vld [vmem:[%s16355_s14 + $0xb0] sm:$0xff] }
 0x87e   :  { %v12725_v61 = vpop.eup %12724  ;;  %12726 = vrcp.f32 %v4486_v58  ;;  %v4488_v0 = vadd.f32 1.0, %v12723_v21  ;;  %v4604_v58 = vld [vmem:[%s16355_s14 + $0xb8] sm:$0xff]  ;;  %v4691_v60 = vand.u32 4294901760, %v4603_v4 }
 0x87f   :  { %12728 = vrcp.f32 %v4485_v10  ;;  %v4487_v42 = vadd.f32 1.0, %v12725_v61  ;;  %v4694_v2 = vand.u32 4294901760, %v4604_v58 }
 0x880   :  { %12730 = vrcp.f32 %v4488_v0  ;;  %v14346_v0 = vsub.f32 %v4602_v23, %v4688_v39 }
 0x881   :  { %12732 = vrcp.f32 %v4487_v42  ;;  %v14362_v39 = vpack.c.bf16 %v4694_v2, %v4691_v60  ;;  %v14368_v52 = vsub.f32 %v4604_v58, %v4694_v2 }
 0x883   :  { %16556 = vst [vmem:[#allocation27_spill] sm:$0xff] %v14362_v39  ;;  %11627 = vmatpush1.bf16.msra.mxu0 %v14362_v39 }
 0x884   :  { %11628 = vmatprep.subr.bf16.mxu0 %v16555_v37 }
 0x885   :  { %v14314_v14 = vpop.f32.mrb[10].mxu1 }
 0x886   :  { %16550 = vst [vmem:[#allocation22_spill] sm:$0xff] %v14314_v14  ;;  %v14322_v22 = vpop.f32.mrb[11].mxu1 }
 0x887   :  { %16551 = vst [vmem:[#allocation23_spill] sm:$0xff] %v14322_v22 }
 0x888   :  { %v12727_v3 = vpop.eup %12726 }
 0x889   :  { %v12729_v21 = vpop.eup %12728  ;;  %v14340_v10 = vpop.f32.mrb[12].mxu1  ;;  %v4498_v61 = vmul.f32 %v12727_v3, %v4470_v46 }
 0x88a   :  { %16552 = vst [vmem:[#allocation24_spill] sm:$0xff] %v14340_v10  ;;  %v12731_v29 = vpop.eup %12730  ;;  %v14348_v11 = vpop.f32.mrb[13].mxu1  ;;  %v14350_v42 = vmul.f32 %v12729_v21, %v4469_v26 }
 0x88b   :  { %16554 = vst [vmem:[#allocation26_spill] sm:$0xff] %v14348_v11  ;;  %v12733_v28 = vpop.eup %12732  ;;  %4510 = vrot.lane.b32.xlu1 %v4498_v61, %s12784_s28  ;;  %v4526_v59 = vmul.f32 %v12951_v15, %v4498_v61  ;;  %v4558_v5 = vrot.slane %v4498_v61, 1  ;;  %v4500_v46 = vmul.f32 %v12731_v29, %v4472_v49  ;;  %v14365_v61 = vsub.f32 %v4603_v4, %v4691_v60 }
 0x88c   :  { %4508 = vrot.lane.b32.xlu0 %v14350_v42, %s12784_s28  ;;  %v4549_v26 = vmul.f32 %v12947_v13, %v14350_v42  ;;  %v4499_v23 = vmul.f32 %v12733_v28, %v14293_v32  ;;  %v16557_v32 = vrot.slane %v14350_v42, 7  ;;  %v16386_v4 = vand.u32 4294901760, %v14195_v25 }
 0x88d   :  { %v4534_v3 = vrot.slane %v4526_v59, 7  ;;  %v4528_v49 = vmul.f32 %v12954_v16, %v4500_v46  ;;  %v4562_v21 = vrot.slane %v4500_v46, 1  ;;  %v16385_v60 = vand.u32 4294901760, %v14197_v20 }
 0x88e   :  { %v4557_v29 = vrot.slane %v4549_v26, 1  ;;  %v4536_v17 = vrot.slane %v4499_v23, 7  ;;  %v4551_v43 = vmul.f32 %v12966_v27, %v4499_v23  ;;  %v16397_v16 = vand.u32 4294901760, %v14233_v9 }
 0x88f   :  { %4514 = vrot.lane.b32.xlu1 %v4500_v46, %s12784_s28  ;;  %v4538_v15 = vrot.slane %v4528_v49, 7  ;;  %4572 = vst.msk [vmem:[#allocation2 + $0x38] sm:$0x7f] %vm4571_vm12, %v4562_v21  ;;  %v14375_v28 = vsel %vm195_vm5, %v16557_v32, %v4534_v3  ;;  %v16390_v46 = vand.u32 4294901760, %v14199_v12  ;;  %v4777_v49 = vsub.f32 %v14195_v25, %v16386_v4 }
 0x890   :  { %v4559_v59 = vsel %vm221_vm1, %v4557_v29, %v4558_v5  ;;  %4512 = vrot.lane.b32.xlu0 %v4499_v23, %s12784_s28  ;;  %v4560_v58 = vrot.slane %v4551_v43, 1  ;;  %v14383_v2 = vsel %vm195_vm5, %v4534_v3, %v4536_v17  ;;  %v4784_v43 = vsub.f32 %v14197_v20, %v16385_v60 }
 0x891   :  { %4568 = vst.msk [vmem:[#allocation2 + $0x8] sm:$0xff] %vm3242_vm10, %v4559_v59  ;;  %v14389_v26 = vsel %vm195_vm5, %v4536_v17, %v4538_v15  ;;  %v16387_v23 = vand.u32 4294901760, %v14212_v47  ;;  %v4791_v32 = vsub.f32 %v14199_v12, %v16390_v46  ;;  %v4778_v15 = vand.u32 4294901760, %v4777_v49 }
 0x892   :  { %v4561_v3 = vsel %vm221_vm1, %v4558_v5, %v4560_v58  ;;  %v4563_v29 = vsel %vm221_vm1, %v4560_v58, %v4562_v21  ;;  %v4785_v17 = vand.u32 4294901760, %v4784_v43  ;;  %v16388_v60 = vand.u32 4294901760, %v14214_v24 }
 0x893   :  { %4569 = vst.msk [vmem:[#allocation2 + $0x18] sm:$0xff] %vm3242_vm10, %v4561_v3  ;;  %4570 = vst.msk [vmem:[#allocation2 + $0x28] sm:$0xff] %vm3242_vm10, %v4563_v29  ;;  %v4798_v59 = vsub.f32 %v14212_v47, %v16387_v23  ;;  %v4792_v4 = vand.u32 4294901760, %v4791_v32  ;;  %v16389_v5 = vand.u32 4294901760, %v14220_v8  ;;  %v16395_v32 = vand.u32 4294901760, %v14229_v6 }
 0x894   :  { %v14410_v21 = vpack.c.bf16 %v4785_v17, %v4778_v15  ;;  %v4805_v3 = vsub.f32 %v14214_v24, %v16388_v60  ;;  %v16403_v11 = vand.u32 4294901760, %v14245_v62  ;;  %v16404_v13 = vand.u32 4294901760, %v14247_v55 }
 0x895   :  { %v4799_v58 = vand.u32 4294901760, %v4798_v59  ;;  %v4812_v49 = vsub.f32 %v14220_v8, %v16389_v5  ;;  %v16396_v59 = vand.u32 4294901760, %v14231_v48  ;;  %v4819_v5 = vsub.f32 %v14229_v6, %v16395_v32 }
 0x896   :  { %v14418_v43 = vld [vmem:[#allocation2 + $0x38] sm:$0xff]  ;;  %v4806_v23 = vand.u32 4294901760, %v4805_v3  ;;  %v16398_v32 = vand.u32 4294901760, %v14240_v53 }
 0x897   :  { %v14420_v29 = vpack.c.bf16 %v4799_v58, %v4792_v4  ;;  %6188 = vst.msk [vmem:[#allocation2 + $0x3f] sm:$0x1] %vm4501_vm8, %v16537_v63  ;;  %v4813_v17 = vand.u32 4294901760, %v4812_v49  ;;  %v4826_v58 = vsub.f32 %v14231_v48, %v16396_v59  ;;  %v4820_v3 = vand.u32 4294901760, %v4819_v5 }
 0x898   :  { %v4574_v15 = vld [vmem:[#allocation2 + $0x8] sm:$0xff]  ;;  %v4840_v5 = vsub.f32 %v14240_v53, %v16398_v32  ;;  %v16402_v59 = vand.u32 4294901760, %v14242_v36  ;;  %v4854_v32 = vsub.f32 %v14245_v62, %v16403_v11  ;;  %v16409_v11 = vand.u32 4294901760, %v14254_v57 }
 0x899   :  { %v4613_v60 = vsel %vm3242_vm10, %v4574_v15, 0  ;;  %v14432_v4 = vpack.c.bf16 %v4813_v17, %v4806_v23  ;;  %v4827_v27 = vand.u32 4294901760, %v4826_v58  ;;  %v4833_v15 = vsub.f32 %v14233_v9, %v16397_v16 }
 0x89a   :  { %v14430_v46 = vand.u32 4294901760, %v4613_v60  ;;  %v4841_v58 = vand.u32 4294901760, %v4840_v5  ;;  %v4847_v16 = vsub.f32 %v14242_v36, %v16402_v59  ;;  %v4855_v5 = vand.u32 4294901760, %v4854_v32 }
 0x89b   :  { %v14446_v17 = vpack.c.bf16 %v4827_v27, %v4820_v3  ;;  %v4834_v10 = vand.u32 4294901760, %v4833_v15  ;;  %v4861_v59 = vsub.f32 %v14247_v55, %v16404_v13 }
 0x89c   :  { %v14439_v49 = vsub.f32 %v4613_v60, %v14430_v46  ;;  %v4848_v15 = vand.u32 4294901760, %v4847_v16 }
 0x89d   :  { %v14459_v3 = vpack.c.bf16 %v4841_v58, %v4834_v10  ;;  %v4862_v16 = vand.u32 4294901760, %v4861_v59  ;;  %v16406_v58 = vand.u32 4294901760, %v14252_v51  ;;  %v16411_v59 = vand.u32 4294901760, %v14328_v19 }
 0x89e   :  { %v16401_v23 = vand.u32 4294901760, %v14439_v49 }
 0x89f   :  { %v4875_v32 = vsub.f32 %v14252_v51, %v16406_v58  ;;  %v4896_v58 = vsub.f32 %v14328_v19, %v16411_v59  ;;  %v16416_v59 = vand.u32 4294901760, %v14344_v35 }
 0x8a0   :  { %v4715_v60 = vsub.f32 %v14439_v49, %v16401_v23  ;;  %v16405_v23 = vand.u32 4294901760, %v14250_v50 }
 0x8a1   :  { %v4876_v22 = vand.u32 4294901760, %v4875_v32 }
 0x8a2   :  { %v4716_v27 = vand.u32 4294901760, %v4715_v60  ;;  %v4868_v10 = vsub.f32 %v14250_v50, %v16405_v23  ;;  %v14472_v60 = vpack.c.bf16 %v4855_v5, %v4848_v15  ;;  %v16410_v15 = vand.u32 4294901760, %v14326_v38 }
 0x8a4   :  { %4717 = vmatprep.mubr.f32.mxu0 %v4716_v27  ;;  %v4869_v14 = vand.u32 4294901760, %v4868_v10  ;;  %v4882_v27 = vsub.f32 %v14254_v57, %v16409_v11  ;;  %v4889_v10 = vsub.f32 %v14326_v38, %v16410_v15  ;;  %v4897_v11 = vand.u32 4294901760, %v4896_v58 }
 0x8a5   :  { %v16423_v58 = vand.u32 4294901760, %v14346_v0 }
 0x8a6   :  { %v14482_v13 = vpack.c.bf16 %v4869_v14, %v4862_v16  ;;  %v4883_v23 = vand.u32 4294901760, %v4882_v27  ;;  %v4890_v39 = vand.u32 4294901760, %v4889_v10  ;;  %v16412_v14 = vand.u32 4294901760, %v14330_v30 }
 0x8a7   :  { %v16415_v16 = vand.u32 4294901760, %v14332_v56 }
 0x8a8   :  { %v14486_v5 = vpack.c.bf16 %v4883_v23, %v4876_v22  ;;  %v14496_v32 = vpack.c.bf16 %v4897_v11, %v4890_v39  ;;  %v4903_v22 = vsub.f32 %v14330_v30, %v16412_v14  ;;  %v4917_v11 = vsub.f32 %v14344_v35, %v16416_v59 }
 0x8a9   :  { %v4910_v23 = vsub.f32 %v14332_v56, %v16415_v16  ;;  %v4924_v39 = vsub.f32 %v14346_v0, %v16423_v58  ;;  %v16421_v16 = vand.u32 4294901760, %v14365_v61  ;;  %v16558_v58 = vrot.slane %v14350_v42, 7 }
 0x8aa   :  { %v4904_v27 = vand.u32 4294901760, %v4903_v22  ;;  %v4918_v14 = vand.u32 4294901760, %v4917_v11  ;;  %v16422_v22 = vand.u32 4294901760, %v14368_v52 }
 0x8ab   :  { %v4911_v15 = vand.u32 4294901760, %v4910_v23  ;;  %v4925_v45 = vand.u32 4294901760, %v4924_v39 }
 0x8ad   :  { %v14506_v10 = vpack.c.bf16 %v4911_v15, %v4904_v27  ;;  %v14516_v23 = vpack.c.bf16 %v4925_v45, %v4918_v14  ;;  %v4931_v15 = vsub.f32 %v14365_v61, %v16421_v16  ;;  %v4938_v27 = vsub.f32 %v14368_v52, %v16422_v22  ;;  %v4578_v22 = vld [vmem:[#allocation2 + $0x28] sm:$0xff] }
 0x8af   :  { %v4932_v59 = vand.u32 4294901760, %v4931_v15  ;;  %v4939_v41 = vand.u32 4294901760, %v4938_v27  ;;  %v4576_v15 = vld [vmem:[#allocation2 + $0x18] sm:$0xff] }
 0x8b1   :  { %v14524_v7 = vpack.c.bf16 %v4939_v41, %v4932_v59  ;;  %v4616_v59 = vsel %vm3242_vm10, %v4576_v15, 0 }
 0x8b2   :  { %v14558_v27 = vand.u32 4294901760, %v4616_v59 }
 0x8b4   :  { %v14568_v42 = vsub.f32 %v4616_v59, %v14558_v27 }
 0x8b6   :  { %16559 = vst [vmem:[#allocation28_spill] sm:$0xff] %v14568_v42 }
 0x8fd   :  { %v4511_v14 = vpop.permute.xlu1 %4510 }
 0x8fe   :  { %4522 = vst.msk [vmem:[#allocation2 + $0x10] sm:$0xff] %vm4520_vm13, %v4511_v14  ;;  %v4509_v41 = vpop.permute.xlu0 %4508  ;;  %v4619_v14 = vsel %vm3242_vm10, %v4578_v22, 0 }
 0x8ff   :  { %4546 = vst.msk [vmem:[#allocation2 + $0x10] sm:$0xff] %vm3242_vm10, %v14375_v28  ;;  %v14570_v28 = vand.u32 4294901760, %v4619_v14 }
 0x900   :  { %4521 = vst.msk [vmem:[#allocation2] sm:$0xff] %vm4520_vm13, %v4509_v41 }
 0x901   :  { %4545 = vst.msk [vmem:[#allocation2] sm:$0xfe] %vm4544_vm14, %v16558_v58  ;;  %v4515_v16 = vpop.permute.xlu1 %4514 }
 0x902   :  { %4524 = vst.msk [vmem:[#allocation2 + $0x30] sm:$0xff] %vm4520_vm13, %v4515_v16  ;;  %v4513_v45 = vpop.permute.xlu0 %4512  ;;  %v4622_v16 = vsel %vm3242_vm10, %v14418_v43, 0 }
 0x903   :  { %4548 = vst.msk [vmem:[#allocation2 + $0x30] sm:$0xff] %vm3242_vm10, %v14389_v26  ;;  %v14587_v59 = vand.u32 4294901760, %v4622_v16 }
 0x904   :  { %4523 = vst.msk [vmem:[#allocation2 + $0x20] sm:$0xff] %vm4520_vm13, %v4513_v45  ;;  %v14585_v45 = vsub.f32 %v4619_v14, %v14570_v28 }
 0x905   :  { %4547 = vst.msk [vmem:[#allocation2 + $0x20] sm:$0xff] %vm3242_vm10, %v14383_v2  ;;  %v14603_v1 = vsub.f32 %v4622_v16, %v14587_v59 }
 0x906   :  { %v4575_v58 = vld [vmem:[#allocation2 + $0x10] sm:$0xff]  ;;  %v16562_v16 = vand.u32 4294901760, %v14585_v45 }
 0x907   :  { %v14574_v41 = vand.u32 4294901760, %v4575_v58 }
 0x908   :  { %v4573_v15 = vld [vmem:[#allocation2] sm:$0xff] }
 0x909   :  { %v14576_v22 = vand.u32 4294901760, %v4573_v15  ;;  %6187 = vst.msk [vmem:[#allocation2] sm:$0x1] %vm4501_vm8, %v16537_v63  ;;  %v14582_v2 = vsub.f32 %v4575_v58, %v14574_v41  ;;  %v16560_v58 = vand.u32 4294901760, %v14568_v42 }
 0x90a   :  { %v4579_v39 = vld [vmem:[#allocation2 + $0x30] sm:$0xff] }
 0x90b   :  { %v14590_v43 = vsub.f32 %v4573_v15, %v14576_v22  ;;  %v14596_v26 = vand.u32 4294901760, %v4579_v39  ;;  %v4730_v14 = vsub.f32 %v14568_v42, %v16560_v58  ;;  %v16561_v54 = vand.u32 4294901760, %v14582_v2 }
 0x90c   :  { %v4577_v11 = vld [vmem:[#allocation2 + $0x20] sm:$0xff]  ;;  %v4745_v42 = vsub.f32 %v14585_v45, %v16562_v16  ;;  %v16575_v16 = vld [vmem:[#allocation28_spill] sm:$0xff] }
 0x90d   :  { %v16443_v18 = vand.u32 4294901760, %v14590_v43  ;;  %v14594_v63 = vand.u32 4294901760, %v4577_v11  ;;  %v4736_v31 = vsub.f32 %v14582_v2, %v16561_v54  ;;  %v14616_v58 = vsub.f32 %v4579_v39, %v14596_v26 }
 0x90e   :  { %v4731_v33 = vand.u32 4294901760, %v4730_v14  ;;  %v4746_v14 = vand.u32 4294901760, %v4745_v42  ;;  %v16574_v42 = vpack.c.bf16 %v14368_v52, %v14365_v61 }
 0x90f   :  { %v4721_v15 = vsub.f32 %v14590_v43, %v16443_v18  ;;  %v14609_v40 = vsub.f32 %v4577_v11, %v14594_v63  ;;  %v4759_v18 = vand.u32 4294901760, %v14603_v1  ;;  %v4737_v11 = vand.u32 4294901760, %v4736_v31 }
 0x910   :  { %v4765_v39 = vand.u32 4294901760, %v14616_v58 }
 0x911   :  { %v4722_v44 = vand.u32 4294901760, %v4721_v15  ;;  %v4750_v34 = vand.u32 4294901760, %v14609_v40  ;;  %v4760_v15 = vsub.f32 %v14603_v1, %v4759_v18 }
 0x912   :  { %v4766_v31 = vsub.f32 %v14616_v58, %v4765_v39 }
 0x913   :  { %4723 = vmatmul.mubr.f32.vlgmr.msra.gmra.mrb[10].mxu0 %v4722_v44  ;;  %v4751_v54 = vsub.f32 %v14609_v40, %v4750_v34  ;;  %v4761_v44 = vand.u32 4294901760, %v4760_v15  ;;  %v16579_v15 = vld [vmem:[#allocation15_spill] sm:$0xff] }
 0x914   :  { %11630 = vmatpush1.bf16.msra.mxu0 %v14410_v21  ;;  %4732 = vmatprep.mubr.f32.mxu0 %v4731_v33  ;;  %v4767_v21 = vand.u32 4294901760, %v4766_v31  ;;  %v16581_v31 = vld [vmem:[#allocation16_spill] sm:$0xff] }
 0x915   :  { %11631 = vmatprep.subr.bf16.mxu0 %v16555_v37  ;;  %v4752_v33 = vand.u32 4294901760, %v4751_v54  ;;  %v16577_v54 = vld [vmem:[#allocation13_spill] sm:$0xff] }
 0x917   :  { %4738 = vmatmul.mubr.f32.gmra.mrb[12].mxu0 %v4737_v11  ;;  %v16576_v11 = vld [vmem:[#allocation12_spill] sm:$0xff] }
 0x918   :  { %11633 = vmatpush1.bf16.msra.mxu0 %v14420_v29  ;;  %4747 = vmatprep.mubr.f32.mxu0 %v4746_v14  ;;  %v16564_v29 = vpack.c.bf16 %v14212_v47, %v14199_v12  ;;  %v16578_v14 = vld [vmem:[#allocation14_spill] sm:$0xff] }
 0x919   :  { %11634 = vmatprep.subr.bf16.mxu0 %v16555_v37 }
 0x91b   :  { %4753 = vmatmul.mubr.f32.gmra.mrb[14].mxu0 %v4752_v33  ;;  %v16580_v33 = vand.u32 4294901760, %v14439_v49 }
 0x91c   :  { %11636 = vmatpush1.bf16.msra.mxu0 %v14432_v4  ;;  %4762 = vmatprep.mubr.f32.mxu0 %v4761_v44  ;;  %v16566_v4 = vpack.c.bf16 %v14231_v48, %v14229_v6  ;;  %v16582_v44 = vld [vmem:[#allocation17_spill] sm:$0xff] }
 0x91d   :  { %11637 = vmatprep.subr.bf16.mxu0 %v16555_v37 }
 0x91f   :  { %4768 = vmatmul.mubr.f32.gmra.mrb[16].mxu0 %v4767_v21  ;;  %v16583_v21 = vld [vmem:[#allocation18_spill] sm:$0xff] }
 0x920   :  { %11639 = vmatpush1.bf16.msra.mxu0 %v14446_v17  ;;  %4958 = vmatprep.mubr.f32.mxu0 %v14430_v46  ;;  %v16567_v17 = vpack.c.bf16 %v14240_v53, %v14233_v9 }
 0x921   :  { %11640 = vmatprep.subr.bf16.mxu0 %v16555_v37 }
 0x924   :  { %11642 = vmatpush1.bf16.msra.mxu0 %v14459_v3  ;;  %v16568_v3 = vpack.c.bf16 %v14245_v62, %v14242_v36 }
 0x925   :  { %11643 = vmatprep.subr.bf16.mxu0 %v16555_v37 }
 0x928   :  { %11645 = vmatpush1.bf16.msra.mxu0 %v14472_v60  ;;  %v16569_v60 = vpack.c.bf16 %v14250_v50, %v14247_v55 }
 0x929   :  { %11646 = vmatprep.subr.bf16.mxu0 %v16555_v37 }
 0x92c   :  { %11648 = vmatpush1.bf16.msra.mxu0 %v14482_v13  ;;  %v16563_v13 = vpack.c.bf16 %v14197_v20, %v14195_v25 }
 0x92d   :  { %11649 = vmatprep.subr.bf16.mxu0 %v16555_v37 }
 0x930   :  { %11651 = vmatpush1.bf16.msra.mxu0 %v14486_v5  ;;  %v16570_v5 = vpack.c.bf16 %v14254_v57, %v14252_v51 }
 0x931   :  { %11652 = vmatprep.subr.bf16.mxu0 %v16555_v37 }
 0x934   :  { %11654 = vmatpush1.bf16.msra.mxu0 %v14496_v32  ;;  %v16571_v32 = vpack.c.bf16 %v14328_v19, %v14326_v38 }
 0x935   :  { %11655 = vmatprep.subr.bf16.mxu0 %v16555_v37 }
 0x938   :  { %11657 = vmatpush1.bf16.msra.mxu0 %v14506_v10  ;;  %v16572_v10 = vpack.c.bf16 %v14332_v56, %v14330_v30 }
 0x939   :  { %11658 = vmatprep.subr.bf16.mxu0 %v16555_v37 }
 0x93c   :  { %11660 = vmatpush1.bf16.msra.mxu0 %v14516_v23  ;;  %v16573_v23 = vpack.c.bf16 %v14346_v0, %v14344_v35 }
 0x93d   :  { %11661 = vmatprep.subr.bf16.mxu0 %v16555_v37 }
 0x940   :  { %11663 = vmatpush1.bf16.msra.mxu0 %v14524_v7  ;;  %v16565_v7 = vpack.c.bf16 %v14220_v8, %v14214_v24 }
 0x941   :  { %11664 = vmatprep.subr.bf16.mxu0 %v16555_v37 }
 0x943   :  { %4960 = vmatmul.mubr.f32.vlgmr.msra.gmra.mrb[10].mxu0 %v14576_v22 }
 0x944   :  { %4965 = vmatprep.mubr.f32.mxu0 %v14558_v27  ;;  %11666 = vmatpush1.bf16.msra.mxu0 %v16563_v13  ;;  %v16584_v13 = vld [vmem:[#allocation19_spill] sm:$0xff] }
 0x945   :  { %11667 = vmatprep.subr.bf16.mxu0 %v16555_v37 }
 0x947   :  { %4967 = vmatmul.mubr.f32.gmra.mrb[12].mxu0 %v14574_v41 }
 0x948   :  { %4972 = vmatprep.mubr.f32.mxu0 %v14570_v28  ;;  %11669 = vmatpush1.bf16.msra.mxu0 %v16564_v29  ;;  %v16586_v29 = vld [vmem:[#allocation21_spill] sm:$0xff] }
 0x949   :  { %11670 = vmatprep.subr.bf16.mxu0 %v16555_v37 }
 0x94b   :  { %4974 = vmatmul.mubr.f32.gmra.mrb[14].mxu0 %v14594_v63 }
 0x94c   :  { %4979 = vmatprep.mubr.f32.mxu0 %v14587_v59  ;;  %11672 = vmatpush1.bf16.msra.mxu0 %v16565_v7  ;;  %v16587_v7 = vld [vmem:[#allocation25_spill] sm:$0xff] }
 0x94d   :  { %11673 = vmatprep.subr.bf16.mxu0 %v16555_v37 }
 0x94f   :  { %4981 = vmatmul.mubr.f32.gmra.mrb[16].mxu0 %v14596_v26 }
 0x950   :  { %11675 = vmatpush1.bf16.msra.mxu0 %v16566_v4  ;;  %5100 = vmatprep.mubr.f32.mxu0 %v14439_v49  ;;  %v16585_v49 = vld [vmem:[#allocation20_spill] sm:$0xff]  ;;  %v16588_v4 = vld [vmem:[#allocation27_spill] sm:$0xff] }
 0x951   :  { %11676 = vmatprep.subr.bf16.mxu0 %v16555_v37 }
 0x954   :  { %11678 = vmatpush1.bf16.msra.mxu0 %v16567_v17  ;;  %v16589_v17 = vand.u32 4294901760, %v14195_v25  ;;  %v16595_v25 = vand.u32 4294901760, %v14582_v2 }
 0x955   :  { %11679 = vmatprep.subr.bf16.mxu0 %v16555_v37 }
 0x958   :  { %11681 = vmatpush1.bf16.msra.mxu0 %v16568_v3  ;;  %v16590_v3 = vand.u32 4294901760, %v14197_v20  ;;  %v16596_v20 = vand.u32 4294901760, %v14585_v45 }
 0x959   :  { %11682 = vmatprep.subr.bf16.mxu0 %v16555_v37 }
 0x95c   :  { %11684 = vmatpush1.bf16.msra.mxu0 %v16569_v60  ;;  %v11737_v60 = vpack.c.bf16 %v16590_v3, %v16589_v17 }
 0x95d   :  { %11685 = vmatprep.subr.bf16.mxu0 %v16555_v37 }
 0x960   :  { %11687 = vmatpush1.bf16.msra.mxu0 %v16570_v5  ;;  %v16591_v5 = vand.u32 4294901760, %v14590_v43 }
 0x961   :  { %11688 = vmatprep.subr.bf16.mxu0 %v16555_v37 }
 0x964   :  { %11690 = vmatpush1.bf16.msra.mxu0 %v16571_v32  ;;  %v16592_v32 = vand.u32 4294901760, %v16575_v16 }
 0x965   :  { %11691 = vmatprep.subr.bf16.mxu0 %v16555_v37 }
 0x968   :  { %11693 = vmatpush1.bf16.msra.mxu0 %v16572_v10  ;;  %v16593_v10 = vand.u32 4294901760, %v14199_v12  ;;  %v16599_v12 = vand.u32 4294901760, %v14229_v6  ;;  %v16603_v6 = vand.u32 4294901760, %v14242_v36  ;;  %v16609_v36 = vand.u32 4294901760, %v14326_v38 }
 0x969   :  { %11694 = vmatprep.subr.bf16.mxu0 %v16555_v37  ;;  %v16615_v38 = vand.u32 4294901760, %v14365_v61  ;;  %v6266_v61 = vld [vmem:[%s16359_s18 + $0x18] sm:$0xff] }
 0x96c   :  { %11696 = vmatpush1.bf16.msra.mxu0 %v16573_v23  ;;  %v16594_v23 = vand.u32 4294901760, %v14212_v47  ;;  %v16600_v47 = vand.u32 4294901760, %v14231_v48  ;;  %v16604_v48 = vand.u32 4294901760, %v14245_v62  ;;  %v16610_v62 = vand.u32 4294901760, %v14328_v19 }
 0x96d   :  { %11697 = vmatprep.subr.bf16.mxu0 %v16555_v37  ;;  %v16616_v19 = vand.u32 4294901760, %v14368_v52 }
 0x970   :  { %11699 = vmatpush1.bf16.msra.mxu0 %v16574_v42  ;;  %v11740_v42 = vpack.c.bf16 %v16594_v23, %v16593_v10 }
 0x971   :  { %11700 = vmatprep.subr.bf16.mxu0 %v16555_v37 }
 0x973   :  { %5103 = vmatmul.mubr.f32.vlgmr.msra.gmra.mrb[10].mxu0 %v14590_v43  ;;  %v16597_v43 = vand.u32 4294901760, %v14214_v24  ;;  %v16601_v24 = vand.u32 4294901760, %v14233_v9  ;;  %v16607_v9 = vand.u32 4294901760, %v14252_v51  ;;  %v16613_v51 = vand.u32 4294901760, %v14344_v35  ;;  %v6264_v35 = vld [vmem:[%s16359_s18 + $0x8] sm:$0xff] }
 0x974   :  { %5109 = vmatprep.mubr.f32.mxu0 %v16575_v16  ;;  %11702 = vmatpush1.bf16.msra.mxu0 %v16576_v11  ;;  %v16598_v16 = vand.u32 4294901760, %v14220_v8  ;;  %v6310_v52 = vand.u32 4294901760, %v6264_v35 }
 0x975   :  { %11703 = vmatprep.subr.bf16.mxu0 %v16555_v37 }
 0x977   :  { %5112 = vmatmul.mubr.f32.gmra.mrb[12].mxu0 %v14582_v2  ;;  %v11746_v2 = vpack.c.bf16 %v16600_v47, %v16599_v12 }
 0x978   :  { %5118 = vmatprep.mubr.f32.mxu0 %v14585_v45  ;;  %11705 = vmatpush1.bf16.msra.mxu0 %v16577_v54 }
 0x979   :  { %11706 = vmatprep.subr.bf16.mxu0 %v16555_v37 }
 0x97b   :  { %5121 = vmatmul.mubr.f32.gmra.mrb[14].mxu0 %v14609_v40  ;;  %v11752_v40 = vpack.c.bf16 %v16604_v48, %v16603_v6 }
 0x97c   :  { %5127 = vmatprep.mubr.f32.mxu0 %v14603_v1  ;;  %11708 = vmatpush1.bf16.msra.mxu0 %v16578_v14  ;;  %v16605_v1 = vand.u32 4294901760, %v14247_v55  ;;  %v16611_v55 = vand.u32 4294901760, %v14330_v30  ;;  %v16617_v30 = vmov 0.0  }
 0x97d   :  { %11709 = vmatprep.subr.bf16.mxu0 %v16555_v37 }
 0x97f   :  { %5130 = vmatmul.mubr.f32.gmra.mrb[16].mxu0 %v14616_v58 }
 0x980   :  { %11711 = vmatpush1.bf16.msra.mxu0 %v16579_v15  ;;  %5226 = vmatprep.mubr.f32.mxu0 %v16580_v33  ;;  %v11743_v33 = vpack.c.bf16 %v16598_v16, %v16597_v43  ;;  %v6276_v16 = vld [vmem:[%s16359_s18 + $0x68] sm:$0xff] }
 0x981   :  { %11712 = vmatprep.subr.bf16.mxu0 %v16555_v37 }
 0x984   :  { %11714 = vmatpush1.bf16.msra.mxu0 %v16581_v31 }
 0x985   :  { %11715 = vmatprep.subr.bf16.mxu0 %v16555_v37 }
 0x988   :  { %11717 = vmatpush1.bf16.msra.mxu0 %v16582_v44 }
 0x989   :  { %11718 = vmatprep.subr.bf16.mxu0 %v16555_v37 }
 0x98c   :  { %11720 = vmatpush1.bf16.msra.mxu0 %v16583_v21 }
 0x98d   :  { %11721 = vmatprep.subr.bf16.mxu0 %v16555_v37 }
 0x990   :  { %11723 = vmatpush1.bf16.msra.mxu0 %v16584_v13 }
 0x991   :  { %11724 = vmatprep.subr.bf16.mxu0 %v16555_v37 }
 0x994   :  { %11726 = vmatpush1.bf16.msra.mxu0 %v16585_v49 }
 0x995   :  { %11727 = vmatprep.subr.bf16.mxu0 %v16555_v37 }
 0x998   :  { %11729 = vmatpush1.bf16.msra.mxu0 %v16586_v29 }
 0x999   :  { %11730 = vmatprep.subr.bf16.mxu0 %v16555_v37 }
 0x99c   :  { %11732 = vmatpush1.bf16.msra.mxu0 %v16587_v7 }
 0x99d   :  { %11733 = vmatprep.subr.bf16.mxu0 %v16555_v37 }
 0x9a0   :  { %11735 = vmatpush1.bf16.msra.mxu0 %v16588_v4 }
 0x9a1   :  { %11736 = vmatprep.subr.bf16.mxu0 %v16555_v37 }
 0x9a3   :  { %5230 = vmatmul.mubr.f32.vlgmr.msra.gmra.mrb[10].mxu0 %v16591_v5  ;;  %v6275_v5 = vld [vmem:[%s16359_s18 + $0x60] sm:$0xff] }
 0x9a4   :  { %5237 = vmatprep.mubr.f32.mxu0 %v16592_v32  ;;  %11738 = vmatpush1.bf16.msra.mxu0 %v11737_v60  ;;  %v11770_v60 = vpack.c.bf16 %v16616_v19, %v16615_v38 }
 0x9a5   :  { %11739 = vmatprep.subr.bf16.mxu0 %v16555_v37 }
 0x9a7   :  { %5241 = vmatmul.mubr.f32.gmra.mrb[12].mxu0 %v16595_v25 }
 0x9a8   :  { %5248 = vmatprep.mubr.f32.mxu0 %v16596_v20  ;;  %11741 = vmatpush1.bf16.msra.mxu0 %v11740_v42 }
 0x9a9   :  { %11742 = vmatprep.subr.bf16.mxu0 %v16555_v37 }
 0x9ab   :  { %5252 = vmatmul.mubr.f32.gmra.mrb[14].mxu0 %v4750_v34  ;;  %v16602_v34 = vand.u32 4294901760, %v14240_v53  ;;  %v16608_v53 = vand.u32 4294901760, %v14254_v57  ;;  %v16614_v57 = vand.u32 4294901760, %v14346_v0  ;;  %v6265_v0 = vld [vmem:[%s16359_s18 + $0x10] sm:$0xff] }
 0x9ac   :  { %5259 = vmatprep.mubr.f32.mxu0 %v4759_v18  ;;  %11744 = vmatpush1.bf16.msra.mxu0 %v11743_v33  ;;  %v16606_v18 = vand.u32 4294901760, %v14250_v50  ;;  %v16612_v50 = vand.u32 4294901760, %v14332_v56  ;;  %v6263_v56 = vld [vmem:[%s16359_s18] sm:$0xff]  ;;  %v6277_v33 = vld [vmem:[%s16359_s18 + $0x70] sm:$0xff] }
 0x9ad   :  { %11745 = vmatprep.subr.bf16.mxu0 %v16555_v37  ;;  %v11749_v8 = vpack.c.bf16 %v16602_v34, %v16601_v24  ;;  %v11758_v58 = vpack.c.bf16 %v16608_v53, %v16607_v9  ;;  %v11767_v3 = vpack.c.bf16 %v16614_v57, %v16613_v51  ;;  %v6343_v24 = vand.u32 4294901760, %v6275_v5  ;;  %v6278_v34 = vld [vmem:[%s16359_s18 + $0x78] sm:$0xff]  ;;  %v6279_v51 = vld [vmem:[%s16359_s18 + $0x80] sm:$0xff]  ;;  %v6280_v57 = vld [vmem:[%s16359_s18 + $0x88] sm:$0xff] }
 0x9ae   :  { %v11755_v45 = vpack.c.bf16 %v16606_v18, %v16605_v1  ;;  %v11764_v17 = vpack.c.bf16 %v16612_v50, %v16611_v55  ;;  %v6346_v1 = vand.u32 4294901760, %v6276_v16  ;;  %v6352_v9 = vand.u32 4294901760, %v6278_v34 }
 0x9af   :  { %5263 = vmatmul.mubr.f32.gmra.mrb[16].mxu0 %v4765_v39  ;;  %v11761_v39 = vpack.c.bf16 %v16610_v62, %v16609_v36  ;;  %v14943_v18 = vsub.f32 %v6275_v5, %v6343_v24  ;;  %v6358_v38 = vand.u32 4294901760, %v6280_v57 }
 0x9b0   :  { %11747 = vmatpush1.bf16.msra.mxu0 %v11746_v2  ;;  %5405 = vmatprep.mubr.f32.mxu0 %v14430_v46  ;;  %v14946_v53 = vsub.f32 %v6276_v16, %v6346_v1  ;;  %v14950_v36 = vsub.f32 %v6278_v34, %v6352_v9  ;;  %v14965_v50 = vpack.c.bf16 %v6346_v1, %v6343_v24  ;;  %v16630_v34 = vld [vmem:[#allocation22_spill] sm:$0xff] }
 0x9b1   :  { %11748 = vmatprep.subr.bf16.mxu0 %v16555_v37 }
 0x9b2   :  { %16623 = vst [vmem:[#allocation16_spill] sm:$0xff] %v14965_v50 }
 0x9b4   :  { %11750 = vmatpush1.bf16.msra.mxu0 %v11749_v8 }
 0x9b5   :  { %11751 = vmatprep.subr.bf16.mxu0 %v16555_v37 }
 0x9b8   :  { %11753 = vmatpush1.bf16.msra.mxu0 %v11752_v40 }
 0x9b9   :  { %11754 = vmatprep.subr.bf16.mxu0 %v16555_v37 }
 0x9bc   :  { %11756 = vmatpush1.bf16.msra.mxu0 %v11755_v45  ;;  %v6349_v45 = vand.u32 4294901760, %v6277_v33 }
 0x9bd   :  { %11757 = vmatprep.subr.bf16.mxu0 %v16555_v37 }
 0x9c0   :  { %11759 = vmatpush1.bf16.msra.mxu0 %v11758_v58  ;;  %v14948_v58 = vsub.f32 %v6277_v33, %v6349_v45 }
 0x9c1   :  { %11760 = vmatprep.subr.bf16.mxu0 %v16555_v37 }
 0x9c4   :  { %11762 = vmatpush1.bf16.msra.mxu0 %v11761_v39 }
 0x9c5   :  { %11763 = vmatprep.subr.bf16.mxu0 %v16555_v37 }
 0x9c8   :  { %11765 = vmatpush1.bf16.msra.mxu0 %v11764_v17  ;;  %v14969_v17 = vpack.c.bf16 %v6352_v9, %v6349_v45 }
 0x9c9   :  { %11766 = vmatprep.subr.bf16.mxu0 %v16555_v37 }
 0x9ca   :  { %16624 = vst [vmem:[#allocation17_spill] sm:$0xff] %v14969_v17 }
 0x9cc   :  { %11768 = vmatpush1.bf16.msra.mxu0 %v11767_v3  ;;  %v6355_v3 = vand.u32 4294901760, %v6279_v51 }
 0x9cd   :  { %11769 = vmatprep.subr.bf16.mxu0 %v16555_v37 }
 0x9ce   :  { %v14980_v19 = vpack.c.bf16 %v6358_v38, %v6355_v3 }
 0x9d0   :  { %11771 = vmatpush1.bf16.msra.mxu0 %v11770_v60  ;;  %16625 = vst [vmem:[#allocation18_spill] sm:$0xff] %v14980_v19  ;;  %v6281_v60 = vld [vmem:[%s16359_s18 + $0x90] sm:$0xff] }
 0x9d1   :  { %11772 = vmatprep.subr.bf16.mxu0 %v16555_v37 }
 0x9d3   :  { %5407 = vmatmul.mubr.f32.vlgmr.msra.gmra.mrb[10].mxu0 %v14576_v22 }
 0x9d4   :  { %5412 = vmatprep.mubr.f32.mxu0 %v14558_v27  ;;  %11774 = vmatpush1.bf16.msra.mxu0 %v16576_v11  ;;  %v6270_v11 = vld [vmem:[%s16359_s18 + $0x38] sm:$0xff] }
 0x9d5   :  { %11775 = vmatprep.subr.bf16.mxu0 %v16555_v37  ;;  %v6328_v23 = vand.u32 4294901760, %v6270_v11 }
 0x9d7   :  { %5414 = vmatmul.mubr.f32.gmra.mrb[12].mxu0 %v14574_v41  ;;  %v14927_v47 = vsub.f32 %v6270_v11, %v6328_v23 }
 0x9d8   :  { %5419 = vmatprep.mubr.f32.mxu0 %v14570_v28  ;;  %11777 = vmatpush1.bf16.msra.mxu0 %v16577_v54  ;;  %v6271_v54 = vld [vmem:[%s16359_s18 + $0x40] sm:$0xff] }
 0x9d9   :  { %11778 = vmatprep.subr.bf16.mxu0 %v16555_v37  ;;  %v6331_v42 = vand.u32 4294901760, %v6271_v54 }
 0x9db   :  { %5421 = vmatmul.mubr.f32.gmra.mrb[14].mxu0 %v14594_v63  ;;  %v14929_v2 = vsub.f32 %v6271_v54, %v6331_v42 }
 0x9dc   :  { %5426 = vmatprep.mubr.f32.mxu0 %v14587_v59  ;;  %11780 = vmatpush1.bf16.msra.mxu0 %v16578_v14 }
 0x9dd   :  { %11781 = vmatprep.subr.bf16.mxu0 %v16555_v37 }
 0x9df   :  { %5428 = vmatmul.mubr.f32.gmra.mrb[16].mxu0 %v14596_v26 }
 0x9e0   :  { %11783 = vmatpush1.bf16.msra.mxu0 %v16579_v15  ;;  %5522 = vmatprep.mubr.f32.mxu0 %v14430_v46  ;;  %v6313_v46 = vand.u32 4294901760, %v6265_v0 }
 0x9e1   :  { %11784 = vmatprep.subr.bf16.mxu0 %v16555_v37 }
 0x9e4   :  { %11786 = vmatpush1.bf16.msra.mxu0 %v16581_v31  ;;  %v14893_v31 = vsub.f32 %v6264_v35, %v6310_v52  ;;  %v6361_v35 = vand.u32 4294901760, %v6281_v60 }
 0x9e5   :  { %11787 = vmatprep.subr.bf16.mxu0 %v16555_v37 }
 0x9e6   :  { %v16452_v9 = vand.u32 4294901760, %v14893_v31 }
 0x9e8   :  { %11789 = vmatpush1.bf16.msra.mxu0 %v16582_v44  ;;  %v14895_v44 = vsub.f32 %v6265_v0, %v6313_v46 }
 0x9e9   :  { %11790 = vmatprep.subr.bf16.mxu0 %v16555_v37 }
 0x9ec   :  { %11792 = vmatpush1.bf16.msra.mxu0 %v16583_v21  ;;  %v6272_v21 = vld [vmem:[%s16359_s18 + $0x48] sm:$0xff] }
 0x9ed   :  { %11793 = vmatprep.subr.bf16.mxu0 %v16555_v37  ;;  %v6334_v25 = vand.u32 4294901760, %v6272_v21 }
 0x9ef   :  { %v14936_v6 = vsub.f32 %v6272_v21, %v6334_v25  ;;  %v14957_v39 = vpack.c.bf16 %v6334_v25, %v6331_v42  ;;  %v15013_v21 = vsub.f32 %v6279_v51, %v6355_v3  ;;  %v6285_v25 = vld [vmem:[%s16359_s18 + $0xb0] sm:$0xff]  ;;  %v16631_v51 = vld [vmem:[#allocation6_spill] sm:$0xff] }
 0x9f0   :  { %11795 = vmatpush1.bf16.msra.mxu0 %v16584_v13  ;;  %v6273_v13 = vld [vmem:[%s16359_s18 + $0x50] sm:$0xff]  ;;  %v6373_v16 = vand.u32 4294901760, %v6285_v25 }
 0x9f1   :  { %11796 = vmatprep.subr.bf16.mxu0 %v16555_v37  ;;  %v6337_v20 = vand.u32 4294901760, %v6273_v13  ;;  %16621 = vst [vmem:[#allocation14_spill] sm:$0xff] %v14957_v39 }
 0x9f3   :  { %v14938_v48 = vsub.f32 %v6273_v13, %v6337_v20  ;;  %v15015_v13 = vsub.f32 %v6280_v57, %v6358_v38 }
 0x9f4   :  { %11798 = vmatpush1.bf16.msra.mxu0 %v16585_v49  ;;  %v6274_v49 = vld [vmem:[%s16359_s18 + $0x58] sm:$0xff] }
 0x9f5   :  { %11799 = vmatprep.subr.bf16.mxu0 %v16555_v37  ;;  %v6340_v43 = vand.u32 4294901760, %v6274_v49 }
 0x9f7   :  { %v14941_v40 = vsub.f32 %v6274_v49, %v6340_v43  ;;  %v14961_v55 = vpack.c.bf16 %v6340_v43, %v6337_v20  ;;  %v15017_v49 = vsub.f32 %v6281_v60, %v6361_v35  ;;  %v6286_v20 = vld [vmem:[%s16359_s18 + $0xb8] sm:$0xff] }
 0x9f8   :  { %11801 = vmatpush1.bf16.msra.mxu0 %v16586_v29  ;;  %v6376_v33 = vand.u32 4294901760, %v6286_v20 }
 0x9f9   :  { %11802 = vmatprep.subr.bf16.mxu0 %v16555_v37  ;;  %16622 = vst [vmem:[#allocation15_spill] sm:$0xff] %v14961_v55 }
 0x9fa   :  { %v15046_v60 = vpack.c.bf16 %v6376_v33, %v6373_v16 }
 0x9fc   :  { %11804 = vmatpush1.bf16.msra.mxu0 %v16587_v7  ;;  %16632 = vst [vmem:[#allocation25_spill] sm:$0xff] %v15046_v60 }
 0x9fd   :  { %11805 = vmatprep.subr.bf16.mxu0 %v16555_v37 }
 0xa00   :  { %11807 = vmatpush1.bf16.msra.mxu0 %v16588_v4 }
 0xa01   :  { %12072 = vmatprep.subr.bf16.mxu0 %v16555_v37 }
 0xa03   :  { %5524 = vmatmul.mubr.f32.vlgmr.msra.gmra.mrb[10].mxu0 %v14576_v22 }
 0xa04   :  { %5529 = vmatprep.mubr.f32.mxu0 %v14558_v27  ;;  %v6267_v27 = vld [vmem:[%s16359_s18 + $0x20] sm:$0xff] }
 0xa05   :  { %v6319_v22 = vand.u32 4294901760, %v6267_v27 }
 0xa07   :  { %5531 = vmatmul.mubr.f32.gmra.mrb[12].mxu0 %v14574_v41  ;;  %v6316_v41 = vand.u32 4294901760, %v6266_v61  ;;  %v14910_v4 = vsub.f32 %v6267_v27, %v6319_v22  ;;  %v6284_v27 = vld [vmem:[%s16359_s18 + $0xa8] sm:$0xff] }
 0xa08   :  { %5536 = vmatprep.mubr.f32.mxu0 %v14570_v28  ;;  %v6268_v28 = vld [vmem:[%s16359_s18 + $0x28] sm:$0xff] }
 0xa09   :  { %v14906_v29 = vpack.c.bf16 %v6316_v41, %v6313_v46  ;;  %v14908_v7 = vsub.f32 %v6266_v61, %v6316_v41  ;;  %v15000_v61 = vld [vmem:[%s16356_s15] ss:$0 sm:$0xff]  ;;  %v6370_v41 = vand.u32 4294901760, %v6284_v27 }
 0xa0a   :  { %v6283_v46 = vld [vmem:[%s16359_s18 + $0xa0] sm:$0xff] }
 0xa0b   :  { %5538 = vmatmul.mubr.f32.gmra.mrb[14].mxu0 %v14594_v63  ;;  %v6307_v63 = vand.u32 4294901760, %v6263_v56  ;;  %16618 = vst [vmem:[#allocation28_spill] sm:$0xff] %v14906_v29  ;;  %v15025_v42 = vsub.f32 %v6284_v27, %v6370_v41 }
 0xa0c   :  { %5543 = vmatprep.mubr.f32.mxu0 %v14587_v59  ;;  %v6269_v59 = vld [vmem:[%s16359_s18 + $0x30] sm:$0xff] }
 0xa0d   :  { %v14889_v14 = vpack.c.bf16 %v6310_v52, %v6307_v63  ;;  %v14891_v15 = vsub.f32 %v6263_v56, %v6307_v63  ;;  %v6325_v10 = vand.u32 4294901760, %v6269_v59  ;;  %v6282_v56 = vld [vmem:[%s16359_s18 + $0x98] sm:$0xff]  ;;  %v14993_v63 = vld [vmem:[%s16358_s17] ss:$0 sm:$0xff] }
 0xa0e   :  { %v6364_v0 = vand.u32 4294901760, %v6282_v56  ;;  %v12457_v1 = vadd.f32 %v16630_v34, %v14993_v63 }
 0xa0f   :  { %5545 = vmatmul.mubr.f32.gmra.mrb[16].mxu0 %v14596_v26  ;;  %v6322_v26 = vand.u32 4294901760, %v6268_v28  ;;  %11858 = vmatpush1.bf16.msra.mxu1 %v14889_v14  ;;  %v14925_v12 = vsub.f32 %v6269_v59, %v6325_v10  ;;  %v14953_v62 = vpack.c.bf16 %v6328_v23, %v6325_v10  ;;  %v16453_v24 = vand.u32 4294901760, %v14891_v15 }
 0xa10   :  { %10924 = vmatprep.mubr.msk.f32.mxu0 %vm12786_vm9, %v16617_v30  ;;  %11859 = vmatprep.subr.bf16.mxu1 %v16555_v37  ;;  %v14995_v52 = vpack.c.bf16 %v6364_v0, %v6361_v35  ;;  %v15019_v5 = vsub.f32 %v6282_v56, %v6364_v0  ;;  %v15048_v56 = vsub.f32 %v6285_v25, %v6373_v16 }
 0xa11   :  { %v14916_v32 = vsub.f32 %v6268_v28, %v6322_v26  ;;  %v14934_v8 = vpack.c.bf16 %v6322_v26, %v6319_v22  ;;  %16620 = vst [vmem:[#allocation13_spill] sm:$0xff] %v14953_v62  ;;  %v6367_v28 = vand.u32 4294901760, %v6283_v46  ;;  %v16627_v22 = vld [vmem:[#allocation23_spill] sm:$0xff]  ;;  %v15050_v35 = vsub.f32 %v6286_v20, %v6376_v33 }
 0xa12   :  { %16626 = vst [vmem:[#allocation19_spill] sm:$0xff] %v14995_v52  ;;  %v12458_v26 = vadd.f32 %v14993_v63, %v16627_v22  ;;  %v6459_v0 = vsub.f32 %v14891_v15, %v16453_v24  ;;  %v16457_v24 = vand.u32 4294901760, %v14943_v18 }
 0xa13   :  { %16619 = vst [vmem:[#allocation12_spill] sm:$0xff] %v14934_v8  ;;  %11861 = vmatpush1.bf16.msra.mxu1 %v14906_v29  ;;  %v15021_v10 = vpack.c.bf16 %v6370_v41, %v6367_v28  ;;  %v15023_v23 = vsub.f32 %v6283_v46, %v6367_v28  ;;  %v6466_v46 = vsub.f32 %v14893_v31, %v16452_v9 }
 0xa14   :  { %11862 = vmatprep.subr.bf16.mxu1 %v16555_v37  ;;  %v6460_v41 = vand.u32 4294901760, %v6459_v0 }
 0xa15   :  { %16628 = vst [vmem:[#allocation20_spill] sm:$0xff] %v15021_v10  ;;  %v6467_v22 = vand.u32 4294901760, %v6466_v46 }
 0xa17   :  { %11864 = vmatpush1.bf16.msra.mxu1 %v14934_v8  ;;  %v15070_v34 = vpack.c.bf16 %v6467_v22, %v6460_v41  ;;  %v16447_v41 = vand.u32 4294901760, %v14916_v32  ;;  %v16636_v22 = vld [vmem:[#allocation24_spill] sm:$0xff] }
 0xa18   :  { %11865 = vmatprep.subr.bf16.mxu1 %v16555_v37 }
 0xa1b   :  { %11867 = vmatpush1.bf16.msra.mxu1 %v14953_v62 }
 0xa1c   :  { %11868 = vmatprep.subr.bf16.mxu1 %v16555_v37 }
 0xa1f   :  { %11870 = vmatpush1.bf16.msra.mxu1 %v14957_v39 }
 0xa20   :  { %11871 = vmatprep.subr.bf16.mxu1 %v16555_v37 }
 0xa23   :  { %11873 = vmatpush1.bf16.msra.mxu1 %v14961_v55 }
 0xa24   :  { %11874 = vmatprep.subr.bf16.mxu1 %v16555_v37 }
 0xa27   :  { %11876 = vmatpush1.bf16.msra.mxu1 %v14965_v50 }
 0xa28   :  { %11877 = vmatprep.subr.bf16.mxu1 %v16555_v37 }
 0xa2b   :  { %11879 = vmatpush1.bf16.msra.mxu1 %v14969_v17 }
 0xa2c   :  { %11880 = vmatprep.subr.bf16.mxu1 %v16555_v37 }
 0xa2f   :  { %11882 = vmatpush1.bf16.msra.mxu1 %v14980_v19 }
 0xa30   :  { %11883 = vmatprep.subr.bf16.mxu1 %v16555_v37 }
 0xa33   :  { %11885 = vmatpush1.bf16.msra.mxu1 %v14995_v52 }
 0xa34   :  { %11886 = vmatprep.subr.bf16.mxu1 %v16555_v37 }
 0xa37   :  { %11888 = vmatpush1.bf16.msra.mxu1 %v15021_v10  ;;  %v16476_v10 = vand.u32 4294901760, %v15025_v42 }
 0xa38   :  { %11889 = vmatprep.subr.bf16.mxu1 %v16555_v37 }
 0xa3b   :  { %11891 = vmatpush1.bf16.msra.mxu1 %v15046_v60 }
 0xa3c   :  { %11892 = vmatprep.subr.bf16.mxu1 %v16555_v37 }
 0xad6   :  { %v5525_v59 = vpop.f32.mrb[10].mxu0 }
 0xad7   :  { %v12453_v11 = vadd.f32 %v15000_v61, %v5525_v59  ;;  %v5527_v54 = vpop.f32.mrb[11].mxu0  ;;  %v16445_v59 = vand.u32 4294901760, %v14908_v7 }
 0xad9   :  { %v15033_v43 = vadd.f32 %v12458_v26, %v12453_v11  ;;  %v16444_v26 = vand.u32 4294901760, %v14895_v44  ;;  %v16634_v11 = vld [vmem:[#allocation26_spill] sm:$0xff] }
 0xada   :  { %v5532_v45 = vpop.f32.mrb[12].mxu0  ;;  %v12460_v54 = vadd.f32 %v14993_v63, %v16634_v11  ;;  %v12459_v11 = vadd.f32 %v16636_v22, %v14993_v63 }
 0xadb   :  { %16629 = vst [vmem:[#allocation21_spill] sm:$0xff] %v15033_v43  ;;  %v6232_v57 = vmul.f32 %v16631_v51, %v15033_v43  ;;  %v12454_v3 = vadd.f32 %v15000_v61, %v5532_v45  ;;  %v5534_v38 = vpop.f32.mrb[13].mxu0  ;;  %6193 = vrot.lane.b32.xlu0 %v15033_v43, %s12784_s28  ;;  %v6480_v45 = vsub.f32 %v14908_v7, %v16445_v59  ;;  %v16464_v51 = vand.u32 4294901760, %v15015_v13 }
 0xadd   :  { %v15058_v27 = vadd.f32 %v12457_v1, %v12454_v3  ;;  %v6240_v25 = vrot.slane %v6232_v57, 1  ;;  %v6473_v1 = vsub.f32 %v14895_v44, %v16444_v26  ;;  %v6481_v46 = vand.u32 4294901760, %v6480_v45 }
 0xade   :  { %v5539_v28 = vpop.f32.mrb[14].mxu0 }
 0xadf   :  { %16633 = vst [vmem:[#allocation27_spill] sm:$0xff] %v15058_v27  ;;  %v6241_v20 = vrot.slane %v15058_v27, 1  ;;  %v12455_v16 = vadd.f32 %v15000_v61, %v5539_v28  ;;  %v5541_v33 = vpop.f32.mrb[15].mxu0  ;;  %6195 = vrot.lane.b32.xlu1 %v15058_v27, %s12784_s28  ;;  %v6474_v0 = vand.u32 4294901760, %v6473_v1  ;;  %v16451_v28 = vand.u32 4294901760, %v14910_v4 }
 0xae0   :  { %v16637_v33 = vld [vmem:[#allocation9_spill] sm:$0xff]  ;;  %v6494_v1 = vsub.f32 %v14916_v32, %v16447_v41 }
 0xae1   :  { %v6242_v57 = vsel %vm221_vm1, %v6240_v25, %v6241_v20  ;;  %v15079_v3 = vadd.f32 %v12460_v54, %v12455_v16  ;;  %v15091_v54 = vpack.c.bf16 %v6481_v46, %v6474_v0  ;;  %v6487_v16 = vsub.f32 %v14910_v4, %v16451_v28 }
 0xae2   :  { %6251 = vst.msk [vmem:[#allocation2 + $0x8] sm:$0xff] %vm3242_vm10, %v6242_v57  ;;  %v5546_v38 = vpop.f32.mrb[16].mxu0  ;;  %v6495_v22 = vand.u32 4294901760, %v6494_v1 }
 0xae3   :  { %16635 = vst [vmem:[#allocation23_spill] sm:$0xff] %v15079_v3  ;;  %v6234_v26 = vmul.f32 %v16637_v33, %v15079_v3  ;;  %v12456_v59 = vadd.f32 %v15000_v61, %v5546_v38  ;;  %v5548_v25 = vpop.f32.mrb[17].mxu0  ;;  %6197 = vrot.lane.b32.xlu0 %v15079_v3, %s12784_s28  ;;  %v6488_v57 = vand.u32 4294901760, %v6487_v16  ;;  %v16446_v61 = vand.u32 4294901760, %v14925_v12 }
 0xae4   :  { %v16448_v38 = vand.u32 4294901760, %v14927_v47  ;;  %v6220_v17 = vrot.slane %v15079_v3, 7 }
 0xae5   :  { %v6243_v63 = vrot.slane %v6234_v26, 1  ;;  %v15099_v45 = vadd.f32 %v12459_v11, %v12456_v59  ;;  %v15108_v25 = vpack.c.bf16 %v6495_v22, %v6488_v57  ;;  %v6501_v26 = vsub.f32 %v14925_v12, %v16446_v61 }
 0xae6   :  { %v6508_v59 = vsub.f32 %v14927_v47, %v16448_v38  ;;  %v16449_v22 = vand.u32 4294901760, %v14929_v2  ;;  %v16450_v61 = vand.u32 4294901760, %v14936_v6 }
 0xae7   :  { %16638 = vst [vmem:[#allocation22_spill] sm:$0xff] %v15099_v45  ;;  %v6244_v0 = vsel %vm221_vm1, %v6241_v20, %v6243_v63  ;;  %v6245_v46 = vrot.slane %v15099_v45, 1  ;;  %6199 = vrot.lane.b32.xlu1 %v15099_v45, %s12784_s28  ;;  %v6502_v1 = vand.u32 4294901760, %v6501_v26 }
 0xae8   :  { %6252 = vst.msk [vmem:[#allocation2 + $0x18] sm:$0xff] %vm3242_vm10, %v6244_v0  ;;  %v6509_v57 = vand.u32 4294901760, %v6508_v59  ;;  %v6522_v26 = vsub.f32 %v14936_v6, %v16450_v61 }
 0xae9   :  { %v6246_v11 = vsel %vm221_vm1, %v6243_v63, %v6245_v46  ;;  %6254 = vst.msk [vmem:[#allocation2 + $0x38] sm:$0x7f] %vm4571_vm12, %v6245_v46  ;;  %v6256_v20 = vld [vmem:[#allocation2 + $0x8] sm:$0xff]  ;;  %v6515_v63 = vsub.f32 %v14929_v2, %v16449_v22 }
 0xaea   :  { %6253 = vst.msk [vmem:[#allocation2 + $0x28] sm:$0xff] %vm3242_vm10, %v6246_v11  ;;  %v6295_v16 = vsel %vm3242_vm10, %v6256_v20, 0  ;;  %v15124_v41 = vpack.c.bf16 %v6509_v57, %v6502_v1  ;;  %v16454_v11 = vand.u32 4294901760, %v14938_v48  ;;  %v16455_v20 = vand.u32 4294901760, %v14941_v40 }
 0xaeb   :  { %v15121_v0 = vand.u32 4294901760, %v6295_v16  ;;  %v6516_v59 = vand.u32 4294901760, %v6515_v63  ;;  %v6523_v1 = vand.u32 4294901760, %v6522_v26 }
 0xaec   :  { %v6529_v22 = vsub.f32 %v14938_v48, %v16454_v11  ;;  %v16458_v11 = vand.u32 4294901760, %v14946_v53 }
 0xaed   :  { %v15130_v46 = vsub.f32 %v6295_v16, %v15121_v0  ;;  %v6536_v16 = vsub.f32 %v14941_v40, %v16455_v20  ;;  %v15151_v61 = vpack.c.bf16 %v6523_v1, %v6516_v59  ;;  %v6543_v20 = vsub.f32 %v14943_v18, %v16457_v24 }
 0xaee   :  { %v6530_v26 = vand.u32 4294901760, %v6529_v22  ;;  %v16463_v59 = vand.u32 4294901760, %v14948_v58  ;;  %v16461_v22 = vand.u32 4294901760, %v14950_v36 }
 0xaef   :  { %v16456_v38 = vand.u32 4294901760, %v15130_v46  ;;  %v6537_v28 = vand.u32 4294901760, %v6536_v16  ;;  %v6544_v1 = vand.u32 4294901760, %v6543_v20  ;;  %v6578_v20 = vsub.f32 %v15015_v13, %v16464_v51 }
 0xaf0   :  { %v15138_v57 = vld [vmem:[#allocation2 + $0x38] sm:$0xff]  ;;  %v16471_v51 = vand.u32 4294901760, %v15023_v23 }
 0xaf1   :  { %v6397_v63 = vsub.f32 %v15130_v46, %v16456_v38  ;;  %8490 = vst.msk [vmem:[#allocation2 + $0x3f] sm:$0x1] %vm4501_vm8, %v16617_v30  ;;  %v15154_v33 = vpack.c.bf16 %v6537_v28, %v6530_v26  ;;  %v6550_v38 = vsub.f32 %v14946_v53, %v16458_v11  ;;  %v6557_v28 = vsub.f32 %v14948_v58, %v16463_v59 }
 0xaf2   :  { %v16462_v11 = vand.u32 4294901760, %v15013_v21 }
 0xaf3   :  { %v6398_v9 = vand.u32 4294901760, %v6397_v63  ;;  %v6551_v16 = vand.u32 4294901760, %v6550_v38  ;;  %v6558_v26 = vand.u32 4294901760, %v6557_v28  ;;  %v6579_v28 = vand.u32 4294901760, %v6578_v20 }
 0xaf4   :  { %v6571_v38 = vsub.f32 %v15013_v21, %v16462_v11  ;;  %v6606_v20 = vsub.f32 %v15025_v42, %v16476_v10 }
 0xaf5   :  { %6399 = vmatprep.mubr.f32.mxu1 %v6398_v9  ;;  %v6564_v9 = vsub.f32 %v14950_v36, %v16461_v22  ;;  %v15171_v63 = vpack.c.bf16 %v6551_v16, %v6544_v1  ;;  %v16469_v22 = vand.u32 4294901760, %v15017_v49  ;;  %v16470_v1 = vand.u32 4294901760, %v15019_v5 }
 0xaf6   :  { %v6572_v16 = vand.u32 4294901760, %v6571_v38  ;;  %v6599_v38 = vsub.f32 %v15023_v23, %v16471_v51 }
 0xaf7   :  { %v6565_v24 = vand.u32 4294901760, %v6564_v9  ;;  %v6585_v9 = vsub.f32 %v15017_v49, %v16469_v22 }
 0xaf8   :  { %v6600_v22 = vand.u32 4294901760, %v6599_v38 }
 0xaf9   :  { %v15175_v60 = vpack.c.bf16 %v6565_v24, %v6558_v26  ;;  %v6592_v24 = vsub.f32 %v15019_v5, %v16470_v1  ;;  %v15191_v26 = vpack.c.bf16 %v6579_v28, %v6572_v16  ;;  %v6586_v11 = vand.u32 4294901760, %v6585_v9 }
 0xafa   :  { %v6607_v1 = vand.u32 4294901760, %v6606_v20  ;;  %v16474_v16 = vand.u32 4294901760, %v15048_v56  ;;  %v16475_v28 = vand.u32 4294901760, %v15050_v35 }
 0xafb   :  { %v6593_v59 = vand.u32 4294901760, %v6592_v24 }
 0xafc   :  { %v15205_v9 = vpack.c.bf16 %v6607_v1, %v6600_v22  ;;  %v6258_v22 = vld [vmem:[#allocation2 + $0x18] sm:$0xff] }
 0xafd   :  { %v15195_v52 = vpack.c.bf16 %v6593_v59, %v6586_v11  ;;  %v6613_v11 = vsub.f32 %v15048_v56, %v16474_v16  ;;  %v6620_v59 = vsub.f32 %v15050_v35, %v16475_v28 }
 0xaff   :  { %v6614_v24 = vand.u32 4294901760, %v6613_v11  ;;  %v6621_v51 = vand.u32 4294901760, %v6620_v59  ;;  %v16639_v11 = vld [vmem:[#allocation7_spill] sm:$0xff]  ;;  %v6298_v59 = vsel %vm3242_vm10, %v6258_v22, 0 }
 0xb00   :  { %v6210_v1 = vmul.f32 %v16639_v11, %v15058_v27  ;;  %v15245_v28 = vand.u32 4294901760, %v6298_v59  ;;  %v16640_v27 = vld [vmem:[#allocation8_spill] sm:$0xff] }
 0xb01   :  { %v15213_v19 = vpack.c.bf16 %v6621_v51, %v6614_v24  ;;  %v6217_v51 = vrot.slane %v15033_v43, 7  ;;  %v6260_v24 = vld [vmem:[#allocation2 + $0x28] sm:$0xff]  ;;  %v6212_v11 = vmul.f32 %v16640_v27, %v15099_v45 }
 0xb02   :  { %v6218_v38 = vrot.slane %v6210_v1, 7  ;;  %v6301_v16 = vsel %vm3242_vm10, %v6260_v24, 0  ;;  %v6304_v24 = vsel %vm3242_vm10, %v15138_v57, 0 }
 0xb03   :  { %v15257_v1 = vand.u32 4294901760, %v6301_v16  ;;  %v6222_v50 = vrot.slane %v6212_v11, 7 }
 0xb04   :  { %v6219_v22 = vsel %vm195_vm5, %v6217_v51, %v6218_v38  ;;  %v6221_v55 = vsel %vm195_vm5, %v6218_v38, %v6220_v17 }
 0xb4d   :  { %v6194_v20 = vpop.permute.xlu0 %6193 }
 0xb4e   :  { %6205 = vst.msk [vmem:[#allocation2] sm:$0xff] %vm4520_vm13, %v6194_v20  ;;  %v15255_v20 = vsub.f32 %v6298_v59, %v15245_v28  ;;  %v15270_v59 = vsub.f32 %v6301_v16, %v15257_v1 }
 0xb4f   :  { %6228 = vst.msk [vmem:[#allocation2] sm:$0xfe] %vm4544_vm14, %v6217_v51 }
 0xb50   :  { %v16492_v51 = vand.u32 4294901760, %v15255_v20  ;;  %v16496_v27 = vand.u32 4294901760, %v15270_v59 }
 0xb51   :  { %v6196_v10 = vpop.permute.xlu1 %6195 }
 0xb52   :  { %6206 = vst.msk [vmem:[#allocation2 + $0x10] sm:$0xff] %vm4520_vm13, %v6196_v10  ;;  %v6412_v16 = vsub.f32 %v15255_v20, %v16492_v51  ;;  %v6427_v51 = vsub.f32 %v15270_v59, %v16496_v27 }
 0xb53   :  { %6229 = vst.msk [vmem:[#allocation2 + $0x10] sm:$0xff] %vm3242_vm10, %v6219_v22  ;;  %v15272_v22 = vand.u32 4294901760, %v6304_v24 }
 0xb54   :  { %v6413_v62 = vand.u32 4294901760, %v6412_v16 }
 0xb55   :  { %v6198_v43 = vpop.permute.xlu0 %6197 }
 0xb56   :  { %v6255_v3 = vld [vmem:[#allocation2] sm:$0xff]  ;;  %6207 = vst.msk [vmem:[#allocation2 + $0x20] sm:$0xff] %vm4520_vm13, %v6198_v43  ;;  %v6223_v43 = vsel %vm195_vm5, %v6220_v17, %v6222_v50 }
 0xb57   :  { %v15263_v10 = vand.u32 4294901760, %v6255_v3  ;;  %8489 = vst.msk [vmem:[#allocation2] sm:$0x1] %vm4501_vm8, %v16617_v30 }
 0xb58   :  { %6230 = vst.msk [vmem:[#allocation2 + $0x20] sm:$0xff] %vm3242_vm10, %v6221_v55 }
 0xb59   :  { %v6200_v57 = vpop.permute.xlu1 %6199  ;;  %v15275_v11 = vsub.f32 %v6255_v3, %v15263_v10  ;;  %v15288_v3 = vsub.f32 %v6304_v24, %v15272_v22  ;;  %v6428_v24 = vand.u32 4294901760, %v6427_v51 }
 0xb5a   :  { %6208 = vst.msk [vmem:[#allocation2 + $0x30] sm:$0xff] %vm4520_vm13, %v6200_v57  ;;  %v6257_v38 = vld [vmem:[#allocation2 + $0x10] sm:$0xff] }
 0xb5b   :  { %6231 = vst.msk [vmem:[#allocation2 + $0x30] sm:$0xff] %vm3242_vm10, %v6223_v43  ;;  %v16493_v55 = vand.u32 4294901760, %v15275_v11  ;;  %v15281_v45 = vand.u32 4294901760, %v6257_v38 }
 0xb5d   :  { %v6403_v50 = vsub.f32 %v15275_v11, %v16493_v55  ;;  %v15294_v17 = vsub.f32 %v6257_v38, %v15281_v45 }
 0xb5f   :  { %v6259_v57 = vld [vmem:[#allocation2 + $0x20] sm:$0xff]  ;;  %v6404_v43 = vand.u32 4294901760, %v6403_v50  ;;  %v6417_v30 = vand.u32 4294901760, %v15294_v17 }
 0xb60   :  { %v15297_v39 = vand.u32 4294901760, %v6259_v57 }
 0xb61   :  { %6405 = vmatmul.mubr.f32.vlgmr.msra.gmra.mrb[14].mxu1 %v6404_v43  ;;  %v6418_v55 = vsub.f32 %v15294_v17, %v6417_v30  ;;  %v16641_v43 = vand.u32 4294901760, %v15288_v3 }
 0xb62   :  { %v15307_v38 = vsub.f32 %v6259_v57, %v15297_v39  ;;  %11894 = vmatpush1.bf16.msra.mxu1 %v15070_v34  ;;  %6414 = vmatprep.mubr.f32.mxu1 %v6413_v62  ;;  %v6261_v50 = vld [vmem:[#allocation2 + $0x30] sm:$0xff] }
 0xb63   :  { %11895 = vmatprep.subr.bf16.mxu1 %v16555_v37  ;;  %v6419_v16 = vand.u32 4294901760, %v6418_v55  ;;  %v15312_v27 = vand.u32 4294901760, %v6261_v50  ;;  %v6442_v29 = vsub.f32 %v15288_v3, %v16641_v43  ;;  %v16655_v43 = vld [vmem:[#allocation12_spill] sm:$0xff] }
 0xb64   :  { %v6432_v8 = vand.u32 4294901760, %v15307_v38 }
 0xb65   :  { %6420 = vmatmul.mubr.f32.gmra.mrb[16].mxu1 %v6419_v16  ;;  %v15321_v62 = vsub.f32 %v6261_v50, %v15312_v27  ;;  %v6443_v55 = vand.u32 4294901760, %v6442_v29  ;;  %v16642_v29 = vpack.c.bf16 %v14893_v31, %v14891_v15 }
 0xb66   :  { %v6433_v57 = vsub.f32 %v15307_v38, %v6432_v8  ;;  %11897 = vmatpush1.bf16.msra.mxu1 %v15091_v54  ;;  %6429 = vmatprep.mubr.f32.mxu1 %v6428_v24  ;;  %v16648_v54 = vpack.c.bf16 %v14946_v53, %v14943_v18  ;;  %v16654_v24 = vld [vmem:[#allocation28_spill] sm:$0xff] }
 0xb67   :  { %11898 = vmatprep.subr.bf16.mxu1 %v16555_v37  ;;  %v6447_v51 = vand.u32 4294901760, %v15321_v62 }
 0xb68   :  { %v6434_v34 = vand.u32 4294901760, %v6433_v57  ;;  %v16656_v57 = vld [vmem:[#allocation13_spill] sm:$0xff] }
 0xb69   :  { %v6448_v16 = vsub.f32 %v15321_v62, %v6447_v51 }
 0xb6a   :  { %6435 = vmatmul.mubr.f32.gmra.mrb[18].mxu1 %v6434_v34  ;;  %v16657_v34 = vand.u32 4294901760, %v15130_v46 }
 0xb6b   :  { %11900 = vmatpush1.bf16.msra.mxu1 %v15108_v25  ;;  %6444 = vmatprep.mubr.f32.mxu1 %v6443_v55  ;;  %v6449_v50 = vand.u32 4294901760, %v6448_v16  ;;  %v16650_v25 = vpack.c.bf16 %v15015_v13, %v15013_v21  ;;  %v16658_v55 = vld [vmem:[#allocation14_spill] sm:$0xff]  ;;  %v16659_v16 = vld [vmem:[#allocation15_spill] sm:$0xff] }
 0xb6c   :  { %11901 = vmatprep.subr.bf16.mxu1 %v16555_v37 }
 0xb6e   :  { %6450 = vmatmul.mubr.f32.gmra.mrb[20].mxu1 %v6449_v50  ;;  %v16660_v50 = vld [vmem:[#allocation16_spill] sm:$0xff] }
 0xb6f   :  { %11903 = vmatpush1.bf16.msra.mxu1 %v15124_v41  ;;  %6640 = vmatprep.mubr.f32.mxu1 %v15121_v0  ;;  %v16646_v41 = vpack.c.bf16 %v14936_v6, %v14929_v2 }
 0xb70   :  { %11904 = vmatprep.subr.bf16.mxu1 %v16555_v37 }
 0xb73   :  { %11906 = vmatpush1.bf16.msra.mxu1 %v15151_v61  ;;  %v16649_v61 = vpack.c.bf16 %v14950_v36, %v14948_v58 }
 0xb74   :  { %11907 = vmatprep.subr.bf16.mxu1 %v16555_v37 }
 0xb77   :  { %11909 = vmatpush1.bf16.msra.mxu1 %v15154_v33  ;;  %v16647_v33 = vpack.c.bf16 %v14941_v40, %v14938_v48 }
 0xb78   :  { %11910 = vmatprep.subr.bf16.mxu1 %v16555_v37 }
 0xb7b   :  { %11912 = vmatpush1.bf16.msra.mxu1 %v15171_v63  ;;  %v16651_v63 = vpack.c.bf16 %v15019_v5, %v15017_v49 }
 0xb7c   :  { %11913 = vmatprep.subr.bf16.mxu1 %v16555_v37 }
 0xb7f   :  { %11915 = vmatpush1.bf16.msra.mxu1 %v15175_v60  ;;  %v16645_v60 = vpack.c.bf16 %v14927_v47, %v14925_v12 }
 0xb80   :  { %11916 = vmatprep.subr.bf16.mxu1 %v16555_v37 }
 0xb83   :  { %11918 = vmatpush1.bf16.msra.mxu1 %v15191_v26  ;;  %v16652_v26 = vpack.c.bf16 %v15025_v42, %v15023_v23 }
 0xb84   :  { %11919 = vmatprep.subr.bf16.mxu1 %v16555_v37 }
 0xb87   :  { %11921 = vmatpush1.bf16.msra.mxu1 %v15195_v52  ;;  %v16643_v52 = vpack.c.bf16 %v14908_v7, %v14895_v44 }
 0xb88   :  { %11922 = vmatprep.subr.bf16.mxu1 %v16555_v37 }
 0xb8b   :  { %11924 = vmatpush1.bf16.msra.mxu1 %v15205_v9  ;;  %v16653_v9 = vpack.c.bf16 %v15050_v35, %v15048_v56 }
 0xb8c   :  { %11925 = vmatprep.subr.bf16.mxu1 %v16555_v37 }
 0xb8f   :  { %11927 = vmatpush1.bf16.msra.mxu1 %v15213_v19  ;;  %v16644_v19 = vpack.c.bf16 %v14916_v32, %v14910_v4 }
 0xb90   :  { %11928 = vmatprep.subr.bf16.mxu1 %v16555_v37 }
 0xb92   :  { %6642 = vmatmul.mubr.f32.vlgmr.msra.gmra.mrb[14].mxu1 %v15263_v10 }
 0xb93   :  { %6647 = vmatprep.mubr.f32.mxu1 %v15245_v28  ;;  %11930 = vmatpush1.bf16.msra.mxu1 %v16642_v29  ;;  %v16661_v29 = vld [vmem:[#allocation17_spill] sm:$0xff] }
 0xb94   :  { %11931 = vmatprep.subr.bf16.mxu1 %v16555_v37 }
 0xb96   :  { %6649 = vmatmul.mubr.f32.gmra.mrb[16].mxu1 %v15281_v45 }
 0xb97   :  { %6654 = vmatprep.mubr.f32.mxu1 %v15257_v1  ;;  %11933 = vmatpush1.bf16.msra.mxu1 %v16643_v52  ;;  %v16663_v52 = vld [vmem:[#allocation19_spill] sm:$0xff] }
 0xb98   :  { %11934 = vmatprep.subr.bf16.mxu1 %v16555_v37 }
 0xb9a   :  { %6656 = vmatmul.mubr.f32.gmra.mrb[18].mxu1 %v15297_v39 }
 0xb9b   :  { %6661 = vmatprep.mubr.f32.mxu1 %v15272_v22  ;;  %11936 = vmatpush1.bf16.msra.mxu1 %v16644_v19  ;;  %v16664_v19 = vld [vmem:[#allocation20_spill] sm:$0xff] }
 0xb9c   :  { %11937 = vmatprep.subr.bf16.mxu1 %v16555_v37 }
 0xb9e   :  { %6663 = vmatmul.mubr.f32.gmra.mrb[20].mxu1 %v15312_v27 }
 0xb9f   :  { %11939 = vmatpush1.bf16.msra.mxu1 %v16645_v60  ;;  %6782 = vmatprep.mubr.f32.mxu1 %v15130_v46  ;;  %v16662_v46 = vld [vmem:[#allocation18_spill] sm:$0xff]  ;;  %v16665_v60 = vld [vmem:[#allocation25_spill] sm:$0xff] }
 0xba0   :  { %11940 = vmatprep.subr.bf16.mxu1 %v16555_v37 }
 0xba3   :  { %11942 = vmatpush1.bf16.msra.mxu1 %v16646_v41  ;;  %v16666_v41 = vand.u32 4294901760, %v14891_v15  ;;  %v16672_v15 = vand.u32 4294901760, %v15270_v59 }
 0xba4   :  { %11943 = vmatprep.subr.bf16.mxu1 %v16555_v37 }
 0xba7   :  { %11945 = vmatpush1.bf16.msra.mxu1 %v16647_v33  ;;  %v16667_v33 = vand.u32 4294901760, %v14893_v31  ;;  %v16673_v31 = vand.u32 4294901760, %v14910_v4  ;;  %v16678_v4 = vand.u32 4294901760, %v14929_v2  ;;  %v16684_v2 = vand.u32 4294901760, %v14948_v58 }
 0xba8   :  { %11946 = vmatprep.subr.bf16.mxu1 %v16555_v37  ;;  %v16690_v58 = vand.u32 4294901760, %v15023_v23 }
 0xbab   :  { %11948 = vmatpush1.bf16.msra.mxu1 %v16648_v54  ;;  %v12001_v54 = vpack.c.bf16 %v16667_v33, %v16666_v41 }
 0xbac   :  { %11949 = vmatprep.subr.bf16.mxu1 %v16555_v37 }
 0xbaf   :  { %11951 = vmatpush1.bf16.msra.mxu1 %v16649_v61  ;;  %v16668_v61 = vand.u32 4294901760, %v15275_v11 }
 0xbb0   :  { %11952 = vmatprep.subr.bf16.mxu1 %v16555_v37 }
 0xbb3   :  { %11954 = vmatpush1.bf16.msra.mxu1 %v16650_v25  ;;  %v16669_v25 = vand.u32 4294901760, %v15255_v20 }
 0xbb4   :  { %11955 = vmatprep.subr.bf16.mxu1 %v16555_v37 }
 0xbb7   :  { %11957 = vmatpush1.bf16.msra.mxu1 %v16651_v63  ;;  %v16670_v63 = vand.u32 4294901760, %v14895_v44  ;;  %v16675_v44 = vand.u32 4294901760, %v15288_v3 }
 0xbb8   :  { %11958 = vmatprep.subr.bf16.mxu1 %v16555_v37 }
 0xbbb   :  { %11960 = vmatpush1.bf16.msra.mxu1 %v16652_v26  ;;  %v16671_v26 = vand.u32 4294901760, %v14908_v7  ;;  %v16677_v7 = vand.u32 4294901760, %v14927_v47  ;;  %v16681_v47 = vand.u32 4294901760, %v14941_v40  ;;  %v16687_v40 = vand.u32 4294901760, %v15015_v13 }
 0xbbc   :  { %11961 = vmatprep.subr.bf16.mxu1 %v16555_v37  ;;  %v16693_v13 = vand.u32 4294901760, %v15050_v35  ;;  %v7253_v35 = vld [vmem:[%s16363_s22 + $0x18] sm:$0xff] }
 0xbbf   :  { %11963 = vmatpush1.bf16.msra.mxu1 %v16653_v9  ;;  %v12004_v9 = vpack.c.bf16 %v16671_v26, %v16670_v63 }
 0xbc0   :  { %11964 = vmatprep.subr.bf16.mxu1 %v16555_v37 }
 0xbc2   :  { %6785 = vmatmul.mubr.f32.vlgmr.msra.gmra.mrb[14].mxu1 %v15275_v11 }
 0xbc3   :  { %6791 = vmatprep.mubr.f32.mxu1 %v15255_v20  ;;  %11966 = vmatpush1.bf16.msra.mxu1 %v14889_v14  ;;  %v16674_v20 = vand.u32 4294901760, %v14916_v32  ;;  %v16679_v32 = vand.u32 4294901760, %v14936_v6  ;;  %v16685_v6 = vand.u32 4294901760, %v14950_v36  ;;  %v16691_v36 = vand.u32 4294901760, %v15025_v42 }
 0xbc4   :  { %11967 = vmatprep.subr.bf16.mxu1 %v16555_v37 }
 0xbc5   :  { %v12007_v11 = vpack.c.bf16 %v16674_v20, %v16673_v31  ;;  %v12031_v33 = vpack.c.bf16 %v16691_v36, %v16690_v58 }
 0xbc6   :  { %6794 = vmatmul.mubr.f32.gmra.mrb[16].mxu1 %v15294_v17  ;;  %v16682_v17 = vand.u32 4294901760, %v14943_v18  ;;  %v16688_v18 = vand.u32 4294901760, %v15017_v49  ;;  %v7250_v49 = vld [vmem:[%s16363_s22] sm:$0xff] }
 0xbc7   :  { %6800 = vmatprep.mubr.f32.mxu1 %v15270_v59  ;;  %11969 = vmatpush1.bf16.msra.mxu1 %v16654_v24  ;;  %v7264_v23 = vand.u32 4294901760, %v7250_v49 }
 0xbc8   :  { %11970 = vmatprep.subr.bf16.mxu1 %v16555_v37 }
 0xbca   :  { %6803 = vmatmul.mubr.f32.gmra.mrb[18].mxu1 %v15307_v38  ;;  %v16683_v38 = vand.u32 4294901760, %v14946_v53  ;;  %v16689_v53 = vand.u32 4294901760, %v15019_v5  ;;  %v7251_v5 = vld [vmem:[%s16363_s22 + $0x8] sm:$0xff] }
 0xbcb   :  { %6809 = vmatprep.mubr.f32.mxu1 %v15288_v3  ;;  %11972 = vmatpush1.bf16.msra.mxu1 %v16655_v43  ;;  %v7267_v42 = vand.u32 4294901760, %v7251_v5 }
 0xbcc   :  { %11973 = vmatprep.subr.bf16.mxu1 %v16555_v37  ;;  %v12028_v41 = vpack.c.bf16 %v16689_v53, %v16688_v18 }
 0xbce   :  { %6812 = vmatmul.mubr.f32.gmra.mrb[20].mxu1 %v15321_v62  ;;  %v12019_v62 = vpack.c.bf16 %v16683_v38, %v16682_v17 }
 0xbcf   :  { %11975 = vmatpush1.bf16.msra.mxu1 %v16656_v57  ;;  %6908 = vmatprep.mubr.f32.mxu1 %v16657_v34 }
 0xbd0   :  { %11976 = vmatprep.subr.bf16.mxu1 %v16555_v37 }
 0xbd3   :  { %11978 = vmatpush1.bf16.msra.mxu1 %v16658_v55 }
 0xbd4   :  { %11979 = vmatprep.subr.bf16.mxu1 %v16555_v37 }
 0xbd7   :  { %11981 = vmatpush1.bf16.msra.mxu1 %v16659_v16 }
 0xbd8   :  { %11982 = vmatprep.subr.bf16.mxu1 %v16555_v37 }
 0xbdb   :  { %11984 = vmatpush1.bf16.msra.mxu1 %v16660_v50 }
 0xbdc   :  { %11985 = vmatprep.subr.bf16.mxu1 %v16555_v37 }
 0xbdf   :  { %11987 = vmatpush1.bf16.msra.mxu1 %v16661_v29 }
 0xbe0   :  { %11988 = vmatprep.subr.bf16.mxu1 %v16555_v37 }
 0xbe3   :  { %11990 = vmatpush1.bf16.msra.mxu1 %v16662_v46 }
 0xbe4   :  { %11991 = vmatprep.subr.bf16.mxu1 %v16555_v37 }
 0xbe7   :  { %11993 = vmatpush1.bf16.msra.mxu1 %v16663_v52 }
 0xbe8   :  { %11994 = vmatprep.subr.bf16.mxu1 %v16555_v37 }
 0xbeb   :  { %11996 = vmatpush1.bf16.msra.mxu1 %v16664_v19 }
 0xbec   :  { %11997 = vmatprep.subr.bf16.mxu1 %v16555_v37 }
 0xbef   :  { %11999 = vmatpush1.bf16.msra.mxu1 %v16665_v60 }
 0xbf0   :  { %12000 = vmatprep.subr.bf16.mxu1 %v16555_v37 }
 0xbf2   :  { %6912 = vmatmul.mubr.f32.vlgmr.msra.gmra.mrb[14].mxu1 %v16668_v61 }
 0xbf3   :  { %6919 = vmatprep.mubr.f32.mxu1 %v16669_v25  ;;  %12002 = vmatpush1.bf16.msra.mxu1 %v12001_v54 }
 0xbf4   :  { %12003 = vmatprep.subr.bf16.mxu1 %v16555_v37 }
 0xbf6   :  { %6923 = vmatmul.mubr.f32.gmra.mrb[16].mxu1 %v6417_v30  ;;  %v16676_v30 = vand.u32 4294901760, %v14925_v12  ;;  %v16680_v12 = vand.u32 4294901760, %v14938_v48  ;;  %v16686_v48 = vand.u32 4294901760, %v15013_v21  ;;  %v16692_v21 = vand.u32 4294901760, %v15048_v56 }
 0xbf7   :  { %6930 = vmatprep.mubr.f32.mxu1 %v16672_v15  ;;  %12005 = vmatpush1.bf16.msra.mxu1 %v12004_v9  ;;  %v15561_v56 = vpack.c.bf16 %v7267_v42, %v7264_v23 }
 0xbf8   :  { %12006 = vmatprep.subr.bf16.mxu1 %v16555_v37  ;;  %v12010_v59 = vpack.c.bf16 %v16677_v7, %v16676_v30  ;;  %v12016_v3 = vpack.c.bf16 %v16681_v47, %v16680_v12  ;;  %v12025_v34 = vpack.c.bf16 %v16687_v40, %v16686_v48  ;;  %v12034_v54 = vpack.c.bf16 %v16693_v13, %v16692_v21 }
 0xbf9   :  { %12074 = vmatpush3.bf16.msra.mxu0 %v15561_v56 }
 0xbfa   :  { %6934 = vmatmul.mubr.f32.gmra.mrb[18].mxu1 %v6432_v8  ;;  %v12013_v8 = vpack.c.bf16 %v16679_v32, %v16678_v4  ;;  %12075 = vmatprep.subr.bf16.mxu0 %v16555_v37 }
 0xbfb   :  { %6941 = vmatprep.mubr.f32.mxu1 %v16675_v44  ;;  %12008 = vmatpush1.bf16.msra.mxu1 %v12007_v11 }
 0xbfc   :  { %12009 = vmatprep.subr.bf16.mxu1 %v16555_v37 }
 0xbfe   :  { %6945 = vmatmul.mubr.f32.gmra.mrb[20].mxu1 %v6447_v51  ;;  %v12022_v51 = vpack.c.bf16 %v16685_v6, %v16684_v2 }
 0xbff   :  { %12011 = vmatpush1.bf16.msra.mxu1 %v12010_v59  ;;  %7087 = vmatprep.mubr.f32.mxu1 %v15121_v0 }
 0xc00   :  { %12012 = vmatprep.subr.bf16.mxu1 %v16555_v37 }
 0xc03   :  { %12014 = vmatpush1.bf16.msra.mxu1 %v12013_v8 }
 0xc04   :  { %12015 = vmatprep.subr.bf16.mxu1 %v16555_v37 }
 0xc07   :  { %12017 = vmatpush1.bf16.msra.mxu1 %v12016_v3 }
 0xc08   :  { %12018 = vmatprep.subr.bf16.mxu1 %v16555_v37 }
 0xc0b   :  { %12020 = vmatpush1.bf16.msra.mxu1 %v12019_v62 }
 0xc0c   :  { %12021 = vmatprep.subr.bf16.mxu1 %v16555_v37 }
 0xc0f   :  { %12023 = vmatpush1.bf16.msra.mxu1 %v12022_v51 }
 0xc10   :  { %12024 = vmatprep.subr.bf16.mxu1 %v16555_v37 }
 0xc13   :  { %12026 = vmatpush1.bf16.msra.mxu1 %v12025_v34 }
 0xc14   :  { %12027 = vmatprep.subr.bf16.mxu1 %v16555_v37 }
 0xc17   :  { %12029 = vmatpush1.bf16.msra.mxu1 %v12028_v41 }
 0xc18   :  { %12030 = vmatprep.subr.bf16.mxu1 %v16555_v37 }
 0xc1b   :  { %12032 = vmatpush1.bf16.msra.mxu1 %v12031_v33 }
 0xc1c   :  { %12033 = vmatprep.subr.bf16.mxu1 %v16555_v37 }
 0xc1f   :  { %12035 = vmatpush1.bf16.msra.mxu1 %v12034_v54 }
 0xc20   :  { %12036 = vmatprep.subr.bf16.mxu1 %v16555_v37 }
 0xc22   :  { %7089 = vmatmul.mubr.f32.vlgmr.msra.gmra.mrb[14].mxu1 %v15263_v10 }
 0xc23   :  { %7094 = vmatprep.mubr.f32.mxu1 %v15245_v28  ;;  %12038 = vmatpush1.bf16.msra.mxu1 %v14889_v14  ;;  %v16694_v14 = vmov 0.0  }
 0xc24   :  { %12039 = vmatprep.subr.bf16.mxu1 %v16555_v37 }
 0xc26   :  { %7096 = vmatmul.mubr.f32.gmra.mrb[16].mxu1 %v15281_v45 }
 0xc27   :  { %7101 = vmatprep.mubr.f32.mxu1 %v15257_v1  ;;  %12041 = vmatpush1.bf16.msra.mxu1 %v16654_v24 }
 0xc28   :  { %12042 = vmatprep.subr.bf16.mxu1 %v16555_v37 }
 0xc2a   :  { %7103 = vmatmul.mubr.f32.gmra.mrb[18].mxu1 %v15297_v39 }
 0xc2b   :  { %7108 = vmatprep.mubr.f32.mxu1 %v15272_v22  ;;  %12044 = vmatpush1.bf16.msra.mxu1 %v16655_v43  ;;  %v7348_v43 = vsub.f32 %v7250_v49, %v7264_v23  ;;  %v9580_v23 = vld [vmem:[%s16360_s19] ss:$0 sm:$0xff] }
 0xc2c   :  { %12045 = vmatprep.subr.bf16.mxu1 %v16555_v37 }
 0xc2e   :  { %7110 = vmatmul.mubr.f32.gmra.mrb[20].mxu1 %v15312_v27 }
 0xc2f   :  { %12047 = vmatpush1.bf16.msra.mxu1 %v16656_v57  ;;  %7204 = vmatprep.mubr.f32.mxu1 %v15121_v0  ;;  %v7355_v57 = vsub.f32 %v7251_v5, %v7267_v42 }
 0xc30   :  { %12048 = vmatprep.subr.bf16.mxu1 %v16555_v37 }
 0xc31   :  { %v15611_v58 = vpack.c.bf16 %v7355_v57, %v7348_v43 }
 0xc33   :  { %12050 = vmatpush1.bf16.msra.mxu1 %v16658_v55  ;;  %v7256_v55 = vld [vmem:[%s16363_s22 + $0x30] sm:$0xff] }
 0xc34   :  { %12051 = vmatprep.subr.bf16.mxu1 %v16555_v37 }
 0xc37   :  { %12053 = vmatpush1.bf16.msra.mxu1 %v16659_v16  ;;  %v7257_v16 = vld [vmem:[%s16363_s22 + $0x38] sm:$0xff] }
 0xc38   :  { %12054 = vmatprep.subr.bf16.mxu1 %v16555_v37 }
 0xc3b   :  { %12056 = vmatpush1.bf16.msra.mxu1 %v16660_v50  ;;  %v7282_v50 = vand.u32 4294901760, %v7256_v55 }
 0xc3c   :  { %12057 = vmatprep.subr.bf16.mxu1 %v16555_v37 }
 0xc3d   :  { %v7390_v17 = vsub.f32 %v7256_v55, %v7282_v50 }
 0xc3f   :  { %12059 = vmatpush1.bf16.msra.mxu1 %v16661_v29  ;;  %v7285_v29 = vand.u32 4294901760, %v7257_v16  ;;  %v7391_v6 = vand.u32 4294901760, %v7390_v17 }
 0xc40   :  { %12060 = vmatprep.subr.bf16.mxu1 %v16555_v37 }
 0xc41   :  { %v7397_v38 = vsub.f32 %v7257_v16, %v7285_v29  ;;  %v7392_v40 = vsub.f32 %v7390_v17, %v7391_v6 }
 0xc43   :  { %12062 = vmatpush1.bf16.msra.mxu1 %v16662_v46  ;;  %v7349_v46 = vand.u32 4294901760, %v7348_v43  ;;  %v7398_v51 = vand.u32 4294901760, %v7397_v38  ;;  %v7393_v18 = vand.u32 4294901760, %v7392_v40  ;;  %v15617_v21 = vpack.c.bf16 %v7397_v38, %v7390_v17 }
 0xc44   :  { %12063 = vmatprep.subr.bf16.mxu1 %v16555_v37 }
 0xc45   :  { %v7399_v34 = vsub.f32 %v7397_v38, %v7398_v51  ;;  %v15625_v5 = vpack.c.bf16 %v7398_v51, %v7391_v6 }
 0xc47   :  { %12065 = vmatpush1.bf16.msra.mxu1 %v16663_v52  ;;  %v7356_v52 = vand.u32 4294901760, %v7355_v57  ;;  %v7400_v53 = vand.u32 4294901760, %v7399_v34 }
 0xc48   :  { %12066 = vmatprep.subr.bf16.mxu1 %v16555_v37 }
 0xc49   :  { %v7357_v61 = vsub.f32 %v7355_v57, %v7356_v52  ;;  %v15609_v41 = vpack.c.bf16 %v7400_v53, %v7393_v18  ;;  %v15619_v13 = vpack.c.bf16 %v7356_v52, %v7349_v46  ;;  %v16696_v53 = vld [vmem:[#allocation11_spill] sm:$0xff] }
 0xc4b   :  { %12068 = vmatpush1.bf16.msra.mxu1 %v16664_v19  ;;  %v15597_v19 = vpack.c.bf16 %v7285_v29, %v7282_v50  ;;  %v7358_v9 = vand.u32 4294901760, %v7357_v61 }
 0xc4c   :  { %12069 = vmatprep.subr.bf16.mxu1 %v16555_v37 }
 0xc4f   :  { %12071 = vmatpush1.bf16.msra.mxu1 %v16665_v60  ;;  %v7350_v60 = vsub.f32 %v7348_v43, %v7349_v46 }
 0xc50   :  { %12144 = vmatprep.subr.bf16.mxu1 %v16555_v37 }
 0xc51   :  { %v7351_v26 = vand.u32 4294901760, %v7350_v60 }
 0xc52   :  { %7206 = vmatmul.mubr.f32.vlgmr.msra.gmra.mrb[14].mxu1 %v15263_v10 }
 0xc53   :  { %7211 = vmatprep.mubr.f32.mxu1 %v15245_v28  ;;  %12146 = vmatpush3.bf16.msra.mxu1 %v15561_v56  ;;  %v7254_v28 = vld [vmem:[%s16363_s22 + $0x20] sm:$0xff]  ;;  %v15603_v20 = vpack.c.bf16 %v7358_v9, %v7351_v26 }
 0xc54   :  { %12147 = vmatprep.subr.bf16.mxu1 %v16555_v37  ;;  %v7276_v10 = vand.u32 4294901760, %v7254_v28 }
 0xc56   :  { %7213 = vmatmul.mubr.f32.gmra.mrb[16].mxu1 %v15281_v45  ;;  %v7273_v45 = vand.u32 4294901760, %v7253_v35  ;;  %v7376_v30 = vsub.f32 %v7254_v28, %v7276_v10 }
 0xc57   :  { %7218 = vmatprep.mubr.f32.mxu1 %v15257_v1  ;;  %v7255_v1 = vld [vmem:[%s16363_s22 + $0x28] sm:$0xff] }
 0xc58   :  { %v7369_v63 = vsub.f32 %v7253_v35, %v7273_v45  ;;  %v7377_v32 = vand.u32 4294901760, %v7376_v30 }
 0xc5a   :  { %7220 = vmatmul.mubr.f32.gmra.mrb[18].mxu1 %v15297_v39  ;;  %v7252_v39 = vld [vmem:[%s16363_s22 + $0x10] sm:$0xff]  ;;  %v7370_v31 = vand.u32 4294901760, %v7369_v63  ;;  %v7378_v47 = vsub.f32 %v7376_v30, %v7377_v32 }
 0xc5b   :  { %7225 = vmatprep.mubr.f32.mxu1 %v15272_v22  ;;  %v7279_v22 = vand.u32 4294901760, %v7255_v1 }
 0xc5c   :  { %v7371_v44 = vsub.f32 %v7369_v63, %v7370_v31  ;;  %v7379_v62 = vand.u32 4294901760, %v7378_v47 }
 0xc5d   :  { %v15585_v24 = vpack.c.bf16 %v7279_v22, %v7276_v10  ;;  %v7383_v7 = vsub.f32 %v7255_v1, %v7279_v22 }
 0xc5e   :  { %7227 = vmatmul.mubr.f32.gmra.mrb[20].mxu1 %v15312_v27  ;;  %v7270_v27 = vand.u32 4294901760, %v7252_v39  ;;  %v7372_v4 = vand.u32 4294901760, %v7371_v44 }
 0xc5f   :  { %11038 = vmatprep.mubr.msk.f32.mxu1 %vm12786_vm9, %v16694_v14  ;;  %v7384_v8 = vand.u32 4294901760, %v7383_v7  ;;  %v15615_v33 = vpack.c.bf16 %v7383_v7, %v7376_v30 }
 0xc60   :  { %v15573_v0 = vpack.c.bf16 %v7273_v45, %v7270_v27  ;;  %v7362_v25 = vsub.f32 %v7252_v39, %v7270_v27 }
 0xc61   :  { %v7385_v3 = vsub.f32 %v7383_v7, %v7384_v8  ;;  %v15623_v49 = vpack.c.bf16 %v7384_v8, %v7377_v32 }
 0xc62   :  { %12077 = vmatpush3.bf16.msra.mxu0 %v15573_v0  ;;  %12149 = vmatpush3.bf16.msra.mxu1 %v15573_v0  ;;  %v7363_v15 = vand.u32 4294901760, %v7362_v25  ;;  %v15613_v36 = vpack.c.bf16 %v7369_v63, %v7362_v25 }
 0xc63   :  { %12078 = vmatprep.subr.bf16.mxu0 %v16555_v37  ;;  %12150 = vmatprep.subr.bf16.mxu1 %v16555_v37  ;;  %v7386_v2 = vand.u32 4294901760, %v7385_v3 }
 0xc64   :  { %v7364_v11 = vsub.f32 %v7362_v25, %v7363_v15  ;;  %v15621_v54 = vpack.c.bf16 %v7370_v31, %v7363_v15 }
 0xc65   :  { %v15607_v48 = vpack.c.bf16 %v7386_v2, %v7379_v62  ;;  %v16695_v2 = vld [vmem:[#allocation10_spill] sm:$0xff] }
 0xc66   :  { %12080 = vmatpush3.bf16.msra.mxu0 %v15585_v24  ;;  %12152 = vmatpush3.bf16.msra.mxu1 %v15585_v24  ;;  %v7365_v59 = vand.u32 4294901760, %v7364_v11 }
 0xc67   :  { %12081 = vmatprep.subr.bf16.mxu0 %v16555_v37  ;;  %12153 = vmatprep.subr.bf16.mxu1 %v16555_v37 }
 0xc68   :  { %v15605_v12 = vpack.c.bf16 %v7372_v4, %v7365_v59 }
 0xc6a   :  { %12083 = vmatpush3.bf16.msra.mxu0 %v15597_v19  ;;  %12155 = vmatpush3.bf16.msra.mxu1 %v15597_v19 }
 0xc6b   :  { %12084 = vmatprep.subr.bf16.mxu0 %v16555_v37  ;;  %12156 = vmatprep.subr.bf16.mxu1 %v16555_v37 }
 0xd25   :  { %v7207_v42 = vpop.f32.mrb[14].mxu1 }
 0xd26   :  { %v7209_v39 = vpop.f32.mrb[15].mxu1  ;;  %v15630_v35 = vadd.f32 %v9580_v23, %v7207_v42 }
 0xd28   :  { %v7232_v1 = vsel %vm3242_vm10, %v15630_v35, 0.0 }
 0xd29   :  { %v7214_v27 = vpop.f32.mrb[16].mxu1 }
 0xd2a   :  { %v15632_v45 = vadd.f32 %v9580_v23, %v7214_v27  ;;  %v7216_v28 = vpop.f32.mrb[17].mxu1 }
 0xd2c   :  { %v7233_v10 = vsel %vm3242_vm10, %v15632_v45, 0.0 }
 0xd2d   :  { %v7234_v22 = vadd.f32 %v7233_v10, %v7232_v1  ;;  %v7221_v43 = vpop.f32.mrb[18].mxu1 }
 0xd2e   :  { %v7223_v57 = vpop.f32.mrb[19].mxu1  ;;  %v15638_v16 = vadd.f32 %v9580_v23, %v7221_v43 }
 0xd2f   :  { %v7235_v55 = vrot.slane %v7234_v22, 4 }
 0xd30   :  { %v7241_v60 = vsel %vm3242_vm10, %v15638_v16, 0.0 }
 0xd31   :  { %v7236_v50 = vadd.f32 %v7235_v55, %v7234_v22  ;;  %v7228_v29 = vpop.f32.mrb[20].mxu1 }
 0xd32   :  { %v15640_v46 = vadd.f32 %v9580_v23, %v7228_v29  ;;  %v7230_v52 = vpop.f32.mrb[21].mxu1 }
 0xd33   :  { %v7237_v25 = vrot.slane %v7236_v50, 2 }
 0xd34   :  { %v7242_v61 = vsel %vm3242_vm10, %v15640_v46, 0.0 }
 0xd35   :  { %v7243_v63 = vadd.f32 %v7242_v61, %v7241_v60  ;;  %v7238_v9 = vadd.f32 %v7237_v25, %v7236_v50 }
 0xd37   :  { %v7244_v26 = vrot.slane %v7243_v63, 4  ;;  %v7239_v11 = vrot.slane %v7238_v9, 1 }
 0xd39   :  { %v7245_v15 = vadd.f32 %v7244_v26, %v7243_v63  ;;  %v7240_v7 = vadd.f32 %v7239_v11, %v7238_v9 }
 0xd3b   :  { %v7246_v31 = vrot.slane %v7245_v15, 2 }
 0xd3d   :  { %v7247_v44 = vadd.f32 %v7246_v31, %v7245_v15 }
 0xd3f   :  { %v7248_v30 = vrot.slane %v7247_v44, 1 }
 0xd41   :  { %v7249_v59 = vadd.f32 %v7248_v30, %v7247_v44 }
 0xd43   :  { %v7260_v4 = vsel %vm3271_vm11, %v7249_v59, %v7240_v7 }
 0xd44   :  { %v7261_v32 = vsel %vm3242_vm10, %v7260_v4, 0 }
 0xd45   :  { %v7336_v8 = vand.u32 4294901760, %v7261_v32 }
 0xd47   :  { %v7337_v47 = vsub.f32 %v7261_v32, %v7336_v8 }
 0xd49   :  { %v7338_v3 = vand.u32 4294901760, %v7337_v47 }
 0xd4b   :  { %v7339_v17 = vsub.f32 %v7337_v47, %v7338_v3 }
 0xd4d   :  { %v7340_v38 = vand.u32 4294901760, %v7339_v17  ;;  %v8572_v17 = vld [vmem:[%s16364_s23 + $0x38] sm:$0xff] }
 0xd4f   :  { %10925 = vmatmul.mubr.f32.vlgmr.msra.gmra.mrb[18].mxu0 %v7340_v38 }
 0xd50   :  { %12086 = vmatpush3.bf16.msra.mxu0 %v15603_v20  ;;  %10943 = vmatprep.mubr.msk.f32.mxu0 %vm12786_vm9, %v16694_v14 }
 0xd51   :  { %12087 = vmatprep.subr.bf16.mxu0 %v16555_v37 }
 0xd54   :  { %12089 = vmatpush3.bf16.msra.mxu0 %v15605_v12 }
 0xd55   :  { %12090 = vmatprep.subr.bf16.mxu0 %v16555_v37 }
 0xd58   :  { %12092 = vmatpush3.bf16.msra.mxu0 %v15607_v48 }
 0xd59   :  { %12093 = vmatprep.subr.bf16.mxu0 %v16555_v37 }
 0xd5c   :  { %12095 = vmatpush3.bf16.msra.mxu0 %v15609_v41 }
 0xd5d   :  { %12096 = vmatprep.subr.bf16.mxu0 %v16555_v37 }
 0xd5f   :  { %10944 = vmatmul.mubr.f32.vlgmr.msra.gmra.mrb[18].mxu0 %v7336_v8 }
 0xd60   :  { %12098 = vmatpush3.bf16.msra.mxu0 %v15611_v58  ;;  %10962 = vmatprep.mubr.msk.f32.mxu0 %vm12786_vm9, %v16694_v14 }
 0xd61   :  { %12099 = vmatprep.subr.bf16.mxu0 %v16555_v37 }
 0xd64   :  { %12101 = vmatpush3.bf16.msra.mxu0 %v15613_v36 }
 0xd65   :  { %12102 = vmatprep.subr.bf16.mxu0 %v16555_v37 }
 0xd68   :  { %12104 = vmatpush3.bf16.msra.mxu0 %v15615_v33 }
 0xd69   :  { %12105 = vmatprep.subr.bf16.mxu0 %v16555_v37 }
 0xd6c   :  { %12107 = vmatpush3.bf16.msra.mxu0 %v15617_v21 }
 0xd6d   :  { %12108 = vmatprep.subr.bf16.mxu0 %v16555_v37 }
 0xd6f   :  { %10963 = vmatmul.mubr.f32.vlgmr.msra.gmra.mrb[18].mxu0 %v7337_v47 }
 0xd70   :  { %12110 = vmatpush3.bf16.msra.mxu0 %v15561_v56  ;;  %10981 = vmatprep.mubr.msk.f32.mxu0 %vm12786_vm9, %v16694_v14 }
 0xd71   :  { %12111 = vmatprep.subr.bf16.mxu0 %v16555_v37 }
 0xd74   :  { %12113 = vmatpush3.bf16.msra.mxu0 %v15573_v0 }
 0xd75   :  { %12114 = vmatprep.subr.bf16.mxu0 %v16555_v37 }
 0xd78   :  { %12116 = vmatpush3.bf16.msra.mxu0 %v15585_v24 }
 0xd79   :  { %12117 = vmatprep.subr.bf16.mxu0 %v16555_v37 }
 0xd7c   :  { %12119 = vmatpush3.bf16.msra.mxu0 %v15597_v19 }
 0xd7d   :  { %12120 = vmatprep.subr.bf16.mxu0 %v16555_v37 }
 0xd7f   :  { %10982 = vmatmul.mubr.f32.vlgmr.msra.gmra.mrb[18].mxu0 %v7338_v3  ;;  %v8571_v3 = vld [vmem:[%s16364_s23 + $0x30] sm:$0xff] }
 0xd80   :  { %12122 = vmatpush3.bf16.msra.mxu0 %v15619_v13  ;;  %11000 = vmatprep.mubr.msk.f32.mxu0 %vm12786_vm9, %v16694_v14 }
 0xd81   :  { %12123 = vmatprep.subr.bf16.mxu0 %v16555_v37 }
 0xd84   :  { %12125 = vmatpush3.bf16.msra.mxu0 %v15621_v54 }
 0xd85   :  { %12126 = vmatprep.subr.bf16.mxu0 %v16555_v37 }
 0xd88   :  { %12128 = vmatpush3.bf16.msra.mxu0 %v15623_v49 }
 0xd89   :  { %12129 = vmatprep.subr.bf16.mxu0 %v16555_v37 }
 0xd8c   :  { %12131 = vmatpush3.bf16.msra.mxu0 %v15625_v5 }
 0xd8d   :  { %12132 = vmatprep.subr.bf16.mxu0 %v16555_v37 }
 0xd8f   :  { %11001 = vmatmul.mubr.f32.vlgmr.msra.gmra.mrb[18].mxu0 %v7336_v8 }
 0xd90   :  { %12134 = vmatpush3.bf16.msra.mxu0 %v15561_v56  ;;  %11019 = vmatprep.mubr.msk.f32.mxu0 %vm12786_vm9, %v16694_v14 }
 0xd91   :  { %12135 = vmatprep.subr.bf16.mxu0 %v16555_v37 }
 0xd94   :  { %12137 = vmatpush3.bf16.msra.mxu0 %v15573_v0 }
 0xd95   :  { %12138 = vmatprep.subr.bf16.mxu0 %v16555_v37 }
 0xd98   :  { %12140 = vmatpush3.bf16.msra.mxu0 %v15585_v24 }
 0xd99   :  { %12141 = vmatprep.subr.bf16.mxu0 %v16555_v37 }
 0xd9c   :  { %12143 = vmatpush3.bf16.msra.mxu0 %v15597_v19 }
 0xd9d   :  { %12216 = vmatprep.subr.bf16.mxu0 %v16555_v37 }
 0xd9f   :  { %11020 = vmatmul.mubr.f32.vlgmr.msra.gmra.mrb[18].mxu0 %v7336_v8 }
 0xe72   :  { %v7796_v62 = vpop.f32.mrb[18].mxu0 }
 0xe73   :  { %v7807_v6 = vrot.slane %v7796_v62, %v16695_v2  ;;  %v11021_v51 = vpop.f32.mrb[19].mxu0 }
 0xe75   :  { %v7808_v40 = vcombine.high %v7807_v6, %v7807_v6  ;;  %v7815_v34 = vrot.slane %v7807_v6, %v16695_v2 }
 0xe77   :  { %v7822_v18 = vrot.slane %v7808_v40, %v16695_v2  ;;  %v7826_v23 = vrot.slane %v7815_v34, %v16696_v53  ;;  %v8627_v34 = vand.u32 4294901760, %v8571_v3 }
 0xe79   :  { %v7830_v42 = vrot.slane %v7822_v18, %v16696_v53  ;;  %v15704_v39 = vsub.f32 %v15630_v35, %v7826_v23  ;;  %v15707_v27 = vsub.f32 %v15632_v45, %v7826_v23  ;;  %v8630_v18 = vand.u32 4294901760, %v8572_v17  ;;  %v8573_v23 = vld [vmem:[%s16364_s23 + $0x40] sm:$0xff] }
 0xe7b   :  { %v15710_v28 = vsub.f32 %v15638_v16, %v7830_v42  ;;  %v15713_v1 = vsub.f32 %v15640_v46, %v7830_v42  ;;  %v7837_v10 = vmul.f32 %v15704_v39, %v15704_v39  ;;  %v7838_v22 = vmul.f32 %v15707_v27, %v15707_v27  ;;  %v8574_v42 = vld [vmem:[%s16364_s23 + $0x48] sm:$0xff] }
 0xe7d   :  { %v7839_v43 = vmul.f32 %v15710_v28, %v15710_v28  ;;  %v7840_v35 = vmul.f32 %v15713_v1, %v15713_v1  ;;  %v7841_v45 = vsel %vm3242_vm10, %v7837_v10, 0.0  ;;  %v7842_v57 = vsel %vm3242_vm10, %v7838_v22, 0.0 }
 0xe7e   :  { %v7843_v55 = vadd.f32 %v7842_v57, %v7841_v45  ;;  %v8633_v45 = vand.u32 4294901760, %v8573_v23  ;;  %v8636_v57 = vand.u32 4294901760, %v8574_v42 }
 0xe7f   :  { %v7850_v16 = vsel %vm3242_vm10, %v7839_v43, 0.0  ;;  %v7851_v50 = vsel %vm3242_vm10, %v7840_v35, 0.0  ;;  %v15838_v43 = vsub.f32 %v8571_v3, %v8627_v34  ;;  %v15840_v35 = vsub.f32 %v8572_v17, %v8630_v18 }
 0xe80   :  { %v7844_v29 = vrot.slane %v7843_v55, 4  ;;  %v7852_v46 = vadd.f32 %v7851_v50, %v7850_v16  ;;  %v8576_v16 = vld [vmem:[%s16364_s23 + $0x58] sm:$0xff]  ;;  %v15850_v50 = vpack.c.bf16 %v8630_v18, %v8627_v34 }
 0xe82   :  { %v7845_v52 = vadd.f32 %v7844_v29, %v7843_v55  ;;  %v7853_v60 = vrot.slane %v7852_v46, 4  ;;  %v8575_v55 = vld [vmem:[%s16364_s23 + $0x50] sm:$0xff] }
 0xe83   :  { %v8639_v29 = vand.u32 4294901760, %v8575_v55 }
 0xe84   :  { %v7846_v61 = vrot.slane %v7845_v52, 2  ;;  %v7854_v25 = vadd.f32 %v7853_v60, %v7852_v46  ;;  %v12298_v46 = vpack.c.bf16 %v15840_v35, %v15838_v43  ;;  %v15857_v60 = vsub.f32 %v8574_v42, %v8636_v57 }
 0xe86   :  { %v7847_v63 = vadd.f32 %v7846_v61, %v7845_v52  ;;  %v7855_v26 = vrot.slane %v7854_v25, 2  ;;  %v15855_v52 = vsub.f32 %v8573_v23, %v8633_v45  ;;  %v8642_v61 = vand.u32 4294901760, %v8576_v16 }
 0xe88   :  { %v7848_v9 = vrot.slane %v7847_v63, 1  ;;  %v7856_v15 = vadd.f32 %v7855_v26, %v7854_v25  ;;  %v8577_v25 = vld [vmem:[%s16364_s23 + $0x60] sm:$0xff]  ;;  %v15867_v26 = vpack.c.bf16 %v8636_v57, %v8633_v45 }
 0xe8a   :  { %v7857_v31 = vrot.slane %v7856_v15, 1  ;;  %v7849_v11 = vadd.f32 %v7848_v9, %v7847_v63  ;;  %v8578_v63 = vld [vmem:[%s16364_s23 + $0x68] sm:$0xff]  ;;  %v15869_v9 = vsub.f32 %v8575_v55, %v8639_v29  ;;  %v9581_v55 = vld [vmem:[%s16361_s20] ss:$0 sm:$0xff] }
 0xe8c   :  { %v7858_v44 = vadd.f32 %v7857_v31, %v7856_v15  ;;  %v12301_v15 = vpack.c.bf16 %v15857_v60, %v15855_v52  ;;  %v15874_v31 = vsub.f32 %v8576_v16, %v8642_v61 }
 0xe8e   :  { %v7861_v30 = vsel %vm3271_vm11, %v7858_v44, %v7849_v11  ;;  %v8645_v11 = vand.u32 4294901760, %v8577_v25  ;;  %v8648_v44 = vand.u32 4294901760, %v8578_v63 }
 0xe8f   :  { %v7862_v7 = vsel %vm3242_vm10, %v7861_v30, 0  ;;  %v8579_v30 = vld [vmem:[%s16364_s23 + $0x70] sm:$0xff] }
 0xe90   :  { %v7937_v59 = vand.u32 4294901760, %v7862_v7 }
 0xe92   :  { %v7938_v4 = vsub.f32 %v7862_v7, %v7937_v59  ;;  %v8580_v7 = vld [vmem:[%s16364_s23 + $0x78] sm:$0xff] }
 0xe94   :  { %v7939_v32 = vand.u32 4294901760, %v7938_v4 }
 0xe96   :  { %v7940_v8 = vsub.f32 %v7938_v4, %v7939_v32 }
 0xe98   :  { %v7941_v47 = vand.u32 4294901760, %v7940_v8  ;;  %v15889_v8 = vsub.f32 %v8577_v25, %v8645_v11 }
 0xe9a   :  { %11039 = vmatmul.mubr.f32.vlgmr.msra.gmra.mrb[22].mxu1 %v7941_v47  ;;  %v15891_v47 = vsub.f32 %v8578_v63, %v8648_v44 }
 0xe9b   :  { %12158 = vmatpush3.bf16.msra.mxu1 %v15603_v20  ;;  %11057 = vmatprep.mubr.msk.f32.mxu1 %vm12786_vm9, %v16694_v14 }
 0xe9c   :  { %12159 = vmatprep.subr.bf16.mxu1 %v16555_v37 }
 0xe9f   :  { %12161 = vmatpush3.bf16.msra.mxu1 %v15605_v12 }
 0xea0   :  { %12162 = vmatprep.subr.bf16.mxu1 %v16555_v37 }
 0xea3   :  { %12164 = vmatpush3.bf16.msra.mxu1 %v15607_v48  ;;  %v8569_v48 = vld [vmem:[%s16364_s23 + $0x20] sm:$0xff] }
 0xea4   :  { %12165 = vmatprep.subr.bf16.mxu1 %v16555_v37 }
 0xea7   :  { %12167 = vmatpush3.bf16.msra.mxu1 %v15609_v41  ;;  %v8570_v41 = vld [vmem:[%s16364_s23 + $0x28] sm:$0xff] }
 0xea8   :  { %12168 = vmatprep.subr.bf16.mxu1 %v16555_v37 }
 0xeaa   :  { %11058 = vmatmul.mubr.f32.vlgmr.msra.gmra.mrb[22].mxu1 %v7937_v59 }
 0xeab   :  { %12170 = vmatpush3.bf16.msra.mxu1 %v15611_v58  ;;  %11076 = vmatprep.mubr.msk.f32.mxu1 %vm12786_vm9, %v16694_v14 }
 0xeac   :  { %12171 = vmatprep.subr.bf16.mxu1 %v16555_v37 }
 0xeaf   :  { %12173 = vmatpush3.bf16.msra.mxu1 %v15613_v36  ;;  %v8621_v36 = vand.u32 4294901760, %v8569_v48 }
 0xeb0   :  { %12174 = vmatprep.subr.bf16.mxu1 %v16555_v37 }
 0xeb1   :  { %v15818_v6 = vsub.f32 %v8569_v48, %v8621_v36 }
 0xeb3   :  { %12176 = vmatpush3.bf16.msra.mxu1 %v15615_v33  ;;  %v8624_v33 = vand.u32 4294901760, %v8570_v41 }
 0xeb4   :  { %12177 = vmatprep.subr.bf16.mxu1 %v16555_v37 }
 0xeb5   :  { %v15820_v51 = vsub.f32 %v8570_v41, %v8624_v33  ;;  %v15833_v10 = vpack.c.bf16 %v8624_v33, %v8621_v36 }
 0xeb7   :  { %12179 = vmatpush3.bf16.msra.mxu1 %v15617_v21  ;;  %v12295_v22 = vpack.c.bf16 %v15820_v51, %v15818_v6 }
 0xeb8   :  { %12180 = vmatprep.subr.bf16.mxu1 %v16555_v37 }
 0xeba   :  { %11077 = vmatmul.mubr.f32.vlgmr.msra.gmra.mrb[22].mxu1 %v7938_v4  ;;  %v8651_v4 = vand.u32 4294901760, %v8579_v30 }
 0xebb   :  { %12182 = vmatpush3.bf16.msra.mxu1 %v15561_v56  ;;  %11095 = vmatprep.mubr.msk.f32.mxu1 %vm12786_vm9, %v16694_v14 }
 0xebc   :  { %12183 = vmatprep.subr.bf16.mxu1 %v16555_v37 }
 0xebf   :  { %12185 = vmatpush3.bf16.msra.mxu1 %v15573_v0 }
 0xec0   :  { %12186 = vmatprep.subr.bf16.mxu1 %v16555_v37 }
 0xec3   :  { %12188 = vmatpush3.bf16.msra.mxu1 %v15585_v24 }
 0xec4   :  { %12189 = vmatprep.subr.bf16.mxu1 %v16555_v37 }
 0xec7   :  { %12191 = vmatpush3.bf16.msra.mxu1 %v15597_v19 }
 0xec8   :  { %12192 = vmatprep.subr.bf16.mxu1 %v16555_v37 }
 0xeca   :  { %11096 = vmatmul.mubr.f32.vlgmr.msra.gmra.mrb[22].mxu1 %v7939_v32  ;;  %v12304_v32 = vpack.c.bf16 %v15874_v31, %v15869_v9 }
 0xecb   :  { %12194 = vmatpush3.bf16.msra.mxu1 %v15619_v13  ;;  %11114 = vmatprep.mubr.msk.f32.mxu1 %vm12786_vm9, %v16694_v14 }
 0xecc   :  { %12195 = vmatprep.subr.bf16.mxu1 %v16555_v37 }
 0xecf   :  { %12197 = vmatpush3.bf16.msra.mxu1 %v15621_v54 }
 0xed0   :  { %12198 = vmatprep.subr.bf16.mxu1 %v16555_v37 }
 0xed3   :  { %12200 = vmatpush3.bf16.msra.mxu1 %v15623_v49 }
 0xed4   :  { %12201 = vmatprep.subr.bf16.mxu1 %v16555_v37 }
 0xed7   :  { %12203 = vmatpush3.bf16.msra.mxu1 %v15625_v5 }
 0xed8   :  { %12204 = vmatprep.subr.bf16.mxu1 %v16555_v37 }
 0xeda   :  { %11115 = vmatmul.mubr.f32.vlgmr.msra.gmra.mrb[22].mxu1 %v7937_v59 }
 0xedb   :  { %12206 = vmatpush3.bf16.msra.mxu1 %v15561_v56  ;;  %11133 = vmatprep.mubr.msk.f32.mxu1 %vm12786_vm9, %v16694_v14  ;;  %v8565_v56 = vld [vmem:[%s16364_s23] sm:$0xff]  ;;  %v8566_v14 = vld [vmem:[%s16364_s23 + $0x8] sm:$0xff] }
 0xedc   :  { %12207 = vmatprep.subr.bf16.mxu1 %v16555_v37  ;;  %v8612_v20 = vand.u32 4294901760, %v8566_v14 }
 0xede   :  { %v15799_v13 = vsub.f32 %v8566_v14, %v8612_v20  ;;  %v15897_v14 = vld [vmem:[%s16364_s23 + $0x80] sm:$0xff] }
 0xedf   :  { %12209 = vmatpush3.bf16.msra.mxu1 %v15573_v0  ;;  %v8567_v0 = vld [vmem:[%s16364_s23 + $0x10] sm:$0xff]  ;;  %v8657_v48 = vand.u32 4294901760, %v15897_v14 }
 0xee0   :  { %12210 = vmatprep.subr.bf16.mxu1 %v16555_v37  ;;  %v8615_v12 = vand.u32 4294901760, %v8567_v0 }
 0xee1   :  { %v15926_v33 = vsub.f32 %v15897_v14, %v8657_v48 }
 0xee2   :  { %v15801_v54 = vsub.f32 %v8567_v0, %v8615_v12  ;;  %v15902_v0 = vld [vmem:[%s16364_s23 + $0x88] sm:$0xff] }
 0xee3   :  { %12212 = vmatpush3.bf16.msra.mxu1 %v15585_v24  ;;  %v8609_v24 = vand.u32 4294901760, %v8565_v56  ;;  %v8660_v41 = vand.u32 4294901760, %v15902_v0 }
 0xee4   :  { %12213 = vmatprep.subr.bf16.mxu1 %v16555_v37 }
 0xee5   :  { %v15797_v21 = vsub.f32 %v8565_v56, %v8609_v24  ;;  %v15803_v49 = vpack.c.bf16 %v8612_v20, %v8609_v24  ;;  %v8654_v56 = vand.u32 4294901760, %v8580_v7  ;;  %v15905_v24 = vpack.c.bf16 %v8648_v44, %v8645_v11 }
 0xee6   :  { %v15907_v20 = vsub.f32 %v8579_v30, %v8651_v4  ;;  %v15931_v3 = vsub.f32 %v15902_v0, %v8660_v41 }
 0xee7   :  { %12215 = vmatpush3.bf16.msra.mxu1 %v15597_v19  ;;  %v8568_v19 = vld [vmem:[%s16364_s23 + $0x18] sm:$0xff]  ;;  %v12289_v38 = vpack.c.bf16 %v15799_v13, %v15797_v21  ;;  %12218 = vmatpush1.bf16.msra.mxu0 %v15803_v49 }
 0xee8   :  { %12288 = vmatprep.subr.bf16.mxu1 %v16555_v37  ;;  %v8618_v58 = vand.u32 4294901760, %v8568_v19  ;;  %12219 = vmatprep.subr.bf16.mxu0 %v16555_v37  ;;  %v12313_v17 = vpack.c.bf16 %v15931_v3, %v15926_v33 }
 0xeea   :  { %11134 = vmatmul.mubr.f32.vlgmr.msra.gmra.mrb[22].mxu1 %v7937_v59  ;;  %v15805_v5 = vsub.f32 %v8568_v19, %v8618_v58  ;;  %v15816_v62 = vpack.c.bf16 %v8618_v58, %v8615_v12  ;;  %v15884_v59 = vpack.c.bf16 %v8642_v61, %v8639_v29  ;;  %v12307_v19 = vpack.c.bf16 %v15891_v47, %v15889_v8  ;;  %v9582_v61 = vld [vmem:[%s16362_s21] ss:$0 sm:$0xff] }
 0xeeb   :  { %12290 = vmatpush1.bf16.msra.mxu1 %v12289_v38  ;;  %v15912_v12 = vsub.f32 %v8580_v7, %v8654_v56  ;;  %v15918_v58 = vpack.c.bf16 %v8654_v56, %v8651_v4 }
 0xeec   :  { %v12292_v40 = vpack.c.bf16 %v15805_v5, %v15801_v54  ;;  %12291 = vmatprep.subr.bf16.mxu1 %v16555_v37  ;;  %12221 = vmatpush1.bf16.msra.mxu0 %v15816_v62 }
 0xeed   :  { %12222 = vmatprep.subr.bf16.mxu0 %v16555_v37  ;;  %v12310_v36 = vpack.c.bf16 %v15912_v12, %v15907_v20 }
 0xeef   :  { %12293 = vmatpush1.bf16.msra.mxu1 %v12292_v40 }
 0xef0   :  { %12294 = vmatprep.subr.bf16.mxu1 %v16555_v37  ;;  %12224 = vmatpush1.bf16.msra.mxu0 %v15833_v10 }
 0xef1   :  { %12225 = vmatprep.subr.bf16.mxu0 %v16555_v37 }
 0xef3   :  { %12296 = vmatpush1.bf16.msra.mxu1 %v12295_v22 }
 0xef4   :  { %12297 = vmatprep.subr.bf16.mxu1 %v16555_v37  ;;  %12227 = vmatpush1.bf16.msra.mxu0 %v15850_v50 }
 0xef5   :  { %12228 = vmatprep.subr.bf16.mxu0 %v16555_v37 }
 0xef7   :  { %12299 = vmatpush1.bf16.msra.mxu1 %v12298_v46 }
 0xef8   :  { %12300 = vmatprep.subr.bf16.mxu1 %v16555_v37  ;;  %12230 = vmatpush1.bf16.msra.mxu0 %v15867_v26 }
 0xef9   :  { %12231 = vmatprep.subr.bf16.mxu0 %v16555_v37 }
 0xefb   :  { %12302 = vmatpush1.bf16.msra.mxu1 %v12301_v15 }
 0xefc   :  { %12303 = vmatprep.subr.bf16.mxu1 %v16555_v37  ;;  %12233 = vmatpush1.bf16.msra.mxu0 %v15884_v59 }
 0xefd   :  { %12234 = vmatprep.subr.bf16.mxu0 %v16555_v37 }
 0xeff   :  { %12305 = vmatpush1.bf16.msra.mxu1 %v12304_v32 }
 0xf00   :  { %12306 = vmatprep.subr.bf16.mxu1 %v16555_v37  ;;  %12236 = vmatpush1.bf16.msra.mxu0 %v15905_v24 }
 0xf01   :  { %12237 = vmatprep.subr.bf16.mxu0 %v16555_v37 }
 0xf03   :  { %12308 = vmatpush1.bf16.msra.mxu1 %v12307_v19 }
 0xf04   :  { %12309 = vmatprep.subr.bf16.mxu1 %v16555_v37  ;;  %12239 = vmatpush1.bf16.msra.mxu0 %v15918_v58 }
 0xf05   :  { %12240 = vmatprep.subr.bf16.mxu0 %v16555_v37 }
 0xf07   :  { %12311 = vmatpush1.bf16.msra.mxu1 %v12310_v36 }
 0xf08   :  { %12312 = vmatprep.subr.bf16.mxu1 %v16555_v37 }
 0xf0b   :  { %12314 = vmatpush1.bf16.msra.mxu1 %v12313_v17 }
 0xf0c   :  { %12315 = vmatprep.subr.bf16.mxu1 %v16555_v37 }
 0xfbd   :  { %v8397_v38 = vpop.f32.mrb[22].mxu1 }
 0xfbe   :  { %v12465_v40 = vadd.f32 1e-05, %v8397_v38  ;;  %v11135_v34 = vpop.f32.mrb[23].mxu1 }
 0xfc0   :  { %12734 = vrsqrt.f32 %v12465_v40 }
 0xfca   :  { %v12735_v18 = vpop.eup %12734 }
 0xfcb   :  { %v8409_v23 = vrot.slane %v12735_v18, %v16695_v2 }
 0xfcd   :  { %v8410_v42 = vcombine.high %v8409_v23, %v8409_v23  ;;  %v8417_v22 = vrot.slane %v8409_v23, %v16695_v2 }
 0xfcf   :  { %v8428_v45 = vrot.slane %v8417_v22, %v16696_v53  ;;  %v8424_v57 = vrot.slane %v8410_v42, %v16695_v2  ;;  %v8585_v22 = vld [vmem:[%s16364_s23 + $0xa0] sm:$0xff] }
 0xfd1   :  { %v8436_v16 = vmul.f32 %v8428_v45, %v15707_v27  ;;  %v8435_v29 = vmul.f32 %v8428_v45, %v15704_v39  ;;  %v8432_v46 = vrot.slane %v8424_v57, %v16696_v53  ;;  %v8586_v45 = vld [vmem:[%s16364_s23 + $0xa8] sm:$0xff] }
 0xfd3   :  { %v8447_v25 = vmul.f32 %v9581_v55, %v8436_v16  ;;  %v8446_v63 = vmul.f32 %v9581_v55, %v8435_v29  ;;  %v8438_v15 = vmul.f32 %v8432_v46, %v15713_v1  ;;  %v8437_v2 = vmul.f32 %v8432_v46, %v15710_v28  ;;  %v8583_v28 = vld [vmem:[%s16364_s23 + $0x90] sm:$0xff]  ;;  %v8584_v1 = vld [vmem:[%s16364_s23 + $0x98] sm:$0xff] }
 0xfd4   :  { %v8663_v19 = vand.u32 4294901760, %v8583_v28  ;;  %v8666_v36 = vand.u32 4294901760, %v8584_v1  ;;  %v8669_v29 = vand.u32 4294901760, %v8585_v22 }
 0xfd5   :  { %v8458_v11 = vadd.f32 %v9582_v61, %v8447_v25  ;;  %v8457_v44 = vadd.f32 %v9582_v61, %v8446_v63  ;;  %v8449_v30 = vmul.f32 %v9581_v55, %v8438_v15  ;;  %v8448_v7 = vmul.f32 %v9581_v55, %v8437_v2  ;;  %v8587_v2 = vld [vmem:[%s16364_s23 + $0xb0] sm:$0xff] }
 0xfd6   :  { %v15967_v34 = vsub.f32 %v8583_v28, %v8663_v19  ;;  %v15969_v18 = vsub.f32 %v8584_v1, %v8666_v36  ;;  %v15983_v25 = vpack.c.bf16 %v8660_v41, %v8657_v48  ;;  %v15985_v63 = vsub.f32 %v8585_v22, %v8669_v29 }
 0xfd7   :  { %v9584_v4 = vmul.f32 -1.442695, %v8458_v11  ;;  %v9583_v27 = vmul.f32 -1.442695, %v8457_v44  ;;  %v15955_v32 = vadd.f32 %v9582_v61, %v8449_v30  ;;  %v15957_v39 = vadd.f32 %v9582_v61, %v8448_v7  ;;  %v8588_v30 = vld [vmem:[%s16364_s23 + $0xb8] sm:$0xff] }
 0xfd8   :  { %v12316_v16 = vpack.c.bf16 %v15969_v18, %v15967_v34  ;;  %v8672_v61 = vand.u32 4294901760, %v8586_v45  ;;  %12242 = vmatpush1.bf16.msra.mxu0 %v15983_v25  ;;  %v8675_v14 = vand.u32 4294901760, %v8587_v2  ;;  %v8678_v0 = vand.u32 4294901760, %v8588_v30 }
 0xfd9   :  { %12736 = vpow2.f32 %v9584_v4  ;;  %v9586_v53 = vmul.f32 -1.442695, %v15955_v32  ;;  %v9585_v56 = vmul.f32 -1.442695, %v15957_v39  ;;  %12243 = vmatprep.subr.bf16.mxu0 %v16555_v37  ;;  %v16000_v41 = vpack.c.bf16 %v8666_v36, %v8663_v19 }
 0xfda   :  { %12738 = vpow2.f32 %v9583_v27  ;;  %12317 = vmatpush1.bf16.msra.mxu1 %v12316_v16  ;;  %v15988_v15 = vsub.f32 %v8586_v45, %v8672_v61  ;;  %v16002_v7 = vsub.f32 %v8587_v2, %v8675_v14  ;;  %v16004_v4 = vsub.f32 %v8588_v30, %v8678_v0  ;;  %v16702_v2 = vld [vmem:[#allocation9_spill] sm:$0xff] }
 0xfdb   :  { %12740 = vpow2.f32 %v9586_v53  ;;  %12318 = vmatprep.subr.bf16.mxu1 %v16555_v37  ;;  %v16010_v53 = vpack.c.bf16 %v8672_v61, %v8669_v29  ;;  %v16028_v29 = vpack.c.bf16 %v8678_v0, %v8675_v14 }
 0xfdc   :  { %12742 = vpow2.f32 %v9585_v56  ;;  %v12319_v48 = vpack.c.bf16 %v15988_v15, %v15985_v63  ;;  %12245 = vmatpush1.bf16.msra.mxu0 %v16000_v41  ;;  %v12322_v27 = vpack.c.bf16 %v16004_v4, %v16002_v7 }
 0xfdd   :  { %16697 = vst [vmem:[#allocation26_spill] sm:$0xff] %v16010_v53  ;;  %12246 = vmatprep.subr.bf16.mxu0 %v16555_v37  ;;  %16701 = vst [vmem:[#allocation24_spill] sm:$0xff] %v16028_v29 }
 0xfde   :  { %12320 = vmatpush1.bf16.msra.mxu1 %v12319_v48 }
 0xfdf   :  { %12321 = vmatprep.subr.bf16.mxu1 %v16555_v37 }
 0xfe0   :  { %12248 = vmatpush1.bf16.msra.mxu0 %v16010_v53 }
 0xfe1   :  { %12249 = vmatprep.subr.bf16.mxu0 %v16555_v37 }
 0xfe2   :  { %12323 = vmatpush1.bf16.msra.mxu1 %v12322_v27 }
 0xfe3   :  { %v12737_v17 = vpop.eup %12736  ;;  %12360 = vmatprep.subr.bf16.mxu1 %v16555_v37 }
 0xfe4   :  { %v12739_v38 = vpop.eup %12738  ;;  %v8474_v40 = vadd.f32 1.0, %v12737_v17  ;;  %12251 = vmatpush1.bf16.msra.mxu0 %v16028_v29 }
 0xfe5   :  { %v12741_v23 = vpop.eup %12740  ;;  %v8473_v42 = vadd.f32 1.0, %v12739_v38  ;;  %v16698_v38 = vld [vmem:[#allocation7_spill] sm:$0xff]  ;;  %12252 = vmatprep.subr.bf16.mxu0 %v16555_v37 }
 0xfe6   :  { %v12743_v57 = vpop.eup %12742  ;;  %12744 = vrcp.f32 %v8474_v40  ;;  %v8476_v55 = vadd.f32 1.0, %v12741_v23 }
 0xfe7   :  { %12746 = vrcp.f32 %v8473_v42  ;;  %v8475_v46 = vadd.f32 1.0, %v12743_v57  ;;  %v16700_v57 = vld [vmem:[#allocation8_spill] sm:$0xff] }
 0xfe8   :  { %12748 = vrcp.f32 %v8476_v55 }
 0xfe9   :  { %12750 = vrcp.f32 %v8475_v46 }
 0xff0   :  { %v12745_v56 = vpop.eup %12744 }
 0xff1   :  { %v12747_v28 = vpop.eup %12746  ;;  %v8486_v1 = vmul.f32 %v12745_v56, %v8458_v11 }
 0xff2   :  { %v12749_v19 = vpop.eup %12748  ;;  %v16013_v36 = vmul.f32 %v12747_v28, %v8457_v44  ;;  %v16699_v44 = vld [vmem:[#allocation6_spill] sm:$0xff] }
 0xff3   :  { %v12751_v17 = vpop.eup %12750  ;;  %8497 = vrot.lane.b32.xlu1 %v8486_v1, %s12784_s28  ;;  %v8512_v40 = vmul.f32 %v16698_v38, %v8486_v1  ;;  %v8488_v23 = vmul.f32 %v12749_v19, %v15955_v32  ;;  %v8543_v46 = vrot.slane %v8486_v1, 1 }
 0xff4   :  { %8495 = vrot.lane.b32.xlu0 %v16013_v36, %s12784_s28  ;;  %v8519_v11 = vrot.slane %v16013_v36, 7  ;;  %v8534_v42 = vmul.f32 %v16699_v44, %v16013_v36  ;;  %v8487_v22 = vmul.f32 %v12751_v17, %v15957_v39 }
 0xff5   :  { %v8520_v45 = vrot.slane %v8512_v40, 7  ;;  %v8514_v55 = vmul.f32 %v16700_v57, %v8488_v23  ;;  %v8547_v16 = vrot.slane %v8488_v23, 1 }
 0xff6   :  { %v8542_v32 = vrot.slane %v8534_v42, 1  ;;  %v8522_v61 = vrot.slane %v8487_v22, 7  ;;  %v8536_v30 = vmul.f32 %v16702_v2, %v8487_v22 }
 0xff7   :  { %8501 = vrot.lane.b32.xlu1 %v8488_v23, %s12784_s28  ;;  %v8524_v48 = vrot.slane %v8514_v55, 7  ;;  %8556 = vst.msk [vmem:[#allocation2 + $0x38] sm:$0x7f] %vm4571_vm12, %v8547_v16  ;;  %v8521_v39 = vsel %vm195_vm5, %v8519_v11, %v8520_v45  ;;  %v8900_v55 = vand.u32 4294901760, %v15985_v63 }
 0xff8   :  { %v8544_v27 = vsel %vm221_vm1, %v8542_v32, %v8543_v46  ;;  %8499 = vrot.lane.b32.xlu0 %v8487_v22, %s12784_s28  ;;  %v8545_v14 = vrot.slane %v8536_v30, 1  ;;  %v8523_v0 = vsel %vm195_vm5, %v8520_v45, %v8522_v61  ;;  %v8886_v22 = vand.u32 4294901760, %v15967_v34 }
 0xff9   :  { %8553 = vst.msk [vmem:[#allocation2 + $0x8] sm:$0xff] %vm3242_vm10, %v8544_v27  ;;  %v8525_v56 = vsel %vm195_vm5, %v8522_v61, %v8524_v48  ;;  %v8893_v45 = vand.u32 4294901760, %v15969_v18  ;;  %v8914_v48 = vand.u32 4294901760, %v16002_v7  ;;  %v8921_v27 = vand.u32 4294901760, %v16004_v4 }
 0xffa   :  { %v8546_v28 = vsel %vm221_vm1, %v8543_v46, %v8545_v14  ;;  %v8548_v1 = vsel %vm221_vm1, %v8545_v14, %v8547_v16  ;;  %v8907_v16 = vand.u32 4294901760, %v15988_v15  ;;  %v8887_v46 = vsub.f32 %v15967_v34, %v8886_v22 }
 0xffb   :  { %8554 = vst.msk [vmem:[#allocation2 + $0x18] sm:$0xff] %vm3242_vm10, %v8546_v28  ;;  %8555 = vst.msk [vmem:[#allocation2 + $0x28] sm:$0xff] %vm3242_vm10, %v8548_v1  ;;  %v16060_v57 = vpack.c.bf16 %v8893_v45, %v8886_v22  ;;  %v8894_v32 = vsub.f32 %v15969_v18, %v8893_v45  ;;  %v8901_v14 = vsub.f32 %v15985_v63, %v8900_v55 }
 0xffc   :  { %v16066_v61 = vpack.c.bf16 %v8907_v16, %v8900_v55  ;;  %v8888_v2 = vand.u32 4294901760, %v8887_v46  ;;  %v8908_v28 = vsub.f32 %v15988_v15, %v8907_v16  ;;  %v8915_v18 = vsub.f32 %v16002_v7, %v8914_v48 }
 0xffd   :  { %v8895_v30 = vand.u32 4294901760, %v8894_v32 }
 0xffe   :  { %v8909_v34 = vand.u32 4294901760, %v8908_v28  ;;  %v8916_v22 = vand.u32 4294901760, %v8915_v18 }
 0xfff   :  { %v16072_v1 = vpack.c.bf16 %v8895_v30, %v8888_v2  ;;  %v8760_v30 = vand.u32 4294901760, %v15797_v21 }
0x1000   :  { %v8558_v19 = vld [vmem:[#allocation2 + $0x8] sm:$0xff] }
0x1001   :  { %v8597_v17 = vsel %vm3242_vm10, %v8558_v19, 0  ;;  %v16074_v19 = vpack.c.bf16 %v8921_v27, %v8914_v48  ;;  %v8767_v48 = vand.u32 4294901760, %v15799_v13  ;;  %v8761_v36 = vsub.f32 %v15797_v21, %v8760_v30 }
0x1002   :  { %v16048_v38 = vand.u32 4294901760, %v8597_v17  ;;  %v8560_v32 = vld [vmem:[#allocation2 + $0x18] sm:$0xff]  ;;  %v8562_v16 = vld [vmem:[#allocation2 + $0x28] sm:$0xff] }
0x1003   :  { %v8600_v55 = vsel %vm3242_vm10, %v8560_v32, 0  ;;  %v12361_v21 = vpack.c.bf16 %v8767_v48, %v8760_v30 }
0x1004   :  { %v16051_v40 = vsub.f32 %v8597_v17, %v16048_v38  ;;  %v8902_v17 = vand.u32 4294901760, %v8901_v14 }
0x1006   :  { %9084 = vmatprep.mubr.f32.mxu1 %v16051_v40  ;;  %v16499_v23 = vand.u32 4294901760, %v16051_v40 }
0x1008   :  { %v8699_v44 = vsub.f32 %v16051_v40, %v16499_v23 }
0x100a   :  { %v8700_v42 = vand.u32 4294901760, %v8699_v44  ;;  %v16076_v44 = vpack.c.bf16 %v8909_v34, %v8902_v17 }
0x100c   :  { %8701 = vmatprep.mubr.f32.mxu0 %v8700_v42  ;;  %v8922_v42 = vsub.f32 %v16004_v4, %v8921_v27  ;;  %v16089_v4 = vand.u32 4294901760, %v8600_v55  ;;  %v8603_v27 = vsel %vm3242_vm10, %v8562_v16, 0 }
0x100d   :  { %v16103_v28 = vand.u32 4294901760, %v8603_v27 }
0x100e   :  { %v8923_v45 = vand.u32 4294901760, %v8922_v42  ;;  %v16101_v14 = vsub.f32 %v8600_v55, %v16089_v4 }
0x1010   :  { %v16080_v46 = vpack.c.bf16 %v8923_v45, %v8916_v22  ;;  %16703 = vst [vmem:[#allocation28_spill] sm:$0xff] %v16101_v14  ;;  %v8781_v22 = vand.u32 4294901760, %v15805_v5  ;;  %v8762_v45 = vand.u32 4294901760, %v8761_v36  ;;  %v8788_v36 = vand.u32 4294901760, %v15818_v6 }
0x1065   :  { %v8498_v63 = vpop.permute.xlu1 %8497 }
0x1066   :  { %8508 = vst.msk [vmem:[#allocation2 + $0x10] sm:$0xff] %vm4520_vm13, %v8498_v63  ;;  %v8496_v15 = vpop.permute.xlu0 %8495  ;;  %v16116_v63 = vsub.f32 %v8603_v27, %v16103_v28 }
0x1067   :  { %8531 = vst.msk [vmem:[#allocation2 + $0x10] sm:$0xff] %vm3242_vm10, %v8521_v39  ;;  %v8564_v39 = vld [vmem:[#allocation2 + $0x38] sm:$0xff] }
0x1068   :  { %8507 = vst.msk [vmem:[#allocation2] sm:$0xff] %vm4520_vm13, %v8496_v15  ;;  %v8606_v34 = vsel %vm3242_vm10, %v8564_v39, 0  ;;  %v16502_v15 = vand.u32 4294901760, %v16101_v14 }
0x1069   :  { %8530 = vst.msk [vmem:[#allocation2] sm:$0xfe] %vm4544_vm14, %v8519_v11  ;;  %v8502_v7 = vpop.permute.xlu1 %8501  ;;  %v8768_v11 = vsub.f32 %v15799_v13, %v8767_v48  ;;  %v16119_v55 = vand.u32 4294901760, %v8606_v34 }
0x106a   :  { %8510 = vst.msk [vmem:[#allocation2 + $0x30] sm:$0xff] %vm4520_vm13, %v8502_v7  ;;  %v8500_v2 = vpop.permute.xlu0 %8499 }
0x106b   :  { %8533 = vst.msk [vmem:[#allocation2 + $0x30] sm:$0xff] %vm3242_vm10, %v8525_v56  ;;  %v8774_v56 = vand.u32 4294901760, %v15801_v54  ;;  %v8769_v13 = vand.u32 4294901760, %v8768_v11  ;;  %v8795_v11 = vand.u32 4294901760, %v15820_v51 }
0x106c   :  { %8509 = vst.msk [vmem:[#allocation2 + $0x20] sm:$0xff] %vm4520_vm13, %v8500_v2  ;;  %v8782_v2 = vsub.f32 %v15805_v5, %v8781_v22  ;;  %v8714_v5 = vsub.f32 %v16101_v14, %v16502_v15  ;;  %v8809_v15 = vand.u32 4294901760, %v15840_v35 }
0x106d   :  { %8532 = vst.msk [vmem:[#allocation2 + $0x20] sm:$0xff] %vm3242_vm10, %v8523_v0  ;;  %v8775_v7 = vsub.f32 %v15801_v54, %v8774_v56  ;;  %v12364_v48 = vpack.c.bf16 %v8781_v22, %v8774_v56  ;;  %v12253_v54 = vpack.c.bf16 %v8769_v13, %v8762_v45  ;;  %v16140_v56 = vsub.f32 %v8606_v34, %v16119_v55 }
0x106e   :  { %v8559_v17 = vld [vmem:[#allocation2 + $0x10] sm:$0xff]  ;;  %v8783_v45 = vand.u32 4294901760, %v8782_v2  ;;  %v8802_v13 = vand.u32 4294901760, %v15838_v43  ;;  %v8789_v34 = vsub.f32 %v15818_v6, %v8788_v36  ;;  %v8715_v2 = vand.u32 4294901760, %v8714_v5 }
0x106f   :  { %v16106_v42 = vand.u32 4294901760, %v8559_v17  ;;  %v8776_v29 = vand.u32 4294901760, %v8775_v7  ;;  %v16707_v6 = vand.u32 4294901760, %v16116_v63 }
0x1070   :  { %v8557_v18 = vld [vmem:[#allocation2] sm:$0xff]  ;;  %v8790_v7 = vand.u32 4294901760, %v8789_v34 }
0x1071   :  { %v16110_v0 = vand.u32 4294901760, %v8557_v18  ;;  %v16113_v32 = vsub.f32 %v8559_v17, %v16106_v42 }
0x1072   :  { %v8563_v30 = vld [vmem:[#allocation2 + $0x30] sm:$0xff] }
0x1073   :  { %16704 = vst [vmem:[#allocation12_spill] sm:$0xff] %v16113_v32  ;;  %v16122_v16 = vsub.f32 %v8557_v18, %v16110_v0  ;;  %v16133_v23 = vand.u32 4294901760, %v8563_v30  ;;  %v16706_v53 = vand.u32 4294901760, %v16113_v32 }
0x1074   :  { %v8561_v39 = vld [vmem:[#allocation2 + $0x20] sm:$0xff] }
0x1075   :  { %16705 = vst [vmem:[#allocation13_spill] sm:$0xff] %v16122_v16  ;;  %9087 = vmatmul.mubr.f32.vlgmr.msra.gmra.mrb[24].mxu1 %v16122_v16  ;;  %v16506_v27 = vand.u32 4294901760, %v16122_v16  ;;  %v16130_v17 = vand.u32 4294901760, %v8561_v39 }
0x1076   :  { %12362 = vmatpush1.bf16.msra.mxu1 %v12361_v21  ;;  %9093 = vmatprep.mubr.f32.mxu1 %v16101_v14  ;;  %v8796_v14 = vsub.f32 %v15820_v51, %v8795_v11  ;;  %v8729_v51 = vsub.f32 %v16116_v63, %v16707_v6 }
0x1077   :  { %12363 = vmatprep.subr.bf16.mxu1 %v16555_v37  ;;  %v8705_v18 = vsub.f32 %v16122_v16, %v16506_v27  ;;  %v16148_v21 = vsub.f32 %v8561_v39, %v16130_v17  ;;  %v8720_v27 = vsub.f32 %v16113_v32, %v16706_v53  ;;  %v16159_v39 = vsub.f32 %v8563_v30, %v16133_v23 }
0x1078   :  { %v12367_v16 = vpack.c.bf16 %v8795_v11, %v8788_v36  ;;  %v8803_v53 = vsub.f32 %v15838_v43, %v8802_v13  ;;  %v8810_v30 = vsub.f32 %v15840_v35, %v8809_v15  ;;  %v12370_v11 = vpack.c.bf16 %v8809_v15, %v8802_v13 }
0x1079   :  { %9096 = vmatmul.mubr.f32.gmra.mrb[26].mxu1 %v16113_v32  ;;  %v8706_v22 = vand.u32 4294901760, %v8705_v18  ;;  %v8743_v18 = vand.u32 4294901760, %v16140_v56  ;;  %v8797_v32 = vand.u32 4294901760, %v8796_v14  ;;  %v8721_v36 = vand.u32 4294901760, %v8720_v27 }
0x107a   :  { %12365 = vmatpush1.bf16.msra.mxu1 %v12364_v48  ;;  %9102 = vmatprep.mubr.f32.mxu1 %v16116_v63  ;;  %v12256_v48 = vpack.c.bf16 %v8783_v45, %v8776_v29  ;;  %v16708_v5 = vand.u32 4294901760, %v16148_v21  ;;  %v8749_v6 = vand.u32 4294901760, %v16159_v39  ;;  %v8730_v43 = vand.u32 4294901760, %v8729_v51 }
0x107b   :  { %8707 = vmatmul.mubr.f32.vlgmr.msra.gmra.mrb[20].mxu0 %v8706_v22  ;;  %12366 = vmatprep.subr.bf16.mxu1 %v16555_v37  ;;  %v8744_v35 = vsub.f32 %v16140_v56, %v8743_v18  ;;  %v8816_v29 = vand.u32 4294901760, %v15855_v52  ;;  %v8823_v14 = vand.u32 4294901760, %v15857_v60  ;;  %v8804_v15 = vand.u32 4294901760, %v8803_v53 }
0x107c   :  { %12254 = vmatpush1.bf16.msra.mxu0 %v12253_v54  ;;  %8716 = vmatprep.mubr.f32.mxu0 %v8715_v2  ;;  %v8735_v22 = vsub.f32 %v16148_v21, %v16708_v5  ;;  %v8811_v27 = vand.u32 4294901760, %v8810_v30  ;;  %v12259_v54 = vpack.c.bf16 %v8797_v32, %v8790_v7  ;;  %v8750_v34 = vsub.f32 %v16159_v39, %v8749_v6 }
0x107d   :  { %9105 = vmatmul.mubr.f32.gmra.mrb[28].mxu1 %v16148_v21  ;;  %12255 = vmatprep.subr.bf16.mxu0 %v16555_v37  ;;  %v8824_v45 = vsub.f32 %v15857_v60, %v8823_v14  ;;  %v8745_v2 = vand.u32 4294901760, %v8744_v35  ;;  %v12373_v51 = vpack.c.bf16 %v8823_v14, %v8816_v29  ;;  %v8830_v32 = vand.u32 4294901760, %v15869_v9 }
0x107e   :  { %12368 = vmatpush1.bf16.msra.mxu1 %v12367_v16  ;;  %9111 = vmatprep.mubr.f32.mxu1 %v16140_v56  ;;  %v8817_v16 = vsub.f32 %v15855_v52, %v8816_v29  ;;  %v8736_v13 = vand.u32 4294901760, %v8735_v22  ;;  %v8837_v52 = vand.u32 4294901760, %v15874_v31  ;;  %v12262_v60 = vpack.c.bf16 %v8811_v27, %v8804_v15 }
0x107f   :  { %8722 = vmatmul.mubr.f32.gmra.mrb[22].mxu0 %v8721_v36  ;;  %12369 = vmatprep.subr.bf16.mxu1 %v16555_v37  ;;  %v8825_v53 = vand.u32 4294901760, %v8824_v45  ;;  %v8831_v30 = vsub.f32 %v15869_v9, %v8830_v32  ;;  %v8751_v36 = vand.u32 4294901760, %v8750_v34  ;;  %v8851_v5 = vand.u32 4294901760, %v15891_v47 }
0x1080   :  { %12257 = vmatpush1.bf16.msra.mxu0 %v12256_v48  ;;  %8731 = vmatprep.mubr.f32.mxu0 %v8730_v43  ;;  %v8818_v7 = vand.u32 4294901760, %v8817_v16  ;;  %v8838_v48 = vsub.f32 %v15874_v31, %v8837_v52  ;;  %v12376_v22 = vpack.c.bf16 %v8837_v52, %v8830_v32  ;;  %v8858_v15 = vand.u32 4294901760, %v15907_v20 }
0x1081   :  { %9114 = vmatmul.mubr.f32.gmra.mrb[30].mxu1 %v16159_v39  ;;  %12258 = vmatprep.subr.bf16.mxu0 %v16555_v37  ;;  %v8852_v35 = vsub.f32 %v15891_v47, %v8851_v5  ;;  %v8832_v31 = vand.u32 4294901760, %v8831_v30  ;;  %v8865_v27 = vand.u32 4294901760, %v15912_v12  ;;  %v8872_v34 = vand.u32 4294901760, %v15926_v33 }
0x1082   :  { %12371 = vmatpush1.bf16.msra.mxu1 %v12370_v11  ;;  %9389 = vmatprep.mubr.f32.mxu1 %v16048_v38  ;;  %v8844_v11 = vand.u32 4294901760, %v15889_v8  ;;  %v12265_v9 = vpack.c.bf16 %v8825_v53, %v8818_v7  ;;  %v8839_v29 = vand.u32 4294901760, %v8838_v48  ;;  %v8859_v16 = vsub.f32 %v15907_v20, %v8858_v15 }
0x1083   :  { %8737 = vmatmul.mubr.f32.gmra.mrb[24].mxu0 %v8736_v13  ;;  %12372 = vmatprep.subr.bf16.mxu1 %v16555_v37  ;;  %v8866_v45 = vsub.f32 %v15912_v12, %v8865_v27  ;;  %v12382_v13 = vpack.c.bf16 %v8865_v27, %v8858_v15 }
0x1084   :  { %12260 = vmatpush1.bf16.msra.mxu0 %v12259_v54  ;;  %8746 = vmatprep.mubr.f32.mxu0 %v8745_v2  ;;  %v8845_v43 = vsub.f32 %v15889_v8, %v8844_v11  ;;  %v12379_v14 = vpack.c.bf16 %v8851_v5, %v8844_v11  ;;  %v8853_v8 = vand.u32 4294901760, %v8852_v35  ;;  %v12268_v47 = vpack.c.bf16 %v8839_v29, %v8832_v31 }
0x1085   :  { %12261 = vmatprep.subr.bf16.mxu0 %v16555_v37  ;;  %v8879_v2 = vand.u32 4294901760, %v15931_v3  ;;  %v8860_v32 = vand.u32 4294901760, %v8859_v16  ;;  %v8867_v52 = vand.u32 4294901760, %v8866_v45  ;;  %v16719_v11 = vand.u32 4294901760, %v16148_v21 }
0x1086   :  { %12374 = vmatpush1.bf16.msra.mxu1 %v12373_v51  ;;  %v8846_v54 = vand.u32 4294901760, %v8845_v43 }
0x1087   :  { %8752 = vmatmul.mubr.f32.gmra.mrb[26].mxu0 %v8751_v36  ;;  %12375 = vmatprep.subr.bf16.mxu1 %v16555_v37  ;;  %v8880_v20 = vsub.f32 %v15931_v3, %v8879_v2  ;;  %v12385_v12 = vpack.c.bf16 %v8879_v2, %v8872_v34  ;;  %v12274_v7 = vpack.c.bf16 %v8867_v52, %v8860_v32  ;;  %v16710_v3 = vld [vmem:[#allocation26_spill] sm:$0xff]  ;;  %v16718_v36 = vand.u32 4294901760, %v16116_v63 }
0x1088   :  { %12263 = vmatpush1.bf16.msra.mxu0 %v12262_v60  ;;  %8942 = vmatprep.mubr.f32.mxu0 %v16048_v38  ;;  %v12271_v51 = vpack.c.bf16 %v8853_v8, %v8846_v54  ;;  %v8873_v60 = vsub.f32 %v15926_v33, %v8872_v34  ;;  %v16709_v33 = vand.u32 4294901760, %v16051_v40  ;;  %v16711_v40 = vld [vmem:[#allocation24_spill] sm:$0xff] }
0x1089   :  { %12264 = vmatprep.subr.bf16.mxu0 %v16555_v37  ;;  %v8881_v30 = vand.u32 4294901760, %v8880_v20 }
0x108a   :  { %12377 = vmatpush1.bf16.msra.mxu1 %v12376_v22  ;;  %v8874_v53 = vand.u32 4294901760, %v8873_v60 }
0x108b   :  { %12378 = vmatprep.subr.bf16.mxu1 %v16555_v37 }
0x108c   :  { %12266 = vmatpush1.bf16.msra.mxu0 %v12265_v9  ;;  %v12277_v48 = vpack.c.bf16 %v8881_v30, %v8874_v53 }
0x108d   :  { %12267 = vmatprep.subr.bf16.mxu0 %v16555_v37 }
0x108e   :  { %12380 = vmatpush1.bf16.msra.mxu1 %v12379_v14 }
0x108f   :  { %12381 = vmatprep.subr.bf16.mxu1 %v16555_v37 }
0x1090   :  { %12269 = vmatpush1.bf16.msra.mxu0 %v12268_v47 }
0x1091   :  { %12270 = vmatprep.subr.bf16.mxu0 %v16555_v37 }
0x1092   :  { %12383 = vmatpush1.bf16.msra.mxu1 %v12382_v13 }
0x1093   :  { %12384 = vmatprep.subr.bf16.mxu1 %v16555_v37 }
0x1094   :  { %12272 = vmatpush1.bf16.msra.mxu0 %v12271_v51 }
0x1095   :  { %12273 = vmatprep.subr.bf16.mxu0 %v16555_v37 }
0x1096   :  { %12386 = vmatpush1.bf16.msra.mxu1 %v12385_v12 }
0x1097   :  { %12387 = vmatprep.subr.bf16.mxu1 %v16555_v37 }
0x1098   :  { %12275 = vmatpush1.bf16.msra.mxu0 %v12274_v7 }
0x1099   :  { %12276 = vmatprep.subr.bf16.mxu0 %v16555_v37 }
0x109a   :  { %12389 = vmatpush1.bf16.msra.mxu1 %v16060_v57  ;;  %v16712_v57 = vld [vmem:[#allocation13_spill] sm:$0xff] }
0x109b   :  { %12390 = vmatprep.subr.bf16.mxu1 %v16555_v37 }
0x109c   :  { %12278 = vmatpush1.bf16.msra.mxu0 %v12277_v48 }
0x109d   :  { %12279 = vmatprep.subr.bf16.mxu0 %v16555_v37 }
0x109e   :  { %12392 = vmatpush1.bf16.msra.mxu1 %v16066_v61  ;;  %v16713_v61 = vand.u32 4294901760, %v16712_v57 }
0x109f   :  { %12393 = vmatprep.subr.bf16.mxu1 %v16555_v37 }
0x10a0   :  { %12281 = vmatpush1.bf16.msra.mxu0 %v16072_v1  ;;  %v16714_v1 = vld [vmem:[#allocation28_spill] sm:$0xff] }
0x10a1   :  { %12282 = vmatprep.subr.bf16.mxu0 %v16555_v37 }
0x10a2   :  { %12395 = vmatpush1.bf16.msra.mxu1 %v16074_v19  ;;  %v16715_v19 = vand.u32 4294901760, %v16714_v1 }
0x10a4   :  { %12284 = vmatpush1.bf16.msra.mxu0 %v16076_v44  ;;  %v16716_v44 = vld [vmem:[#allocation12_spill] sm:$0xff] }
0x10a5   :  { %9391 = vmatmul.mubr.f32.vlgmr.msra.gmra.mrb[32].mxu1 %v16110_v0  ;;  %12285 = vmatprep.subr.bf16.mxu0 %v16555_v37 }
0x10a6   :  { %9396 = vmatprep.mubr.f32.mxu1 %v16089_v4 }
0x10a8   :  { %12287 = vmatpush1.bf16.msra.mxu0 %v16080_v46  ;;  %v16717_v46 = vand.u32 4294901760, %v16716_v44 }
0x10a9   :  { %9398 = vmatmul.mubr.f32.gmra.mrb[34].mxu1 %v16106_v42  ;;  %12324 = vmatprep.subr.bf16.mxu0 %v16555_v37 }
0x10aa   :  { %9403 = vmatprep.mubr.f32.mxu1 %v16103_v28 }
0x10ab   :  { %8944 = vmatmul.mubr.f32.vlgmr.msra.gmra.mrb[28].mxu0 %v16110_v0 }
0x10ac   :  { %8949 = vmatprep.mubr.f32.mxu0 %v16089_v4  ;;  %12326 = vmatpush1.bf16.msra.mxu0 %v15803_v49 }
0x10ad   :  { %9405 = vmatmul.mubr.f32.gmra.mrb[36].mxu1 %v16130_v17  ;;  %12327 = vmatprep.subr.bf16.mxu0 %v16555_v37 }
0x10ae   :  { %9410 = vmatprep.mubr.f32.mxu1 %v16119_v55 }
0x10af   :  { %8951 = vmatmul.mubr.f32.gmra.mrb[30].mxu0 %v16106_v42 }
0x10b0   :  { %8956 = vmatprep.mubr.f32.mxu0 %v16103_v28  ;;  %12329 = vmatpush1.bf16.msra.mxu0 %v15816_v62 }
0x10b1   :  { %9412 = vmatmul.mubr.f32.gmra.mrb[38].mxu1 %v16133_v23  ;;  %12330 = vmatprep.subr.bf16.mxu0 %v16555_v37 }
0x10b3   :  { %8958 = vmatmul.mubr.f32.gmra.mrb[32].mxu0 %v16130_v17 }
0x10b4   :  { %8963 = vmatprep.mubr.f32.mxu0 %v16119_v55  ;;  %12332 = vmatpush1.bf16.msra.mxu0 %v15833_v10 }
0x10b5   :  { %12333 = vmatprep.subr.bf16.mxu0 %v16555_v37 }
0x10b7   :  { %8965 = vmatmul.mubr.f32.gmra.mrb[34].mxu0 %v16133_v23 }
0x10b8   :  { %12335 = vmatpush1.bf16.msra.mxu0 %v15850_v50  ;;  %9210 = vmatprep.mubr.f32.mxu0 %v16709_v33 }
0x10b9   :  { %12336 = vmatprep.subr.bf16.mxu0 %v16555_v37 }
0x10bc   :  { %12338 = vmatpush1.bf16.msra.mxu0 %v15867_v26 }
0x10bd   :  { %12339 = vmatprep.subr.bf16.mxu0 %v16555_v37 }
0x10c0   :  { %12341 = vmatpush1.bf16.msra.mxu0 %v15884_v59 }
0x10c1   :  { %12342 = vmatprep.subr.bf16.mxu0 %v16555_v37 }
0x10c4   :  { %12344 = vmatpush1.bf16.msra.mxu0 %v15905_v24 }
0x10c5   :  { %12345 = vmatprep.subr.bf16.mxu0 %v16555_v37 }
0x10c8   :  { %12347 = vmatpush1.bf16.msra.mxu0 %v15918_v58 }
0x10c9   :  { %12348 = vmatprep.subr.bf16.mxu0 %v16555_v37 }
0x10cc   :  { %12350 = vmatpush1.bf16.msra.mxu0 %v15983_v25 }
0x10cd   :  { %12351 = vmatprep.subr.bf16.mxu0 %v16555_v37 }
0x10d0   :  { %12353 = vmatpush1.bf16.msra.mxu0 %v16000_v41 }
0x10d1   :  { %12354 = vmatprep.subr.bf16.mxu0 %v16555_v37 }
0x10d4   :  { %12356 = vmatpush1.bf16.msra.mxu0 %v16710_v3 }
0x10d5   :  { %12357 = vmatprep.subr.bf16.mxu0 %v16555_v37 }
0x10d8   :  { %12359 = vmatpush1.bf16.msra.mxu0 %v16711_v40 }
0x10d9   :  { %12396 = vmatprep.subr.bf16.mxu0 %v16555_v37 }
0x10db   :  { %9214 = vmatmul.mubr.f32.vlgmr.msra.gmra.mrb[36].mxu0 %v16713_v61 }
0x10dc   :  { %9221 = vmatprep.mubr.f32.mxu0 %v16715_v19  ;;  %12398 = vmatpush1.bf16.msra.mxu0 %v15803_v49 }
0x10dd   :  { %12399 = vmatprep.subr.bf16.mxu0 %v16555_v37 }
0x10df   :  { %9225 = vmatmul.mubr.f32.gmra.mrb[38].mxu0 %v16717_v46 }
0x10e0   :  { %9232 = vmatprep.mubr.f32.mxu0 %v16718_v36  ;;  %12401 = vmatpush1.bf16.msra.mxu0 %v15816_v62 }
0x10e1   :  { %12402 = vmatprep.subr.bf16.mxu0 %v16555_v37 }
0x10e3   :  { %9236 = vmatmul.mubr.f32.gmra.mrb[40].mxu0 %v16719_v11 }
0x10e4   :  { %9243 = vmatprep.mubr.f32.mxu0 %v8743_v18  ;;  %12404 = vmatpush1.bf16.msra.mxu0 %v15833_v10 }
0x10e5   :  { %12405 = vmatprep.subr.bf16.mxu0 %v16555_v37 }
0x10e7   :  { %9247 = vmatmul.mubr.f32.gmra.mrb[42].mxu0 %v8749_v6 }
0x10e8   :  { %12407 = vmatpush1.bf16.msra.mxu0 %v15850_v50  ;;  %9506 = vmatprep.mubr.f32.mxu0 %v16048_v38 }
0x10e9   :  { %12408 = vmatprep.subr.bf16.mxu0 %v16555_v37 }
0x10ec   :  { %12410 = vmatpush1.bf16.msra.mxu0 %v15867_v26 }
0x10ed   :  { %12411 = vmatprep.subr.bf16.mxu0 %v16555_v37 }
0x10f0   :  { %12413 = vmatpush1.bf16.msra.mxu0 %v15884_v59 }
0x10f1   :  { %12414 = vmatprep.subr.bf16.mxu0 %v16555_v37 }
0x10f4   :  { %12416 = vmatpush1.bf16.msra.mxu0 %v15905_v24 }
0x10f5   :  { %12417 = vmatprep.subr.bf16.mxu0 %v16555_v37 }
0x10f8   :  { %12419 = vmatpush1.bf16.msra.mxu0 %v15918_v58 }
0x10f9   :  { %12420 = vmatprep.subr.bf16.mxu0 %v16555_v37 }
0x10fc   :  { %12422 = vmatpush1.bf16.msra.mxu0 %v15983_v25 }
0x10fd   :  { %12423 = vmatprep.subr.bf16.mxu0 %v16555_v37 }
0x1100   :  { %12425 = vmatpush1.bf16.msra.mxu0 %v16000_v41 }
0x1101   :  { %12426 = vmatprep.subr.bf16.mxu0 %v16555_v37 }
0x1104   :  { %12428 = vmatpush1.bf16.msra.mxu0 %v16710_v3 }
0x1105   :  { %12429 = vmatprep.subr.bf16.mxu0 %v16555_v37 }
0x1108   :  { %12431 = vmatpush1.bf16.msra.mxu0 %v16711_v40 }
0x110b   :  { %9508 = vmatmul.mubr.f32.vlgmr.msra.gmra.mrb[44].mxu0 %v16110_v0 }
0x110c   :  { %9513 = vmatprep.mubr.f32.mxu0 %v16089_v4 }
0x110f   :  { %9515 = vmatmul.mubr.f32.gmra.mrb[46].mxu0 %v16106_v42 }
0x1110   :  { %9520 = vmatprep.mubr.f32.mxu0 %v16103_v28 }
0x1113   :  { %9522 = vmatmul.mubr.f32.gmra.mrb[48].mxu0 %v16130_v17 }
0x1114   :  { %9527 = vmatprep.mubr.f32.mxu0 %v16119_v55 }
0x1117   :  { %9529 = vmatmul.mubr.f32.gmra.mrb[50].mxu0 %v16133_v23  ;;  %v9587_v23 = vld [vmem:[%s16365_s24] ss:$0 sm:$0xff]  ;;  %s12788_s24 = smov [#allocation3]  }
0x1118   :  { %s9547_s15 = sshll.u32 %s12788_s24, 4  ;;  %s9548_s15 = int_to_ptr.vmem [resolvable:$true] %s9547_s15 }
0x1119   :  { %s12756_s17 = scalar_lea.vmem %s9548_s15, 512  ;;  %p12761_p1 = scmp.lt.s32.totalorder %s9548_s15, %s9548_s15 }
0x111a   :  { %p12757_p0 = scmp.ne.s32.totalorder %s9548_s15, %s12756_s17  ;;  %p12762_p2 = scmp.lt.s32.totalorder %s12756_s17, %s12756_s17 }
0x111c   :  { %p12763_p3 = por %p12762_p2, %p12761_p1 }
0x111e   :  { %p12764_p4 = pnand %p12763_p3, %p12757_p0 }
0x1148   :  { %v9088_v49 = vpop.f32.mrb[24].mxu1 }
0x1149   :  { %v9090_v62 = vpop.f32.mrb[25].mxu1 }
0x114c   :  { %v9097_v10 = vpop.f32.mrb[26].mxu1 }
0x114d   :  { %v9099_v37 = vpop.f32.mrb[27].mxu1 }
0x114e   :  { %v8708_v50 = vpop.f32.mrb[20].mxu0 }
0x114f   :  { %v8710_v26 = vpop.f32.mrb[21].mxu0  ;;  %v8709_v56 = vadd.f32 %v9587_v23, %v8708_v50 }
0x1150   :  { %v9106_v59 = vpop.f32.mrb[28].mxu1  ;;  %v16721_v26 = vld [vmem:[#allocation27_spill] sm:$0xff] }
0x1151   :  { %v9108_v24 = vpop.f32.mrb[29].mxu1 }
0x1152   :  { %v8723_v58 = vpop.f32.mrb[22].mxu0 }
0x1153   :  { %v8725_v25 = vpop.f32.mrb[23].mxu0  ;;  %v8724_v22 = vadd.f32 %v9587_v23, %v8723_v58 }
0x1154   :  { %v9115_v41 = vpop.f32.mrb[30].mxu1 }
0x1155   :  { %v9117_v38 = vpop.f32.mrb[31].mxu1 }
0x1156   :  { %v8738_v4 = vpop.f32.mrb[24].mxu0 }
0x1157   :  { %v8740_v28 = vpop.f32.mrb[25].mxu0  ;;  %v8739_v15 = vadd.f32 %v9587_v23, %v8738_v4 }
0x115a   :  { %v8753_v42 = vpop.f32.mrb[26].mxu0 }
0x115b   :  { %v8755_v0 = vpop.f32.mrb[27].mxu0  ;;  %v8754_v45 = vadd.f32 %v9587_v23, %v8753_v42 }
0x115c   :  { %v16723_v0 = vld [vmem:[#allocation22_spill] sm:$0xff] }
0x1178   :  { %v9392_v63 = vpop.f32.mrb[32].mxu1 }
0x1179   :  { %v9394_v55 = vpop.f32.mrb[33].mxu1 }
0x117c   :  { %v9399_v17 = vpop.f32.mrb[34].mxu1 }
0x117d   :  { %v9401_v21 = vpop.f32.mrb[35].mxu1 }
0x117e   :  { %v8945_v39 = vpop.f32.mrb[28].mxu0 }
0x117f   :  { %v8946_v18 = vadd.f32 %v8945_v39, %v8709_v56  ;;  %v8947_v6 = vpop.f32.mrb[29].mxu0 }
0x1180   :  { %v9406_v5 = vpop.f32.mrb[36].mxu1 }
0x1181   :  { %v9408_v43 = vpop.f32.mrb[37].mxu1  ;;  %v9089_v35 = vadd.f32 %v9088_v49, %v8946_v18  ;;  %v16720_v49 = vld [vmem:[#allocation21_spill] sm:$0xff] }
0x1182   :  { %v8952_v9 = vpop.f32.mrb[30].mxu0 }
0x1183   :  { %v8953_v31 = vadd.f32 %v8952_v9, %v8724_v22  ;;  %v8954_v29 = vpop.f32.mrb[31].mxu0 }
0x1184   :  { %v9413_v14 = vpop.f32.mrb[38].mxu1 }
0x1185   :  { %v9415_v27 = vpop.f32.mrb[39].mxu1  ;;  %v9098_v54 = vadd.f32 %v9097_v10, %v8953_v31 }
0x1186   :  { %v8959_v8 = vpop.f32.mrb[32].mxu0 }
0x1187   :  { %v8960_v47 = vadd.f32 %v8959_v8, %v8739_v15  ;;  %v8961_v16 = vpop.f32.mrb[33].mxu0 }
0x1189   :  { %v9107_v13 = vadd.f32 %v9106_v59, %v8960_v47 }
0x118a   :  { %v8966_v34 = vpop.f32.mrb[34].mxu0 }
0x118b   :  { %v8967_v2 = vadd.f32 %v8966_v34, %v8754_v45  ;;  %v8968_v51 = vpop.f32.mrb[35].mxu0 }
0x118d   :  { %v9116_v32 = vadd.f32 %v9115_v41, %v8967_v2  ;;  %v16722_v41 = vld [vmem:[#allocation23_spill] sm:$0xff] }
0x11ae   :  { %v9215_v52 = vpop.f32.mrb[36].mxu0 }
0x11af   :  { %v9216_v60 = vadd.f32 %v9215_v52, %v9089_v35  ;;  %v9217_v20 = vpop.f32.mrb[37].mxu0 }
0x11b1   :  { %v9393_v12 = vadd.f32 %v9392_v63, %v9216_v60 }
0x11b2   :  { %v9226_v7 = vpop.f32.mrb[38].mxu0 }
0x11b3   :  { %v9227_v53 = vadd.f32 %v9226_v7, %v9098_v54  ;;  %v9228_v30 = vpop.f32.mrb[39].mxu0 }
0x11b5   :  { %v9400_v48 = vadd.f32 %v9399_v17, %v9227_v53 }
0x11b6   :  { %v9237_v33 = vpop.f32.mrb[40].mxu0 }
0x11b7   :  { %v9238_v3 = vadd.f32 %v9237_v33, %v9107_v13  ;;  %v9239_v40 = vpop.f32.mrb[41].mxu0 }
0x11b9   :  { %v9407_v57 = vadd.f32 %v9406_v5, %v9238_v3 }
0x11ba   :  { %v9248_v61 = vpop.f32.mrb[42].mxu0 }
0x11bb   :  { %v9249_v1 = vadd.f32 %v9248_v61, %v9116_v32  ;;  %v9250_v19 = vpop.f32.mrb[43].mxu0 }
0x11bd   :  { %v9414_v44 = vadd.f32 %v9413_v14, %v9249_v1 }
0x11de   :  { %v9509_v46 = vpop.f32.mrb[44].mxu0 }
0x11df   :  { %v9510_v36 = vadd.f32 %v9509_v46, %v9393_v12  ;;  %v9511_v11 = vpop.f32.mrb[45].mxu0 }
0x11e1   :  { %v9534_v62 = vadd.f32 %v9510_v36, %v16720_v49 }
0x11e2   :  { %v9516_v10 = vpop.f32.mrb[46].mxu0 }
0x11e3   :  { %9538 = vst.msk [vmem:[#allocation3] sm:$0xff] %vm3242_vm10, %v9534_v62  ;;  %v9517_v37 = vadd.f32 %v9516_v10, %v9400_v48  ;;  %v9518_v50 = vpop.f32.mrb[47].mxu0 }
0x11e5   :  { %v9535_v59 = vadd.f32 %v9517_v37, %v16721_v26 }
0x11e6   :  { %v9523_v24 = vpop.f32.mrb[48].mxu0 }
0x11e7   :  { %9539 = vst.msk [vmem:[#allocation3 + $0x8] sm:$0xff] %vm3242_vm10, %v9535_v59  ;;  %v9524_v58 = vadd.f32 %v9523_v24, %v9407_v57  ;;  %v9525_v25 = vpop.f32.mrb[49].mxu0 }
0x11e9   :  { %v9536_v38 = vadd.f32 %v9524_v58, %v16722_v41 }
0x11ea   :  { %v9530_v4 = vpop.f32.mrb[50].mxu0 }
0x11eb   :  { %9540 = vst.msk [vmem:[#allocation3 + $0x10] sm:$0xff] %vm3242_vm10, %v9536_v38  ;;  %v9531_v28 = vadd.f32 %v9530_v4, %v9414_v44  ;;  %v9532_v42 = vpop.f32.mrb[51].mxu0 }
0x11ed   :  { %v9537_v63 = vadd.f32 %v9531_v28, %v16723_v0 }
0x11ef   :  { %9541 = vst.msk [vmem:[#allocation3 + $0x18] sm:$0xff] %vm3242_vm10, %v9537_v63 }
0x11f0   :  { %12767 = shalt.err (!%p12764_p4)
}
0x11f1   :  { %s12768_s18 = scalar_lea.hbm %s16366_s25, 512 }
0x11f2   :  { %p12769_p5 = scmp.ne.s32.totalorder %s16366_s25, %s12768_s18  ;;  %p12772_p6 = scmp.lt.u32.totalorder %s12768_s18, %s16366_s25 }
0x11f4   :  { %p12774_p7 = pnand %p12772_p6, %p12769_p5 }
0x11f6   :  { %12777 = shalt.err (!%p12774_p7)
}
0x11f7   :  { %s12789_s27 = smov 128  }
0x11f8   :  { %9553 = dma.vmem_to_hbm [thread:$0]  %s9548_s15, 512, %s16366_s25, [#allocation4], %s12789_s27, %s12789_s27, %s12780_s30  }
0x11f9   :  { %12778 = dma.done.wait [#allocation4], 512  }
0x11fa   :  { %12779 = vsyncadd [#allocation4], 4294966784 }
0x11fb   :  { %9557 = vsyncpa [#allocation4], 1 }

</bundles_post_ra>
